<compile_context>
chip_gen: v6e
topology: v6e:2x2x1
jax: 0.10.0
libtpu: 0.0.40
codegen_flags: <defaults>
</compile_context>

<pallas_src>
import math
import functools

import jax
import jax.numpy as jnp
from jax.experimental import pallas as pl
from jax.experimental.pallas import tpu as pltpu


# ----------------------------------------------------------------------------
# Small helpers
# ----------------------------------------------------------------------------

def _const_spec(shape, index_map):
    """BlockSpec for a grid-constant operand: single-buffered when supported."""
    try:
        return pl.BlockSpec(shape, index_map, pipeline_mode=pl.Buffered(1))
    except Exception:  # older jax without pipeline_mode / Buffered
        return pl.BlockSpec(shape, index_map)


def _clamp_vmem(est_bytes):
    # explicit scoped-VMEM budget: generous floor, never above v7x physical.
    return int(min(max(est_bytes, 32 << 20), 64 << 20))


def _row_cap():
    """Row-tile cap for FFN/norm kernels: 256 on 64-MiB-VMEM chips, else 512."""
    try:
        if pltpu.get_tpu_info().vmem_capacity_bytes <= (64 << 20):
            return 256
    except Exception:
        pass
    return 512


# ----------------------------------------------------------------------------
# Attention block kernel (pre-norm + MHA + out-proj + residual, fused)
# ----------------------------------------------------------------------------

def _make_attn_kernel(*, heads, eps, self_kv, causal):
    def kernel(*args):
        idx = 0
        if causal:
            thr_ref = args[idx]; idx += 1              # (B,) int32 in SMEM (prefetch)
        xq_ref = args[idx]; idx += 1                   # (1, Sq, D)
        if not self_kv:
            xkv_ref = args[idx]; idx += 1              # (1, Sk, D)
        if not causal:
            keep_ref = args[idx]; idx += 1             # (1, 1, Sk) keep-mask
        (g_ref, bt_ref,
         wq_ref, wk_ref, wv_ref,
         bq_ref, bk_ref, bv_ref,
         wo_ref, bo_ref, o_ref) = args[idx:]

        Sq, D = xq_ref.shape[-2], xq_ref.shape[-1]
        dh = D // heads
        scale = 1.0 / math.sqrt(dh)

        xq = xq_ref[0].astype(jnp.float32)                               # (Sq, D)

        # Pre-norm on the query stream (torch "Norm": unbiased std, eps on std).
        mu = jnp.mean(xq, axis=-1, keepdims=True)
        xc = xq - mu
        var = jnp.sum(xc * xc, axis=-1, keepdims=True) / (D - 1)
        xq_n = (g_ref[...].astype(jnp.float32) * xc / (jnp.sqrt(var) + eps)
                + bt_ref[...].astype(jnp.float32))

        if self_kv:
            kv_src = xq_n
            Sk = Sq
        else:
            kv_src = xkv_ref[0].astype(jnp.float32)                      # (Sk, D)
            Sk = kv_src.shape[0]

        # Additive attention bias, generated in-kernel (never stored in HBM).
        if causal:
            thr = thr_ref[pl.program_id(0)]
            qi = jax.lax.broadcasted_iota(jnp.int32, (Sq, Sk), 0)
            ki = jax.lax.broadcasted_iota(jnp.int32, (Sq, Sk), 1)
            keep = (ki <= qi) & (qi < thr)
            bias = jnp.where(keep, 0.0, -1e9).astype(jnp.float32)        # (Sq, Sk)
        else:
            keep = keep_ref[0].astype(jnp.float32)                       # (1, Sk)
            bias = jnp.where(keep > 0.0, 0.0, -1e9).astype(jnp.float32)  # broadcasts

        xq_b = xq_n.astype(jnp.bfloat16)
        kv_b = kv_src.astype(jnp.bfloat16)

        def head_body(h, acc):
            # Correctly-sized per-head contractions; weights are bf16.
            q = (jnp.dot(xq_b, wq_ref[h], preferred_element_type=jnp.float32)
                 + bq_ref[h].astype(jnp.float32)) * scale                # (Sq, dh)
            k = (jnp.dot(kv_b, wk_ref[h], preferred_element_type=jnp.float32)
                 + bk_ref[h].astype(jnp.float32))                        # (Sk, dh)
            v = (jnp.dot(kv_b, wv_ref[h], preferred_element_type=jnp.float32)
                 + bv_ref[h].astype(jnp.float32))                        # (Sk, dh)
            s = jax.lax.dot_general(q.astype(jnp.bfloat16), k.astype(jnp.bfloat16),
                                    (((1,), (1,)), ((), ())),
                                    preferred_element_type=jnp.float32) + bias
            s_max = jnp.max(s, axis=-1, keepdims=True)
            p = jnp.exp(s - s_max)
            p = p * pl.reciprocal(jnp.sum(p, axis=-1, keepdims=True), approx=True)
            o = jnp.dot(p.astype(jnp.bfloat16), v.astype(jnp.bfloat16),
                        preferred_element_type=jnp.float32)              # (Sq, dh)
            # Output projection fused per head: acc += o @ Wo[h].
            return acc + jnp.dot(o.astype(jnp.bfloat16), wo_ref[h],
                                 preferred_element_type=jnp.float32)     # (Sq, D)

        acc = jax.lax.fori_loop(0, heads, head_body,
                                jnp.zeros((Sq, D), jnp.float32), unroll=True)
        out = acc + bo_ref[...].astype(jnp.float32)
        o_ref[0] = (xq + out).astype(o_ref.dtype)                        # residual add
    return kernel


def attn_block_pallas(xq, kv, mask_arg, gamma, beta, w, *, heads, eps=1e-6,
                      self_kv=False, causal=True):
    """Fused pre-norm + multi-head attention + output projection + residual.

    xq:       (B, Sq, D) query-stream activations.
    kv:       (B, Sk, D) K/V memory (ignored when self_kv=True).
    mask_arg: causal=True  -> (B,) int32 per-batch row threshold (scalar prefetch)
              causal=False -> (B, 1, Sk) float keep-mask.
    w:        dict of per-head weights (bf16) and biases (f32).
    """
    B, Sq, D = xq.shape
    heads_, _, dh = w["wq"].shape
    assert heads_ == heads and heads * dh == D
    Sk = Sq if self_kv else kv.shape[1]

    def amap(b, *_):
        return (b, 0, 0)

    def cmap2(*_):
        return (0, 0)

    def cmap3(*_):
        return (0, 0, 0)

    in_specs = [pl.BlockSpec((1, Sq, D), amap)]
    operands = [xq]
    if not self_kv:
        in_specs.append(pl.BlockSpec((1, Sk, D), amap))
        operands.append(kv)
    if not causal:
        in_specs.append(pl.BlockSpec((1, 1, Sk), amap))
        operands.append(mask_arg)
    in_specs += [
        _const_spec((1, D), cmap2), _const_spec((1, D), cmap2),
        _const_spec((heads, D, dh), cmap3), _const_spec((heads, D, dh), cmap3),
        _const_spec((heads, D, dh), cmap3),
        _const_spec((heads, 1, dh), cmap3), _const_spec((heads, 1, dh), cmap3),
        _const_spec((heads, 1, dh), cmap3),
        _const_spec((heads, dh, D), cmap3),
        _const_spec((1, D), cmap2),
    ]
    operands += [gamma.reshape(1, D), beta.reshape(1, D),
                 w["wq"], w["wk"], w["wv"],
                 w["bq"], w["bk"], w["bv"],
                 w["wo"], w["bo"].reshape(1, D)]

    # VMEM budget: activations double-buffered, weights single-buffered,
    # plus in-kernel intermediates (bias / scores / accumulator / head tiles).
    act = (Sq * D + (0 if self_kv else Sk * D) + Sq * D) * 4
    if not causal:
        act += Sk * 4
    wts = (3 * heads * D * dh + heads * dh * D) * 2 + (3 * heads * dh + 3 * D) * 4
    tmp = (2 * Sq * Sk + 3 * Sq * D + 2 * (Sq + 2 * Sk) * dh) * 4
    vmem_limit = _clamp_vmem(2 * act + wts + 2 * tmp + (2 << 20))

    grid_spec = pltpu.PrefetchScalarGridSpec(
        num_scalar_prefetch=1 if causal else 0,
        grid=(B,),
        in_specs=in_specs,
        out_specs=pl.BlockSpec((1, Sq, D), amap),
    )
    call = pl.pallas_call(
        _make_attn_kernel(heads=heads, eps=eps, self_kv=self_kv, causal=causal),
        out_shape=jax.ShapeDtypeStruct((B, Sq, D), xq.dtype),
        grid_spec=grid_spec,
        compiler_params=pltpu.CompilerParams(
            dimension_semantics=("parallel",),
            vmem_limit_bytes=vmem_limit),
    )
    if causal:
        return call(mask_arg, *operands)
    return call(*operands)


# ----------------------------------------------------------------------------
# FFN ("Conv" pointwise feed-forward) block and final norm kernels
# ----------------------------------------------------------------------------

def _ffn_block_kernel(x_ref, g_ref, bt_ref, w1_ref, b1_ref, w2_ref, b2_ref, o_ref,
                      *, eps):
    """Fused: pre-norm -> pointwise-conv FF1 -> ReLU -> FF2 -> +residual."""
    x = x_ref[...].astype(jnp.float32)                                   # (bm, D)
    D = x.shape[-1]
    mu = jnp.mean(x, axis=-1, keepdims=True)
    xc = x - mu
    var = jnp.sum(xc * xc, axis=-1, keepdims=True) / (D - 1)
    xn = (g_ref[...].astype(jnp.float32) * xc / (jnp.sqrt(var) + eps)
          + bt_ref[...].astype(jnp.float32))
    h = jnp.dot(xn.astype(jnp.bfloat16), w1_ref[...],
                preferred_element_type=jnp.float32) + b1_ref[...].astype(jnp.float32)
    h = jnp.maximum(h, 0.0)
    y = jnp.dot(h.astype(jnp.bfloat16), w2_ref[...],
                preferred_element_type=jnp.float32) + b2_ref[...].astype(jnp.float32)
    o_ref[...] = (x + y).astype(o_ref.dtype)


def ffn_block_pallas(x, gamma, beta, w1, b1, w2, b2, eps=1e-6):
    orig = x.shape
    D = orig[-1]
    d_ff = w1.shape[1]
    x2 = x.reshape(-1, D)
    M = x2.shape[0]
    cap = _row_cap()
    bm = M if M <= cap else cap
    M_pad = ((M + bm - 1) // bm) * bm
    if M_pad != M:
        x2 = jnp.pad(x2, ((0, M_pad - M), (0, 0)))

    act = bm * D * 4 * 2
    wts = 2 * D * d_ff * 2 + (d_ff + 3 * D) * 4
    tmp = (2 * bm * d_ff + 3 * bm * D) * 4
    vmem_limit = _clamp_vmem(2 * act + wts + tmp + (2 << 20))

    out = pl.pallas_call(
        functools.partial(_ffn_block_kernel, eps=eps),
        out_shape=jax.ShapeDtypeStruct((M_pad, D), x.dtype),
        grid=(M_pad // bm,),
        in_specs=[
            pl.BlockSpec((bm, D), lambda i: (i, 0)),
            _const_spec((1, D), lambda i: (0, 0)),
            _const_spec((1, D), lambda i: (0, 0)),
            _const_spec((D, d_ff), lambda i: (0, 0)),
            _const_spec((1, d_ff), lambda i: (0, 0)),
            _const_spec((d_ff, D), lambda i: (0, 0)),
            _const_spec((1, D), lambda i: (0, 0)),
        ],
        out_specs=pl.BlockSpec((bm, D), lambda i: (i, 0)),
        compiler_params=pltpu.CompilerParams(
            dimension_semantics=("parallel",),
            vmem_limit_bytes=vmem_limit),
    )(x2, gamma.reshape(1, D), beta.reshape(1, D),
      w1, b1.reshape(1, d_ff), w2, b2.reshape(1, D))
    return out[:M].reshape(orig)


def _norm_kernel(x_ref, g_ref, bt_ref, o_ref, *, eps):
    x = x_ref[...].astype(jnp.float32)
    D = x.shape[-1]
    mu = jnp.mean(x, axis=-1, keepdims=True)
    xc = x - mu
    var = jnp.sum(xc * xc, axis=-1, keepdims=True) / (D - 1)  # unbiased (.std())
    o_ref[...] = (g_ref[...].astype(jnp.float32) * xc / (jnp.sqrt(var) + eps)
                  + bt_ref[...].astype(jnp.float32)).astype(o_ref.dtype)


def norm_pallas(x, gamma, beta, eps=1e-6):
    orig = x.shape
    D = orig[-1]
    x2 = x.reshape(-1, D)
    M = x2.shape[0]
    cap = _row_cap()
    bm = M if M <= cap else cap
    M_pad = ((M + bm - 1) // bm) * bm
    if M_pad != M:
        x2 = jnp.pad(x2, ((0, M_pad - M), (0, 0)))
    vmem_limit = _clamp_vmem(6 * bm * D * 4 + (2 << 20))
    out = pl.pallas_call(
        functools.partial(_norm_kernel, eps=eps),
        out_shape=jax.ShapeDtypeStruct((M_pad, D), x.dtype),
        grid=(M_pad // bm,),
        in_specs=[
            pl.BlockSpec((bm, D), lambda i: (i, 0)),
            _const_spec((1, D), lambda i: (0, 0)),
            _const_spec((1, D), lambda i: (0, 0)),
        ],
        out_specs=pl.BlockSpec((bm, D), lambda i: (i, 0)),
        compiler_params=pltpu.CompilerParams(
            dimension_semantics=("parallel",),
            vmem_limit_bytes=vmem_limit),
    )(x2, gamma.reshape(1, D), beta.reshape(1, D))
    return out[:M].reshape(orig)


# ----------------------------------------------------------------------------
# Model pieces built from the fused kernels
# ----------------------------------------------------------------------------

def duplex_decoder_layer(x, y, e_outputs, src_keep, thr, p, heads):
    # TODO(synk): DuplexDecoderLayerConv source was not provided; this is a
    # standard pre-norm reconstruction (masked self-attn + cross-attn + conv-FFN
    # on the x stream; y attends to x + conv-FFN on the y stream).
    x = attn_block_pallas(x, None, thr, p["n1_g"], p["n1_b"], p["self_attn"],
                          heads=heads, self_kv=True, causal=True)
    x = attn_block_pallas(x, e_outputs, src_keep, p["n2_g"], p["n2_b"],
                          p["cross_attn"], heads=heads, self_kv=False, causal=False)
    x = ffn_block_pallas(x, p["n3_g"], p["n3_b"],
                         p["ff_x"]["w1"], p["ff_x"]["b1"],
                         p["ff_x"]["w2"], p["ff_x"]["b2"])
    y = attn_block_pallas(y, x, thr, p["n4_g"], p["n4_b"], p["y_attn"],
                          heads=heads, self_kv=False, causal=True)
    y = ffn_block_pallas(y, p["n5_g"], p["n5_b"],
                         p["ff_y"]["w1"], p["ff_y"]["b1"],
                         p["ff_y"]["w2"], p["ff_y"]["b2"])
    return x, y


def compute_row_threshold(trg):
    """Per-batch query-row threshold reproducing create_combined_mask's row
    zeroing: query row q of batch b is kept iff q < thr[b] (plus causality)."""
    B, S = trg.shape
    is_pad = (trg == 0)
    first_pad = jnp.argmax(is_pad, axis=1)
    has_pad = jnp.any(is_pad, axis=1)
    padding_start = jnp.where(has_pad, first_pad, 0)
    big = S + 1
    r = jnp.where(padding_start != 0, padding_start, big)
    r = jnp.where(jnp.arange(B) <= B - 2, r, big)
    thr = jax.lax.associative_scan(jnp.minimum, r)   # cumulative min over batches
    return thr.astype(jnp.int32)


def sinusoidal_pe(S, D):
    pos = jnp.arange(S, dtype=jnp.float32)[:, None]
    i = jnp.arange(0, D, 2, dtype=jnp.float32)
    angle = pos / jnp.power(10000.0, i / D)
    pe = jnp.zeros((S, D), jnp.float32)
    pe = pe.at[:, 0::2].set(jnp.sin(angle))
    pe = pe.at[:, 1::2].set(jnp.cos(angle))
    return pe


def duplex_decoder_conv_forward(params, trg, e_outputs, src_mask, *, heads, N, d_model):
    B, S = trg.shape
    S_src = e_outputs.shape[1]

    # y = self.y.expand(B, -1, -1)
    y = jnp.broadcast_to(params["y"], (B,) + params["y"].shape)

    # embedding gather (padding row 0 is zero) + scaled positional encoding
    x = jnp.take(params["emb"], trg, axis=0)
    # TODO(synk): ScaledPositionalEncoding source not provided; using
    # x * sqrt(d_model) + alpha * PE with learnable alpha (init 1.0).
    x = x * math.sqrt(d_model) + params["pe_alpha"] * params["pe"][None, :S, :]

    # Per-batch row threshold replaces the (B, S, S) combined mask; the source
    # keep-mask stays (B, 1, S_src).  Biases are generated inside the kernels.
    thr = compute_row_threshold(trg)
    src_keep = src_mask.astype(jnp.float32).reshape(B, 1, S_src)

    for i in range(N):
        x, y = duplex_decoder_layer(x, y, e_outputs, src_keep, thr,
                                    params["layers"][i], heads)
    return norm_pallas(x, params["norm_g"], params["norm_b"])


# ----------------------------------------------------------------------------
# Deterministic parameter initialization (weights pre-split per head, bf16)
# ----------------------------------------------------------------------------

def _init_linear(key, K, N_):
    w = jax.random.normal(key, (K, N_), jnp.float32) * (1.0 / math.sqrt(K))
    b = jnp.zeros((N_,), jnp.float32)
    return w, b


def _init_mha(key, d_model, heads):
    dh = d_model // heads
    ks = jax.random.split(key, 4)
    wq, bq = _init_linear(ks[0], d_model, d_model)
    wk, bk = _init_linear(ks[1], d_model, d_model)
    wv, bv = _init_linear(ks[2], d_model, d_model)
    wo, bo = _init_linear(ks[3], d_model, d_model)

    def cols(w):   # (D, D) -> (H, D, dh): per-head output columns, bf16 MXU feed
        return jnp.transpose(w.reshape(d_model, heads, dh), (1, 0, 2)).astype(jnp.bfloat16)

    return {
        "wq": cols(wq), "wk": cols(wk), "wv": cols(wv),
        "bq": bq.reshape(heads, 1, dh),
        "bk": bk.reshape(heads, 1, dh),
        "bv": bv.reshape(heads, 1, dh),
        "wo": wo.reshape(heads, dh, d_model).astype(jnp.bfloat16),  # per-head rows
        "bo": bo,                                                   # (D,) f32
    }


def _init_layer(key, d_model, d_ff, heads):
    ks = jax.random.split(key, 7)
    w1, b1 = _init_linear(ks[0], d_model, d_ff)
    w2, b2 = _init_linear(ks[1], d_ff, d_model)
    w3, b3 = _init_linear(ks[2], d_model, d_ff)
    w4, b4 = _init_linear(ks[3], d_ff, d_model)
    p = {
        "self_attn": _init_mha(ks[4], d_model, heads),
        "cross_attn": _init_mha(ks[5], d_model, heads),
        "y_attn": _init_mha(ks[6], d_model, heads),
        "ff_x": {"w1": w1.astype(jnp.bfloat16), "b1": b1,
                 "w2": w2.astype(jnp.bfloat16), "b2": b2},
        "ff_y": {"w1": w3.astype(jnp.bfloat16), "b1": b3,
                 "w2": w4.astype(jnp.bfloat16), "b2": b4},
    }
    for n in range(1, 6):
        p[f"n{n}_g"] = jnp.ones((d_model,), jnp.float32)
        p[f"n{n}_b"] = jnp.zeros((d_model,), jnp.float32)
    return p


def init_params(key, vocab_len, max_seq_length, d_model, d_ff, N, heads):
    S = max_seq_length - 1
    keys = jax.random.split(key, N + 3)
    emb = jax.random.normal(keys[0], (vocab_len, d_model), jnp.float32)
    emb = emb.at[0].set(0.0)  # padding_idx=0
    y = jax.random.normal(keys[1], (S, d_model), jnp.float32)  # nn.Parameter
    return {
        "emb": emb,
        "y": y,
        "pe": sinusoidal_pe(S, d_model),
        "pe_alpha": jnp.float32(1.0),
        "norm_g": jnp.ones((d_model,), jnp.float32),
        "norm_b": jnp.zeros((d_model,), jnp.float32),
        "layers": [_init_layer(keys[2 + i], d_model, d_ff, heads) for i in range(N)],
    }


# ----------------------------------------------------------------------------
# Main
# ----------------------------------------------------------------------------

if __name__ == "__main__":
    vocab_len = 11
    max_seq_length = 9          # -> decoder sequence length S = 8
    d_model = 32
    d_ff = 64
    N = 2
    heads = 4
    B = 2
    S = max_seq_length - 1
    S_src = 8
    assert d_model % heads == 0

    root = jax.random.PRNGKey(0)
    k_par, k_trg, k_enc = jax.random.split(root, 3)

    params = init_params(k_par, vocab_len, max_seq_length, d_model, d_ff, N, heads)

    # target tokens (0 == padding); give batch 1 some trailing padding
    trg = jax.random.randint(k_trg, (B, S), 1, vocab_len, dtype=jnp.int32)
    trg = trg.at[1, 6:].set(0)

    # encoder outputs and source padding mask
    e_outputs = jax.random.normal(k_enc, (B, S_src, d_model), jnp.float32)
    src_mask = jnp.ones((B, 1, S_src), jnp.float32).at[1, 0, 7].set(0.0)

    fwd = jax.jit(
        functools.partial(duplex_decoder_conv_forward, heads=heads, N=N, d_model=d_model)
    )
    out = fwd(params, trg, e_outputs, src_mask)
    jax.block_until_ready(out)

    assert out.shape == (B, S, d_model), out.shape
    assert bool(jnp.all(jnp.isfinite(out)))
    print("KERNEL_OK")
</pallas_src>

<mosaic_0001>
module attributes {stable_mosaic.version = 11 : i64} {
  func.func @kernel(%arg0: i32, %arg1: memref<2xi32, #tpu.memory_space<smem>>, %arg2: memref<1x8x32xf32, #tpu.memory_space<vmem>>, %arg3: memref<1x32xf32, #tpu.memory_space<vmem>>, %arg4: memref<1x32xf32, #tpu.memory_space<vmem>>, %arg5: memref<4x32x8xbf16, #tpu.memory_space<vmem>>, %arg6: memref<4x32x8xbf16, #tpu.memory_space<vmem>>, %arg7: memref<4x32x8xbf16, #tpu.memory_space<vmem>>, %arg8: memref<4x1x8xf32, #tpu.memory_space<vmem>>, %arg9: memref<4x1x8xf32, #tpu.memory_space<vmem>>, %arg10: memref<4x1x8xf32, #tpu.memory_space<vmem>>, %arg11: memref<4x8x32xbf16, #tpu.memory_space<vmem>>, %arg12: memref<1x32xf32, #tpu.memory_space<vmem>>, %arg13: memref<1x8x32xf32, #tpu.memory_space<vmem>>) attributes {dimension_semantics = [#tpu.dimension_semantics<parallel>], iteration_bounds = array<i64: 2>, scalar_prefetch = 1 : i64, scratch_operands = 0 : i64, tpu.core_type = #tpu.core_type<tc>, window_params = [{transform_indices = @transform_0, window_bounds = array<i64: 1, 8, 32>}, {pipeline_mode = #tpu.pipeline_mode<synchronous>, transform_indices = @transform_1, window_bounds = array<i64: 1, 32>}, {pipeline_mode = #tpu.pipeline_mode<synchronous>, transform_indices = @transform_2, window_bounds = array<i64: 1, 32>}, {pipeline_mode = #tpu.pipeline_mode<synchronous>, transform_indices = @transform_3, window_bounds = array<i64: 4, 32, 8>}, {pipeline_mode = #tpu.pipeline_mode<synchronous>, transform_indices = @transform_4, window_bounds = array<i64: 4, 32, 8>}, {pipeline_mode = #tpu.pipeline_mode<synchronous>, transform_indices = @transform_5, window_bounds = array<i64: 4, 32, 8>}, {pipeline_mode = #tpu.pipeline_mode<synchronous>, transform_indices = @transform_6, window_bounds = array<i64: 4, 1, 8>}, {pipeline_mode = #tpu.pipeline_mode<synchronous>, transform_indices = @transform_7, window_bounds = array<i64: 4, 1, 8>}, {pipeline_mode = #tpu.pipeline_mode<synchronous>, transform_indices = @transform_8, window_bounds = array<i64: 4, 1, 8>}, {pipeline_mode = #tpu.pipeline_mode<synchronous>, transform_indices = @transform_9, window_bounds = array<i64: 4, 8, 32>}, {pipeline_mode = #tpu.pipeline_mode<synchronous>, transform_indices = @transform_10, window_bounds = array<i64: 1, 32>}, {transform_indices = @transform_11, window_bounds = array<i64: 1, 8, 32>}]} {
    %c0 = arith.constant 0 : index
    %c0_0 = arith.constant 0 : index
    %c0_1 = arith.constant 0 : index
    %0 = vector.load %arg2[%c0, %c0_0, %c0_1] : memref<1x8x32xf32, #tpu.memory_space<vmem>>, vector<1x8x32xf32>
    %1 = vector.shape_cast %0 : vector<1x8x32xf32> to vector<8x32xf32>
    %cst = arith.constant dense<0.000000e+00> : vector<8xf32>
    %2 = vector.multi_reduction <add>, %1, %cst [1] : vector<8x32xf32> to vector<8xf32>
    %3 = vector.shape_cast %2 : vector<8xf32> to vector<8x1xf32>
    %cst_2 = arith.constant 3.200000e+01 : f32
    %4 = vector.broadcast %cst_2 : f32 to vector<8x1xf32>
    %5 = arith.divf %3, %4 : vector<8x1xf32>
    %6 = vector.broadcast %5 : vector<8x1xf32> to vector<8x32xf32>
    %7 = arith.subf %1, %6 : vector<8x32xf32>
    %8 = arith.mulf %7, %7 : vector<8x32xf32>
    %cst_3 = arith.constant dense<0.000000e+00> : vector<8xf32>
    %9 = vector.multi_reduction <add>, %8, %cst_3 [1] : vector<8x32xf32> to vector<8xf32>
    %10 = vector.shape_cast %9 : vector<8xf32> to vector<8x1xf32>
    %cst_4 = arith.constant 3.100000e+01 : f32
    %11 = vector.broadcast %cst_4 : f32 to vector<8x1xf32>
    %12 = arith.divf %10, %11 : vector<8x1xf32>
    %c0_5 = arith.constant 0 : index
    %c0_6 = arith.constant 0 : index
    %13 = vector.load %arg3[%c0_5, %c0_6] : memref<1x32xf32, #tpu.memory_space<vmem>>, vector<1x32xf32>
    %14 = vector.broadcast %13 : vector<1x32xf32> to vector<8x32xf32>
    %15 = arith.mulf %14, %7 : vector<8x32xf32>
    %16 = math.sqrt %12 : vector<8x1xf32>
    %cst_7 = arith.constant 9.99999997E-7 : f32
    %17 = vector.broadcast %cst_7 : f32 to vector<8x1xf32>
    %18 = arith.addf %16, %17 : vector<8x1xf32>
    %19 = vector.broadcast %18 : vector<8x1xf32> to vector<8x32xf32>
    %20 = arith.divf %15, %19 : vector<8x32xf32>
    %c0_8 = arith.constant 0 : index
    %c0_9 = arith.constant 0 : index
    %21 = vector.load %arg4[%c0_8, %c0_9] : memref<1x32xf32, #tpu.memory_space<vmem>>, vector<1x32xf32>
    %22 = vector.broadcast %21 : vector<1x32xf32> to vector<8x32xf32>
    %23 = arith.addf %20, %22 : vector<8x32xf32>
    %24 = arith.index_cast %arg0 : i32 to index
    %25 = memref.load %arg1[%24] : memref<2xi32, #tpu.memory_space<smem>>
    %26 = tpu.iota {dimensions = array<i32: 0>} : vector<8x8xi32>
    %27 = tpu.iota {dimensions = array<i32: 1>} : vector<8x8xi32>
    %28 = arith.cmpi sle, %27, %26 : vector<8x8xi32>
    %29 = vector.broadcast %25 : i32 to vector<8x8xi32>
    %30 = arith.cmpi slt, %26, %29 : vector<8x8xi32>
    %31 = arith.andi %28, %30 : vector<8x8xi1>
    %cst_10 = arith.constant 0.000000e+00 : f32
    %cst_11 = arith.constant -1.000000e+09 : f32
    %32 = vector.broadcast %cst_10 : f32 to vector<8x8xf32>
    %33 = vector.broadcast %cst_11 : f32 to vector<8x8xf32>
    %34 = arith.select %31, %32, %33 : vector<8x8xi1>, vector<8x8xf32>
    %35 = arith.truncf %23 : vector<8x32xf32> to vector<8x32xbf16>
    %36 = arith.truncf %23 : vector<8x32xf32> to vector<8x32xbf16>
    %cst_12 = arith.constant 0.000000e+00 : f32
    %37 = vector.broadcast %cst_12 : f32 to vector<8x32xf32>
    %c0_i32 = arith.constant 0 : i32
    %38 = arith.index_cast %c0_i32 : i32 to index
    %c0_13 = arith.constant 0 : index
    %c0_14 = arith.constant 0 : index
    %39 = vector.load %arg5[%38, %c0_13, %c0_14] : memref<4x32x8xbf16, #tpu.memory_space<vmem>>, vector<1x32x8xbf16>
    %40 = vector.shape_cast %39 : vector<1x32x8xbf16> to vector<32x8xbf16>
    %cst_15 = arith.constant dense<0.000000e+00> : vector<8x8xf32>
    %41 = tpu.matmul %35, %40, %cst_15 {dimension_numbers = #tpu.dot_dimension_numbers<[1], [0], [0], [1], [0, 0, 1, 1], [], []>} : vector<8x32xbf16>, vector<32x8xbf16>, vector<8x8xf32> -> vector<8x8xf32>
    %42 = arith.index_cast %c0_i32 : i32 to index
    %c0_16 = arith.constant 0 : index
    %c0_17 = arith.constant 0 : index
    %43 = vector.load %arg8[%42, %c0_16, %c0_17] : memref<4x1x8xf32, #tpu.memory_space<vmem>>, vector<1x1x8xf32>
    %44 = vector.shape_cast %43 : vector<1x1x8xf32> to vector<1x8xf32>
    %45 = vector.broadcast %44 : vector<1x8xf32> to vector<8x8xf32>
    %46 = arith.addf %41, %45 : vector<8x8xf32>
    %cst_18 = arith.constant 0.353553385 : f32
    %47 = vector.broadcast %cst_18 : f32 to vector<8x8xf32>
    %48 = arith.mulf %46, %47 : vector<8x8xf32>
    %49 = arith.index_cast %c0_i32 : i32 to index
    %c0_19 = arith.constant 0 : index
    %c0_20 = arith.constant 0 : index
    %50 = vector.load %arg6[%49, %c0_19, %c0_20] : memref<4x32x8xbf16, #tpu.memory_space<vmem>>, vector<1x32x8xbf16>
    %51 = vector.shape_cast %50 : vector<1x32x8xbf16> to vector<32x8xbf16>
    %cst_21 = arith.constant dense<0.000000e+00> : vector<8x8xf32>
    %52 = tpu.matmul %36, %51, %cst_21 {dimension_numbers = #tpu.dot_dimension_numbers<[1], [0], [0], [1], [0, 0, 1, 1], [], []>} : vector<8x32xbf16>, vector<32x8xbf16>, vector<8x8xf32> -> vector<8x8xf32>
    %53 = arith.index_cast %c0_i32 : i32 to index
    %c0_22 = arith.constant 0 : index
    %c0_23 = arith.constant 0 : index
    %54 = vector.load %arg9[%53, %c0_22, %c0_23] : memref<4x1x8xf32, #tpu.memory_space<vmem>>, vector<1x1x8xf32>
    %55 = vector.shape_cast %54 : vector<1x1x8xf32> to vector<1x8xf32>
    %56 = vector.broadcast %55 : vector<1x8xf32> to vector<8x8xf32>
    %57 = arith.addf %52, %56 : vector<8x8xf32>
    %58 = arith.index_cast %c0_i32 : i32 to index
    %c0_24 = arith.constant 0 : index
    %c0_25 = arith.constant 0 : index
    %59 = vector.load %arg7[%58, %c0_24, %c0_25] : memref<4x32x8xbf16, #tpu.memory_space<vmem>>, vector<1x32x8xbf16>
    %60 = vector.shape_cast %59 : vector<1x32x8xbf16> to vector<32x8xbf16>
    %cst_26 = arith.constant dense<0.000000e+00> : vector<8x8xf32>
    %61 = tpu.matmul %36, %60, %cst_26 {dimension_numbers = #tpu.dot_dimension_numbers<[1], [0], [0], [1], [0, 0, 1, 1], [], []>} : vector<8x32xbf16>, vector<32x8xbf16>, vector<8x8xf32> -> vector<8x8xf32>
    %62 = arith.index_cast %c0_i32 : i32 to index
    %c0_27 = arith.constant 0 : index
    %c0_28 = arith.constant 0 : index
    %63 = vector.load %arg10[%62, %c0_27, %c0_28] : memref<4x1x8xf32, #tpu.memory_space<vmem>>, vector<1x1x8xf32>
    %64 = vector.shape_cast %63 : vector<1x1x8xf32> to vector<1x8xf32>
    %65 = vector.broadcast %64 : vector<1x8xf32> to vector<8x8xf32>
    %66 = arith.addf %61, %65 : vector<8x8xf32>
    %67 = arith.truncf %48 : vector<8x8xf32> to vector<8x8xbf16>
    %68 = arith.truncf %57 : vector<8x8xf32> to vector<8x8xbf16>
    %cst_29 = arith.constant dense<0.000000e+00> : vector<8x8xf32>
    %69 = tpu.matmul %67, %68, %cst_29 {dimension_numbers = #tpu.dot_dimension_numbers<[1], [1], [0], [0], [0, 0, 1, 0], [], []>} : vector<8x8xbf16>, vector<8x8xbf16>, vector<8x8xf32> -> vector<8x8xf32>
    %70 = arith.addf %69, %34 : vector<8x8xf32>
    %cst_30 = arith.constant dense<0xFF800000> : vector<8xf32>
    %71 = vector.multi_reduction <maximumf>, %70, %cst_30 [1] : vector<8x8xf32> to vector<8xf32>
    %72 = vector.shape_cast %71 : vector<8xf32> to vector<8x1xf32>
    %73 = vector.broadcast %72 : vector<8x1xf32> to vector<8x8xf32>
    %74 = arith.subf %70, %73 : vector<8x8xf32>
    %75 = math.exp %74 : vector<8x8xf32>
    %cst_31 = arith.constant dense<0.000000e+00> : vector<8xf32>
    %76 = vector.multi_reduction <add>, %75, %cst_31 [1] : vector<8x8xf32> to vector<8xf32>
    %77 = vector.shape_cast %76 : vector<8xf32> to vector<8x1xf32>
    %78 = tpu.reciprocal %77 {approx = true} : vector<8x1xf32> -> vector<8x1xf32>
    %79 = vector.broadcast %78 : vector<8x1xf32> to vector<8x8xf32>
    %80 = arith.mulf %75, %79 : vector<8x8xf32>
    %81 = arith.truncf %80 : vector<8x8xf32> to vector<8x8xbf16>
    %82 = arith.truncf %66 : vector<8x8xf32> to vector<8x8xbf16>
    %cst_32 = arith.constant dense<0.000000e+00> : vector<8x8xf32>
    %83 = tpu.matmul %81, %82, %cst_32 {dimension_numbers = #tpu.dot_dimension_numbers<[1], [0], [0], [1], [0, 0, 1, 1], [], []>} : vector<8x8xbf16>, vector<8x8xbf16>, vector<8x8xf32> -> vector<8x8xf32>
    %84 = arith.truncf %83 : vector<8x8xf32> to vector<8x8xbf16>
    %85 = arith.index_cast %c0_i32 : i32 to index
    %c0_33 = arith.constant 0 : index
    %c0_34 = arith.constant 0 : index
    %86 = vector.load %arg11[%85, %c0_33, %c0_34] : memref<4x8x32xbf16, #tpu.memory_space<vmem>>, vector<1x8x32xbf16>
    %87 = vector.shape_cast %86 : vector<1x8x32xbf16> to vector<8x32xbf16>
    %cst_35 = arith.constant dense<0.000000e+00> : vector<8x32xf32>
    %88 = tpu.matmul %84, %87, %cst_35 {dimension_numbers = #tpu.dot_dimension_numbers<[1], [0], [0], [1], [0, 0, 1, 1], [], []>} : vector<8x8xbf16>, vector<8x32xbf16>, vector<8x32xf32> -> vector<8x32xf32>
    %89 = arith.addf %37, %88 : vector<8x32xf32>
    %c1_i32 = arith.constant 1 : i32
    %90 = arith.index_cast %c1_i32 : i32 to index
    %c0_36 = arith.constant 0 : index
    %c0_37 = arith.constant 0 : index
    %91 = vector.load %arg5[%90, %c0_36, %c0_37] : memref<4x32x8xbf16, #tpu.memory_space<vmem>>, vector<1x32x8xbf16>
    %92 = vector.shape_cast %91 : vector<1x32x8xbf16> to vector<32x8xbf16>
    %cst_38 = arith.constant dense<0.000000e+00> : vector<8x8xf32>
    %93 = tpu.matmul %35, %92, %cst_38 {dimension_numbers = #tpu.dot_dimension_numbers<[1], [0], [0], [1], [0, 0, 1, 1], [], []>} : vector<8x32xbf16>, vector<32x8xbf16>, vector<8x8xf32> -> vector<8x8xf32>
    %94 = arith.index_cast %c1_i32 : i32 to index
    %c0_39 = arith.constant 0 : index
    %c0_40 = arith.constant 0 : index
    %95 = vector.load %arg8[%94, %c0_39, %c0_40] : memref<4x1x8xf32, #tpu.memory_space<vmem>>, vector<1x1x8xf32>
    %96 = vector.shape_cast %95 : vector<1x1x8xf32> to vector<1x8xf32>
    %97 = vector.broadcast %96 : vector<1x8xf32> to vector<8x8xf32>
    %98 = arith.addf %93, %97 : vector<8x8xf32>
    %cst_41 = arith.constant 0.353553385 : f32
    %99 = vector.broadcast %cst_41 : f32 to vector<8x8xf32>
    %100 = arith.mulf %98, %99 : vector<8x8xf32>
    %101 = arith.index_cast %c1_i32 : i32 to index
    %c0_42 = arith.constant 0 : index
    %c0_43 = arith.constant 0 : index
    %102 = vector.load %arg6[%101, %c0_42, %c0_43] : memref<4x32x8xbf16, #tpu.memory_space<vmem>>, vector<1x32x8xbf16>
    %103 = vector.shape_cast %102 : vector<1x32x8xbf16> to vector<32x8xbf16>
    %cst_44 = arith.constant dense<0.000000e+00> : vector<8x8xf32>
    %104 = tpu.matmul %36, %103, %cst_44 {dimension_numbers = #tpu.dot_dimension_numbers<[1], [0], [0], [1], [0, 0, 1, 1], [], []>} : vector<8x32xbf16>, vector<32x8xbf16>, vector<8x8xf32> -> vector<8x8xf32>
    %105 = arith.index_cast %c1_i32 : i32 to index
    %c0_45 = arith.constant 0 : index
    %c0_46 = arith.constant 0 : index
    %106 = vector.load %arg9[%105, %c0_45, %c0_46] : memref<4x1x8xf32, #tpu.memory_space<vmem>>, vector<1x1x8xf32>
    %107 = vector.shape_cast %106 : vector<1x1x8xf32> to vector<1x8xf32>
    %108 = vector.broadcast %107 : vector<1x8xf32> to vector<8x8xf32>
    %109 = arith.addf %104, %108 : vector<8x8xf32>
    %110 = arith.index_cast %c1_i32 : i32 to index
    %c0_47 = arith.constant 0 : index
    %c0_48 = arith.constant 0 : index
    %111 = vector.load %arg7[%110, %c0_47, %c0_48] : memref<4x32x8xbf16, #tpu.memory_space<vmem>>, vector<1x32x8xbf16>
    %112 = vector.shape_cast %111 : vector<1x32x8xbf16> to vector<32x8xbf16>
    %cst_49 = arith.constant dense<0.000000e+00> : vector<8x8xf32>
    %113 = tpu.matmul %36, %112, %cst_49 {dimension_numbers = #tpu.dot_dimension_numbers<[1], [0], [0], [1], [0, 0, 1, 1], [], []>} : vector<8x32xbf16>, vector<32x8xbf16>, vector<8x8xf32> -> vector<8x8xf32>
    %114 = arith.index_cast %c1_i32 : i32 to index
    %c0_50 = arith.constant 0 : index
    %c0_51 = arith.constant 0 : index
    %115 = vector.load %arg10[%114, %c0_50, %c0_51] : memref<4x1x8xf32, #tpu.memory_space<vmem>>, vector<1x1x8xf32>
    %116 = vector.shape_cast %115 : vector<1x1x8xf32> to vector<1x8xf32>
    %117 = vector.broadcast %116 : vector<1x8xf32> to vector<8x8xf32>
    %118 = arith.addf %113, %117 : vector<8x8xf32>
    %119 = arith.truncf %100 : vector<8x8xf32> to vector<8x8xbf16>
    %120 = arith.truncf %109 : vector<8x8xf32> to vector<8x8xbf16>
    %cst_52 = arith.constant dense<0.000000e+00> : vector<8x8xf32>
    %121 = tpu.matmul %119, %120, %cst_52 {dimension_numbers = #tpu.dot_dimension_numbers<[1], [1], [0], [0], [0, 0, 1, 0], [], []>} : vector<8x8xbf16>, vector<8x8xbf16>, vector<8x8xf32> -> vector<8x8xf32>
    %122 = arith.addf %121, %34 : vector<8x8xf32>
    %cst_53 = arith.constant dense<0xFF800000> : vector<8xf32>
    %123 = vector.multi_reduction <maximumf>, %122, %cst_53 [1] : vector<8x8xf32> to vector<8xf32>
    %124 = vector.shape_cast %123 : vector<8xf32> to vector<8x1xf32>
    %125 = vector.broadcast %124 : vector<8x1xf32> to vector<8x8xf32>
    %126 = arith.subf %122, %125 : vector<8x8xf32>
    %127 = math.exp %126 : vector<8x8xf32>
    %cst_54 = arith.constant dense<0.000000e+00> : vector<8xf32>
    %128 = vector.multi_reduction <add>, %127, %cst_54 [1] : vector<8x8xf32> to vector<8xf32>
    %129 = vector.shape_cast %128 : vector<8xf32> to vector<8x1xf32>
    %130 = tpu.reciprocal %129 {approx = true} : vector<8x1xf32> -> vector<8x1xf32>
    %131 = vector.broadcast %130 : vector<8x1xf32> to vector<8x8xf32>
    %132 = arith.mulf %127, %131 : vector<8x8xf32>
    %133 = arith.truncf %132 : vector<8x8xf32> to vector<8x8xbf16>
    %134 = arith.truncf %118 : vector<8x8xf32> to vector<8x8xbf16>
    %cst_55 = arith.constant dense<0.000000e+00> : vector<8x8xf32>
    %135 = tpu.matmul %133, %134, %cst_55 {dimension_numbers = #tpu.dot_dimension_numbers<[1], [0], [0], [1], [0, 0, 1, 1], [], []>} : vector<8x8xbf16>, vector<8x8xbf16>, vector<8x8xf32> -> vector<8x8xf32>
    %136 = arith.truncf %135 : vector<8x8xf32> to vector<8x8xbf16>
    %137 = arith.index_cast %c1_i32 : i32 to index
    %c0_56 = arith.constant 0 : index
    %c0_57 = arith.constant 0 : index
    %138 = vector.load %arg11[%137, %c0_56, %c0_57] : memref<4x8x32xbf16, #tpu.memory_space<vmem>>, vector<1x8x32xbf16>
    %139 = vector.shape_cast %138 : vector<1x8x32xbf16> to vector<8x32xbf16>
    %cst_58 = arith.constant dense<0.000000e+00> : vector<8x32xf32>
    %140 = tpu.matmul %136, %139, %cst_58 {dimension_numbers = #tpu.dot_dimension_numbers<[1], [0], [0], [1], [0, 0, 1, 1], [], []>} : vector<8x8xbf16>, vector<8x32xbf16>, vector<8x32xf32> -> vector<8x32xf32>
    %141 = arith.addf %89, %140 : vector<8x32xf32>
    %c2_i32 = arith.constant 2 : i32
    %142 = arith.index_cast %c2_i32 : i32 to index
    %c0_59 = arith.constant 0 : index
    %c0_60 = arith.constant 0 : index
    %143 = vector.load %arg5[%142, %c0_59, %c0_60] : memref<4x32x8xbf16, #tpu.memory_space<vmem>>, vector<1x32x8xbf16>
    %144 = vector.shape_cast %143 : vector<1x32x8xbf16> to vector<32x8xbf16>
    %cst_61 = arith.constant dense<0.000000e+00> : vector<8x8xf32>
    %145 = tpu.matmul %35, %144, %cst_61 {dimension_numbers = #tpu.dot_dimension_numbers<[1], [0], [0], [1], [0, 0, 1, 1], [], []>} : vector<8x32xbf16>, vector<32x8xbf16>, vector<8x8xf32> -> vector<8x8xf32>
    %146 = arith.index_cast %c2_i32 : i32 to index
    %c0_62 = arith.constant 0 : index
    %c0_63 = arith.constant 0 : index
    %147 = vector.load %arg8[%146, %c0_62, %c0_63] : memref<4x1x8xf32, #tpu.memory_space<vmem>>, vector<1x1x8xf32>
    %148 = vector.shape_cast %147 : vector<1x1x8xf32> to vector<1x8xf32>
    %149 = vector.broadcast %148 : vector<1x8xf32> to vector<8x8xf32>
    %150 = arith.addf %145, %149 : vector<8x8xf32>
    %cst_64 = arith.constant 0.353553385 : f32
    %151 = vector.broadcast %cst_64 : f32 to vector<8x8xf32>
    %152 = arith.mulf %150, %151 : vector<8x8xf32>
    %153 = arith.index_cast %c2_i32 : i32 to index
    %c0_65 = arith.constant 0 : index
    %c0_66 = arith.constant 0 : index
    %154 = vector.load %arg6[%153, %c0_65, %c0_66] : memref<4x32x8xbf16, #tpu.memory_space<vmem>>, vector<1x32x8xbf16>
    %155 = vector.shape_cast %154 : vector<1x32x8xbf16> to vector<32x8xbf16>
    %cst_67 = arith.constant dense<0.000000e+00> : vector<8x8xf32>
    %156 = tpu.matmul %36, %155, %cst_67 {dimension_numbers = #tpu.dot_dimension_numbers<[1], [0], [0], [1], [0, 0, 1, 1], [], []>} : vector<8x32xbf16>, vector<32x8xbf16>, vector<8x8xf32> -> vector<8x8xf32>
    %157 = arith.index_cast %c2_i32 : i32 to index
    %c0_68 = arith.constant 0 : index
    %c0_69 = arith.constant 0 : index
    %158 = vector.load %arg9[%157, %c0_68, %c0_69] : memref<4x1x8xf32, #tpu.memory_space<vmem>>, vector<1x1x8xf32>
    %159 = vector.shape_cast %158 : vector<1x1x8xf32> to vector<1x8xf32>
    %160 = vector.broadcast %159 : vector<1x8xf32> to vector<8x8xf32>
    %161 = arith.addf %156, %160 : vector<8x8xf32>
    %162 = arith.index_cast %c2_i32 : i32 to index
    %c0_70 = arith.constant 0 : index
    %c0_71 = arith.constant 0 : index
    %163 = vector.load %arg7[%162, %c0_70, %c0_71] : memref<4x32x8xbf16, #tpu.memory_space<vmem>>, vector<1x32x8xbf16>
    %164 = vector.shape_cast %163 : vector<1x32x8xbf16> to vector<32x8xbf16>
    %cst_72 = arith.constant dense<0.000000e+00> : vector<8x8xf32>
    %165 = tpu.matmul %36, %164, %cst_72 {dimension_numbers = #tpu.dot_dimension_numbers<[1], [0], [0], [1], [0, 0, 1, 1], [], []>} : vector<8x32xbf16>, vector<32x8xbf16>, vector<8x8xf32> -> vector<8x8xf32>
    %166 = arith.index_cast %c2_i32 : i32 to index
    %c0_73 = arith.constant 0 : index
    %c0_74 = arith.constant 0 : index
    %167 = vector.load %arg10[%166, %c0_73, %c0_74] : memref<4x1x8xf32, #tpu.memory_space<vmem>>, vector<1x1x8xf32>
    %168 = vector.shape_cast %167 : vector<1x1x8xf32> to vector<1x8xf32>
    %169 = vector.broadcast %168 : vector<1x8xf32> to vector<8x8xf32>
    %170 = arith.addf %165, %169 : vector<8x8xf32>
    %171 = arith.truncf %152 : vector<8x8xf32> to vector<8x8xbf16>
    %172 = arith.truncf %161 : vector<8x8xf32> to vector<8x8xbf16>
    %cst_75 = arith.constant dense<0.000000e+00> : vector<8x8xf32>
    %173 = tpu.matmul %171, %172, %cst_75 {dimension_numbers = #tpu.dot_dimension_numbers<[1], [1], [0], [0], [0, 0, 1, 0], [], []>} : vector<8x8xbf16>, vector<8x8xbf16>, vector<8x8xf32> -> vector<8x8xf32>
    %174 = arith.addf %173, %34 : vector<8x8xf32>
    %cst_76 = arith.constant dense<0xFF800000> : vector<8xf32>
    %175 = vector.multi_reduction <maximumf>, %174, %cst_76 [1] : vector<8x8xf32> to vector<8xf32>
    %176 = vector.shape_cast %175 : vector<8xf32> to vector<8x1xf32>
    %177 = vector.broadcast %176 : vector<8x1xf32> to vector<8x8xf32>
    %178 = arith.subf %174, %177 : vector<8x8xf32>
    %179 = math.exp %178 : vector<8x8xf32>
    %cst_77 = arith.constant dense<0.000000e+00> : vector<8xf32>
    %180 = vector.multi_reduction <add>, %179, %cst_77 [1] : vector<8x8xf32> to vector<8xf32>
    %181 = vector.shape_cast %180 : vector<8xf32> to vector<8x1xf32>
    %182 = tpu.reciprocal %181 {approx = true} : vector<8x1xf32> -> vector<8x1xf32>
    %183 = vector.broadcast %182 : vector<8x1xf32> to vector<8x8xf32>
    %184 = arith.mulf %179, %183 : vector<8x8xf32>
    %185 = arith.truncf %184 : vector<8x8xf32> to vector<8x8xbf16>
    %186 = arith.truncf %170 : vector<8x8xf32> to vector<8x8xbf16>
    %cst_78 = arith.constant dense<0.000000e+00> : vector<8x8xf32>
    %187 = tpu.matmul %185, %186, %cst_78 {dimension_numbers = #tpu.dot_dimension_numbers<[1], [0], [0], [1], [0, 0, 1, 1], [], []>} : vector<8x8xbf16>, vector<8x8xbf16>, vector<8x8xf32> -> vector<8x8xf32>
    %188 = arith.truncf %187 : vector<8x8xf32> to vector<8x8xbf16>
    %189 = arith.index_cast %c2_i32 : i32 to index
    %c0_79 = arith.constant 0 : index
    %c0_80 = arith.constant 0 : index
    %190 = vector.load %arg11[%189, %c0_79, %c0_80] : memref<4x8x32xbf16, #tpu.memory_space<vmem>>, vector<1x8x32xbf16>
    %191 = vector.shape_cast %190 : vector<1x8x32xbf16> to vector<8x32xbf16>
    %cst_81 = arith.constant dense<0.000000e+00> : vector<8x32xf32>
    %192 = tpu.matmul %188, %191, %cst_81 {dimension_numbers = #tpu.dot_dimension_numbers<[1], [0], [0], [1], [0, 0, 1, 1], [], []>} : vector<8x8xbf16>, vector<8x32xbf16>, vector<8x32xf32> -> vector<8x32xf32>
    %193 = arith.addf %141, %192 : vector<8x32xf32>
    %c3_i32 = arith.constant 3 : i32
    %194 = arith.index_cast %c3_i32 : i32 to index
    %c0_82 = arith.constant 0 : index
    %c0_83 = arith.constant 0 : index
    %195 = vector.load %arg5[%194, %c0_82, %c0_83] : memref<4x32x8xbf16, #tpu.memory_space<vmem>>, vector<1x32x8xbf16>
    %196 = vector.shape_cast %195 : vector<1x32x8xbf16> to vector<32x8xbf16>
    %cst_84 = arith.constant dense<0.000000e+00> : vector<8x8xf32>
    %197 = tpu.matmul %35, %196, %cst_84 {dimension_numbers = #tpu.dot_dimension_numbers<[1], [0], [0], [1], [0, 0, 1, 1], [], []>} : vector<8x32xbf16>, vector<32x8xbf16>, vector<8x8xf32> -> vector<8x8xf32>
    %198 = arith.index_cast %c3_i32 : i32 to index
    %c0_85 = arith.constant 0 : index
    %c0_86 = arith.constant 0 : index
    %199 = vector.load %arg8[%198, %c0_85, %c0_86] : memref<4x1x8xf32, #tpu.memory_space<vmem>>, vector<1x1x8xf32>
    %200 = vector.shape_cast %199 : vector<1x1x8xf32> to vector<1x8xf32>
    %201 = vector.broadcast %200 : vector<1x8xf32> to vector<8x8xf32>
    %202 = arith.addf %197, %201 : vector<8x8xf32>
    %cst_87 = arith.constant 0.353553385 : f32
    %203 = vector.broadcast %cst_87 : f32 to vector<8x8xf32>
    %204 = arith.mulf %202, %203 : vector<8x8xf32>
    %205 = arith.index_cast %c3_i32 : i32 to index
    %c0_88 = arith.constant 0 : index
    %c0_89 = arith.constant 0 : index
    %206 = vector.load %arg6[%205, %c0_88, %c0_89] : memref<4x32x8xbf16, #tpu.memory_space<vmem>>, vector<1x32x8xbf16>
    %207 = vector.shape_cast %206 : vector<1x32x8xbf16> to vector<32x8xbf16>
    %cst_90 = arith.constant dense<0.000000e+00> : vector<8x8xf32>
    %208 = tpu.matmul %36, %207, %cst_90 {dimension_numbers = #tpu.dot_dimension_numbers<[1], [0], [0], [1], [0, 0, 1, 1], [], []>} : vector<8x32xbf16>, vector<32x8xbf16>, vector<8x8xf32> -> vector<8x8xf32>
    %209 = arith.index_cast %c3_i32 : i32 to index
    %c0_91 = arith.constant 0 : index
    %c0_92 = arith.constant 0 : index
    %210 = vector.load %arg9[%209, %c0_91, %c0_92] : memref<4x1x8xf32, #tpu.memory_space<vmem>>, vector<1x1x8xf32>
    %211 = vector.shape_cast %210 : vector<1x1x8xf32> to vector<1x8xf32>
    %212 = vector.broadcast %211 : vector<1x8xf32> to vector<8x8xf32>
    %213 = arith.addf %208, %212 : vector<8x8xf32>
    %214 = arith.index_cast %c3_i32 : i32 to index
    %c0_93 = arith.constant 0 : index
    %c0_94 = arith.constant 0 : index
    %215 = vector.load %arg7[%214, %c0_93, %c0_94] : memref<4x32x8xbf16, #tpu.memory_space<vmem>>, vector<1x32x8xbf16>
    %216 = vector.shape_cast %215 : vector<1x32x8xbf16> to vector<32x8xbf16>
    %cst_95 = arith.constant dense<0.000000e+00> : vector<8x8xf32>
    %217 = tpu.matmul %36, %216, %cst_95 {dimension_numbers = #tpu.dot_dimension_numbers<[1], [0], [0], [1], [0, 0, 1, 1], [], []>} : vector<8x32xbf16>, vector<32x8xbf16>, vector<8x8xf32> -> vector<8x8xf32>
    %218 = arith.index_cast %c3_i32 : i32 to index
    %c0_96 = arith.constant 0 : index
    %c0_97 = arith.constant 0 : index
    %219 = vector.load %arg10[%218, %c0_96, %c0_97] : memref<4x1x8xf32, #tpu.memory_space<vmem>>, vector<1x1x8xf32>
    %220 = vector.shape_cast %219 : vector<1x1x8xf32> to vector<1x8xf32>
    %221 = vector.broadcast %220 : vector<1x8xf32> to vector<8x8xf32>
    %222 = arith.addf %217, %221 : vector<8x8xf32>
    %223 = arith.truncf %204 : vector<8x8xf32> to vector<8x8xbf16>
    %224 = arith.truncf %213 : vector<8x8xf32> to vector<8x8xbf16>
    %cst_98 = arith.constant dense<0.000000e+00> : vector<8x8xf32>
    %225 = tpu.matmul %223, %224, %cst_98 {dimension_numbers = #tpu.dot_dimension_numbers<[1], [1], [0], [0], [0, 0, 1, 0], [], []>} : vector<8x8xbf16>, vector<8x8xbf16>, vector<8x8xf32> -> vector<8x8xf32>
    %226 = arith.addf %225, %34 : vector<8x8xf32>
    %cst_99 = arith.constant dense<0xFF800000> : vector<8xf32>
    %227 = vector.multi_reduction <maximumf>, %226, %cst_99 [1] : vector<8x8xf32> to vector<8xf32>
    %228 = vector.shape_cast %227 : vector<8xf32> to vector<8x1xf32>
    %229 = vector.broadcast %228 : vector<8x1xf32> to vector<8x8xf32>
    %230 = arith.subf %226, %229 : vector<8x8xf32>
    %231 = math.exp %230 : vector<8x8xf32>
    %cst_100 = arith.constant dense<0.000000e+00> : vector<8xf32>
    %232 = vector.multi_reduction <add>, %231, %cst_100 [1] : vector<8x8xf32> to vector<8xf32>
    %233 = vector.shape_cast %232 : vector<8xf32> to vector<8x1xf32>
    %234 = tpu.reciprocal %233 {approx = true} : vector<8x1xf32> -> vector<8x1xf32>
    %235 = vector.broadcast %234 : vector<8x1xf32> to vector<8x8xf32>
    %236 = arith.mulf %231, %235 : vector<8x8xf32>
    %237 = arith.truncf %236 : vector<8x8xf32> to vector<8x8xbf16>
    %238 = arith.truncf %222 : vector<8x8xf32> to vector<8x8xbf16>
    %cst_101 = arith.constant dense<0.000000e+00> : vector<8x8xf32>
    %239 = tpu.matmul %237, %238, %cst_101 {dimension_numbers = #tpu.dot_dimension_numbers<[1], [0], [0], [1], [0, 0, 1, 1], [], []>} : vector<8x8xbf16>, vector<8x8xbf16>, vector<8x8xf32> -> vector<8x8xf32>
    %240 = arith.truncf %239 : vector<8x8xf32> to vector<8x8xbf16>
    %241 = arith.index_cast %c3_i32 : i32 to index
    %c0_102 = arith.constant 0 : index
    %c0_103 = arith.constant 0 : index
    %242 = vector.load %arg11[%241, %c0_102, %c0_103] : memref<4x8x32xbf16, #tpu.memory_space<vmem>>, vector<1x8x32xbf16>
    %243 = vector.shape_cast %242 : vector<1x8x32xbf16> to vector<8x32xbf16>
    %cst_104 = arith.constant dense<0.000000e+00> : vector<8x32xf32>
    %244 = tpu.matmul %240, %243, %cst_104 {dimension_numbers = #tpu.dot_dimension_numbers<[1], [0], [0], [1], [0, 0, 1, 1], [], []>} : vector<8x8xbf16>, vector<8x32xbf16>, vector<8x32xf32> -> vector<8x32xf32>
    %245 = arith.addf %193, %244 : vector<8x32xf32>
    %c4_i32 = arith.constant 4 : i32
    %c0_105 = arith.constant 0 : index
    %c0_106 = arith.constant 0 : index
    %246 = vector.load %arg12[%c0_105, %c0_106] : memref<1x32xf32, #tpu.memory_space<vmem>>, vector<1x32xf32>
    %247 = vector.broadcast %246 : vector<1x32xf32> to vector<8x32xf32>
    %248 = arith.addf %245, %247 : vector<8x32xf32>
    %249 = arith.addf %1, %248 : vector<8x32xf32>
    %c0_107 = arith.constant 0 : index
    %c0_108 = arith.constant 0 : index
    %c0_109 = arith.constant 0 : index
    %250 = vector.load %arg13[%c0_107, %c0_108, %c0_109] : memref<1x8x32xf32, #tpu.memory_space<vmem>>, vector<1x8x32xf32>
    %251 = vector.shape_cast %250 : vector<1x8x32xf32> to vector<8x32xf32>
    %252 = vector.shape_cast %249 : vector<8x32xf32> to vector<1x8x32xf32>
    tpu.vector_store %arg13[%c0_107, %c0_108, %c0_109], %252 {strides = array<i32>} : memref<1x8x32xf32, #tpu.memory_space<vmem>>, vector<1x8x32xf32>,
    return
  }
  func.func @transform_0(%arg0: i32, %arg1: memref<2xi32, #tpu.memory_space<smem>>) -> (i32, i32, i32) {
    %c0_i32 = arith.constant 0 : i32
    %c0_i32_0 = arith.constant 0 : i32
    %c0_i32_1 = arith.constant 0 : i32
    return %arg0, %c0_i32, %c0_i32_0 : i32, i32, i32
  }
  func.func @transform_1(%arg0: i32, %arg1: memref<2xi32, #tpu.memory_space<smem>>) -> (i32, i32) {
    %c0_i32 = arith.constant 0 : i32
    %c0_i32_0 = arith.constant 0 : i32
    %c0_i32_1 = arith.constant 0 : i32
    return %c0_i32, %c0_i32_0 : i32, i32
  }
  func.func @transform_2(%arg0: i32, %arg1: memref<2xi32, #tpu.memory_space<smem>>) -> (i32, i32) {
    %c0_i32 = arith.constant 0 : i32
    %c0_i32_0 = arith.constant 0 : i32
    %c0_i32_1 = arith.constant 0 : i32
    return %c0_i32, %c0_i32_0 : i32, i32
  }
  func.func @transform_3(%arg0: i32, %arg1: memref<2xi32, #tpu.memory_space<smem>>) -> (i32, i32, i32) {
    %c0_i32 = arith.constant 0 : i32
    %c0_i32_0 = arith.constant 0 : i32
    %c0_i32_1 = arith.constant 0 : i32
    %c0_i32_2 = arith.constant 0 : i32
    return %c0_i32, %c0_i32_0, %c0_i32_1 : i32, i32, i32
  }
  func.func @transform_4(%arg0: i32, %arg1: memref<2xi32, #tpu.memory_space<smem>>) -> (i32, i32, i32) {
    %c0_i32 = arith.constant 0 : i32
    %c0_i32_0 = arith.constant 0 : i32
    %c0_i32_1 = arith.constant 0 : i32
    %c0_i32_2 = arith.constant 0 : i32
    return %c0_i32, %c0_i32_0, %c0_i32_1 : i32, i32, i32
  }
  func.func @transform_5(%arg0: i32, %arg1: memref<2xi32, #tpu.memory_space<smem>>) -> (i32, i32, i32) {
    %c0_i32 = arith.constant 0 : i32
    %c0_i32_0 = arith.constant 0 : i32
    %c0_i32_1 = arith.constant 0 : i32
    %c0_i32_2 = arith.constant 0 : i32
    return %c0_i32, %c0_i32_0, %c0_i32_1 : i32, i32, i32
  }
  func.func @transform_6(%arg0: i32, %arg1: memref<2xi32, #tpu.memory_space<smem>>) -> (i32, i32, i32) {
    %c0_i32 = arith.constant 0 : i32
    %c0_i32_0 = arith.constant 0 : i32
    %c0_i32_1 = arith.constant 0 : i32
    %c0_i32_2 = arith.constant 0 : i32
    return %c0_i32, %c0_i32_0, %c0_i32_1 : i32, i32, i32
  }
  func.func @transform_7(%arg0: i32, %arg1: memref<2xi32, #tpu.memory_space<smem>>) -> (i32, i32, i32) {
    %c0_i32 = arith.constant 0 : i32
    %c0_i32_0 = arith.constant 0 : i32
    %c0_i32_1 = arith.constant 0 : i32
    %c0_i32_2 = arith.constant 0 : i32
    return %c0_i32, %c0_i32_0, %c0_i32_1 : i32, i32, i32
  }
  func.func @transform_8(%arg0: i32, %arg1: memref<2xi32, #tpu.memory_space<smem>>) -> (i32, i32, i32) {
    %c0_i32 = arith.constant 0 : i32
    %c0_i32_0 = arith.constant 0 : i32
    %c0_i32_1 = arith.constant 0 : i32
    %c0_i32_2 = arith.constant 0 : i32
    return %c0_i32, %c0_i32_0, %c0_i32_1 : i32, i32, i32
  }
  func.func @transform_9(%arg0: i32, %arg1: memref<2xi32, #tpu.memory_space<smem>>) -> (i32, i32, i32) {
    %c0_i32 = arith.constant 0 : i32
    %c0_i32_0 = arith.constant 0 : i32
    %c0_i32_1 = arith.constant 0 : i32
    %c0_i32_2 = arith.constant 0 : i32
    return %c0_i32, %c0_i32_0, %c0_i32_1 : i32, i32, i32
  }
  func.func @transform_10(%arg0: i32, %arg1: memref<2xi32, #tpu.memory_space<smem>>) -> (i32, i32) {
    %c0_i32 = arith.constant 0 : i32
    %c0_i32_0 = arith.constant 0 : i32
    %c0_i32_1 = arith.constant 0 : i32
    return %c0_i32, %c0_i32_0 : i32, i32
  }
  func.func @transform_11(%arg0: i32, %arg1: memref<2xi32, #tpu.memory_space<smem>>) -> (i32, i32, i32) {
    %c0_i32 = arith.constant 0 : i32
    %c0_i32_0 = arith.constant 0 : i32
    %c0_i32_1 = arith.constant 0 : i32
    return %arg0, %c0_i32, %c0_i32_0 : i32, i32, i32
  }
}

module attributes {stable_mosaic.version = 11 : i64} {
  func.func @_ffn_block_kernel(%arg0: i32, %arg1: memref<16x32xf32, #tpu.memory_space<vmem>>, %arg2: memref<1x32xf32, #tpu.memory_space<vmem>>, %arg3: memref<1x32xf32, #tpu.memory_space<vmem>>, %arg4: memref<32x64xbf16, #tpu.memory_space<vmem>>, %arg5: memref<1x64xf32, #tpu.memory_space<vmem>>, %arg6: memref<64x32xbf16, #tpu.memory_space<vmem>>, %arg7: memref<1x32xf32, #tpu.memory_space<vmem>>, %arg8: memref<16x32xf32, #tpu.memory_space<vmem>>) attributes {dimension_semantics = [#tpu.dimension_semantics<parallel>], iteration_bounds = array<i64: 1>, scalar_prefetch = 0 : i64, scratch_operands = 0 : i64, tpu.core_type = #tpu.core_type<tc>, window_params = [{transform_indices = @transform_0, window_bounds = array<i64: 16, 32>}, {pipeline_mode = #tpu.pipeline_mode<synchronous>, transform_indices = @transform_1, window_bounds = array<i64: 1, 32>}, {pipeline_mode = #tpu.pipeline_mode<synchronous>, transform_indices = @transform_2, window_bounds = array<i64: 1, 32>}, {pipeline_mode = #tpu.pipeline_mode<synchronous>, transform_indices = @transform_3, window_bounds = array<i64: 32, 64>}, {pipeline_mode = #tpu.pipeline_mode<synchronous>, transform_indices = @transform_4, window_bounds = array<i64: 1, 64>}, {pipeline_mode = #tpu.pipeline_mode<synchronous>, transform_indices = @transform_5, window_bounds = array<i64: 64, 32>}, {pipeline_mode = #tpu.pipeline_mode<synchronous>, transform_indices = @transform_6, window_bounds = array<i64: 1, 32>}, {transform_indices = @transform_7, window_bounds = array<i64: 16, 32>}]} {
    %c0 = arith.constant 0 : index
    %c0_0 = arith.constant 0 : index
    %0 = vector.load %arg1[%c0, %c0_0] : memref<16x32xf32, #tpu.memory_space<vmem>>, vector<16x32xf32>
    %cst = arith.constant dense<0.000000e+00> : vector<16xf32>
    %1 = vector.multi_reduction <add>, %0, %cst [1] : vector<16x32xf32> to vector<16xf32>
    %2 = vector.shape_cast %1 : vector<16xf32> to vector<16x1xf32>
    %cst_1 = arith.constant 3.200000e+01 : f32
    %3 = vector.broadcast %cst_1 : f32 to vector<16x1xf32>
    %4 = arith.divf %2, %3 : vector<16x1xf32>
    %5 = vector.broadcast %4 : vector<16x1xf32> to vector<16x32xf32>
    %6 = arith.subf %0, %5 : vector<16x32xf32>
    %7 = arith.mulf %6, %6 : vector<16x32xf32>
    %cst_2 = arith.constant dense<0.000000e+00> : vector<16xf32>
    %8 = vector.multi_reduction <add>, %7, %cst_2 [1] : vector<16x32xf32> to vector<16xf32>
    %9 = vector.shape_cast %8 : vector<16xf32> to vector<16x1xf32>
    %cst_3 = arith.constant 3.100000e+01 : f32
    %10 = vector.broadcast %cst_3 : f32 to vector<16x1xf32>
    %11 = arith.divf %9, %10 : vector<16x1xf32>
    %c0_4 = arith.constant 0 : index
    %c0_5 = arith.constant 0 : index
    %12 = vector.load %arg2[%c0_4, %c0_5] : memref<1x32xf32, #tpu.memory_space<vmem>>, vector<1x32xf32>
    %13 = vector.broadcast %12 : vector<1x32xf32> to vector<16x32xf32>
    %14 = arith.mulf %13, %6 : vector<16x32xf32>
    %15 = math.sqrt %11 : vector<16x1xf32>
    %cst_6 = arith.constant 9.99999997E-7 : f32
    %16 = vector.broadcast %cst_6 : f32 to vector<16x1xf32>
    %17 = arith.addf %15, %16 : vector<16x1xf32>
    %18 = vector.broadcast %17 : vector<16x1xf32> to vector<16x32xf32>
    %19 = arith.divf %14, %18 : vector<16x32xf32>
    %c0_7 = arith.constant 0 : index
    %c0_8 = arith.constant 0 : index
    %20 = vector.load %arg3[%c0_7, %c0_8] : memref<1x32xf32, #tpu.memory_space<vmem>>, vector<1x32xf32>
    %21 = vector.broadcast %20 : vector<1x32xf32> to vector<16x32xf32>
    %22 = arith.addf %19, %21 : vector<16x32xf32>
    %23 = arith.truncf %22 : vector<16x32xf32> to vector<16x32xbf16>
    %c0_9 = arith.constant 0 : index
    %c0_10 = arith.constant 0 : index
    %24 = vector.load %arg4[%c0_9, %c0_10] : memref<32x64xbf16, #tpu.memory_space<vmem>>, vector<32x64xbf16>
    %cst_11 = arith.constant dense<0.000000e+00> : vector<16x64xf32>
    %25 = tpu.matmul %23, %24, %cst_11 {dimension_numbers = #tpu.dot_dimension_numbers<[1], [0], [0], [1], [0, 0, 1, 1], [], []>} : vector<16x32xbf16>, vector<32x64xbf16>, vector<16x64xf32> -> vector<16x64xf32>
    %c0_12 = arith.constant 0 : index
    %c0_13 = arith.constant 0 : index
    %26 = vector.load %arg5[%c0_12, %c0_13] : memref<1x64xf32, #tpu.memory_space<vmem>>, vector<1x64xf32>
    %27 = vector.broadcast %26 : vector<1x64xf32> to vector<16x64xf32>
    %28 = arith.addf %25, %27 : vector<16x64xf32>
    %cst_14 = arith.constant 0.000000e+00 : f32
    %29 = vector.broadcast %cst_14 : f32 to vector<16x64xf32>
    %30 = arith.maximumf %28, %29 : vector<16x64xf32>
    %31 = arith.truncf %30 : vector<16x64xf32> to vector<16x64xbf16>
    %c0_15 = arith.constant 0 : index
    %c0_16 = arith.constant 0 : index
    %32 = vector.load %arg6[%c0_15, %c0_16] : memref<64x32xbf16, #tpu.memory_space<vmem>>, vector<64x32xbf16>
    %cst_17 = arith.constant dense<0.000000e+00> : vector<16x32xf32>
    %33 = tpu.matmul %31, %32, %cst_17 {dimension_numbers = #tpu.dot_dimension_numbers<[1], [0], [0], [1], [0, 0, 1, 1], [], []>} : vector<16x64xbf16>, vector<64x32xbf16>, vector<16x32xf32> -> vector<16x32xf32>
    %c0_18 = arith.constant 0 : index
    %c0_19 = arith.constant 0 : index
    %34 = vector.load %arg7[%c0_18, %c0_19] : memref<1x32xf32, #tpu.memory_space<vmem>>, vector<1x32xf32>
    %35 = vector.broadcast %34 : vector<1x32xf32> to vector<16x32xf32>
    %36 = arith.addf %33, %35 : vector<16x32xf32>
    %37 = arith.addf %0, %36 : vector<16x32xf32>
    %c0_20 = arith.constant 0 : index
    %c0_21 = arith.constant 0 : index
    %38 = vector.load %arg8[%c0_20, %c0_21] : memref<16x32xf32, #tpu.memory_space<vmem>>, vector<16x32xf32>
    tpu.vector_store %arg8[%c0_20, %c0_21], %37 {strides = array<i32>} : memref<16x32xf32, #tpu.memory_space<vmem>>, vector<16x32xf32>,
    return
  }
  func.func @transform_0(%arg0: i32) -> (i32, i32) {
    %c0_i32 = arith.constant 0 : i32
    %c0_i32_0 = arith.constant 0 : i32
    return %arg0, %c0_i32 : i32, i32
  }
  func.func @transform_1(%arg0: i32) -> (i32, i32) {
    %c0_i32 = arith.constant 0 : i32
    %c0_i32_0 = arith.constant 0 : i32
    %c0_i32_1 = arith.constant 0 : i32
    return %c0_i32, %c0_i32_0 : i32, i32
  }
  func.func @transform_2(%arg0: i32) -> (i32, i32) {
    %c0_i32 = arith.constant 0 : i32
    %c0_i32_0 = arith.constant 0 : i32
    %c0_i32_1 = arith.constant 0 : i32
    return %c0_i32, %c0_i32_0 : i32, i32
  }
  func.func @transform_3(%arg0: i32) -> (i32, i32) {
    %c0_i32 = arith.constant 0 : i32
    %c0_i32_0 = arith.constant 0 : i32
    %c0_i32_1 = arith.constant 0 : i32
    return %c0_i32, %c0_i32_0 : i32, i32
  }
  func.func @transform_4(%arg0: i32) -> (i32, i32) {
    %c0_i32 = arith.constant 0 : i32
    %c0_i32_0 = arith.constant 0 : i32
    %c0_i32_1 = arith.constant 0 : i32
    return %c0_i32, %c0_i32_0 : i32, i32
  }
  func.func @transform_5(%arg0: i32) -> (i32, i32) {
    %c0_i32 = arith.constant 0 : i32
    %c0_i32_0 = arith.constant 0 : i32
    %c0_i32_1 = arith.constant 0 : i32
    return %c0_i32, %c0_i32_0 : i32, i32
  }
  func.func @transform_6(%arg0: i32) -> (i32, i32) {
    %c0_i32 = arith.constant 0 : i32
    %c0_i32_0 = arith.constant 0 : i32
    %c0_i32_1 = arith.constant 0 : i32
    return %c0_i32, %c0_i32_0 : i32, i32
  }
  func.func @transform_7(%arg0: i32) -> (i32, i32) {
    %c0_i32 = arith.constant 0 : i32
    %c0_i32_0 = arith.constant 0 : i32
    return %arg0, %c0_i32 : i32, i32
  }
}

module attributes {stable_mosaic.version = 11 : i64} {
  func.func @_norm_kernel(%arg0: i32, %arg1: memref<16x32xf32, #tpu.memory_space<vmem>>, %arg2: memref<1x32xf32, #tpu.memory_space<vmem>>, %arg3: memref<1x32xf32, #tpu.memory_space<vmem>>, %arg4: memref<16x32xf32, #tpu.memory_space<vmem>>) attributes {dimension_semantics = [#tpu.dimension_semantics<parallel>], iteration_bounds = array<i64: 1>, scalar_prefetch = 0 : i64, scratch_operands = 0 : i64, tpu.core_type = #tpu.core_type<tc>, window_params = [{transform_indices = @transform_0, window_bounds = array<i64: 16, 32>}, {pipeline_mode = #tpu.pipeline_mode<synchronous>, transform_indices = @transform_1, window_bounds = array<i64: 1, 32>}, {pipeline_mode = #tpu.pipeline_mode<synchronous>, transform_indices = @transform_2, window_bounds = array<i64: 1, 32>}, {transform_indices = @transform_3, window_bounds = array<i64: 16, 32>}]} {
    %c0 = arith.constant 0 : index
    %c0_0 = arith.constant 0 : index
    %0 = vector.load %arg1[%c0, %c0_0] : memref<16x32xf32, #tpu.memory_space<vmem>>, vector<16x32xf32>
    %cst = arith.constant dense<0.000000e+00> : vector<16xf32>
    %1 = vector.multi_reduction <add>, %0, %cst [1] : vector<16x32xf32> to vector<16xf32>
    %2 = vector.shape_cast %1 : vector<16xf32> to vector<16x1xf32>
    %cst_1 = arith.constant 3.200000e+01 : f32
    %3 = vector.broadcast %cst_1 : f32 to vector<16x1xf32>
    %4 = arith.divf %2, %3 : vector<16x1xf32>
    %5 = vector.broadcast %4 : vector<16x1xf32> to vector<16x32xf32>
    %6 = arith.subf %0, %5 : vector<16x32xf32>
    %7 = arith.mulf %6, %6 : vector<16x32xf32>
    %cst_2 = arith.constant dense<0.000000e+00> : vector<16xf32>
    %8 = vector.multi_reduction <add>, %7, %cst_2 [1] : vector<16x32xf32> to vector<16xf32>
    %9 = vector.shape_cast %8 : vector<16xf32> to vector<16x1xf32>
    %cst_3 = arith.constant 3.100000e+01 : f32
    %10 = vector.broadcast %cst_3 : f32 to vector<16x1xf32>
    %11 = arith.divf %9, %10 : vector<16x1xf32>
    %c0_4 = arith.constant 0 : index
    %c0_5 = arith.constant 0 : index
    %12 = vector.load %arg2[%c0_4, %c0_5] : memref<1x32xf32, #tpu.memory_space<vmem>>, vector<1x32xf32>
    %13 = vector.broadcast %12 : vector<1x32xf32> to vector<16x32xf32>
    %14 = arith.mulf %13, %6 : vector<16x32xf32>
    %15 = math.sqrt %11 : vector<16x1xf32>
    %cst_6 = arith.constant 9.99999997E-7 : f32
    %16 = vector.broadcast %cst_6 : f32 to vector<16x1xf32>
    %17 = arith.addf %15, %16 : vector<16x1xf32>
    %18 = vector.broadcast %17 : vector<16x1xf32> to vector<16x32xf32>
    %19 = arith.divf %14, %18 : vector<16x32xf32>
    %c0_7 = arith.constant 0 : index
    %c0_8 = arith.constant 0 : index
    %20 = vector.load %arg3[%c0_7, %c0_8] : memref<1x32xf32, #tpu.memory_space<vmem>>, vector<1x32xf32>
    %21 = vector.broadcast %20 : vector<1x32xf32> to vector<16x32xf32>
    %22 = arith.addf %19, %21 : vector<16x32xf32>
    %c0_9 = arith.constant 0 : index
    %c0_10 = arith.constant 0 : index
    %23 = vector.load %arg4[%c0_9, %c0_10] : memref<16x32xf32, #tpu.memory_space<vmem>>, vector<16x32xf32>
    tpu.vector_store %arg4[%c0_9, %c0_10], %22 {strides = array<i32>} : memref<16x32xf32, #tpu.memory_space<vmem>>, vector<16x32xf32>,
    return
  }
  func.func @transform_0(%arg0: i32) -> (i32, i32) {
    %c0_i32 = arith.constant 0 : i32
    %c0_i32_0 = arith.constant 0 : i32
    return %arg0, %c0_i32 : i32, i32
  }
  func.func @transform_1(%arg0: i32) -> (i32, i32) {
    %c0_i32 = arith.constant 0 : i32
    %c0_i32_0 = arith.constant 0 : i32
    %c0_i32_1 = arith.constant 0 : i32
    return %c0_i32, %c0_i32_0 : i32, i32
  }
  func.func @transform_2(%arg0: i32) -> (i32, i32) {
    %c0_i32 = arith.constant 0 : i32
    %c0_i32_0 = arith.constant 0 : i32
    %c0_i32_1 = arith.constant 0 : i32
    return %c0_i32, %c0_i32_0 : i32, i32
  }
  func.func @transform_3(%arg0: i32) -> (i32, i32) {
    %c0_i32 = arith.constant 0 : i32
    %c0_i32_0 = arith.constant 0 : i32
    return %arg0, %c0_i32 : i32, i32
  }
}

module attributes {stable_mosaic.version = 11 : i64} {
  func.func @kernel(%arg0: i32, %arg1: memref<1x8x32xf32, #tpu.memory_space<vmem>>, %arg2: memref<1x8x32xf32, #tpu.memory_space<vmem>>, %arg3: memref<1x1x8xf32, #tpu.memory_space<vmem>>, %arg4: memref<1x32xf32, #tpu.memory_space<vmem>>, %arg5: memref<1x32xf32, #tpu.memory_space<vmem>>, %arg6: memref<4x32x8xbf16, #tpu.memory_space<vmem>>, %arg7: memref<4x32x8xbf16, #tpu.memory_space<vmem>>, %arg8: memref<4x32x8xbf16, #tpu.memory_space<vmem>>, %arg9: memref<4x1x8xf32, #tpu.memory_space<vmem>>, %arg10: memref<4x1x8xf32, #tpu.memory_space<vmem>>, %arg11: memref<4x1x8xf32, #tpu.memory_space<vmem>>, %arg12: memref<4x8x32xbf16, #tpu.memory_space<vmem>>, %arg13: memref<1x32xf32, #tpu.memory_space<vmem>>, %arg14: memref<1x8x32xf32, #tpu.memory_space<vmem>>) attributes {dimension_semantics = [#tpu.dimension_semantics<parallel>], iteration_bounds = array<i64: 2>, scalar_prefetch = 0 : i64, scratch_operands = 0 : i64, tpu.core_type = #tpu.core_type<tc>, window_params = [{transform_indices = @transform_0, window_bounds = array<i64: 1, 8, 32>}, {transform_indices = @transform_1, window_bounds = array<i64: 1, 8, 32>}, {transform_indices = @transform_2, window_bounds = array<i64: 1, 1, 8>}, {pipeline_mode = #tpu.pipeline_mode<synchronous>, transform_indices = @transform_3, window_bounds = array<i64: 1, 32>}, {pipeline_mode = #tpu.pipeline_mode<synchronous>, transform_indices = @transform_4, window_bounds = array<i64: 1, 32>}, {pipeline_mode = #tpu.pipeline_mode<synchronous>, transform_indices = @transform_5, window_bounds = array<i64: 4, 32, 8>}, {pipeline_mode = #tpu.pipeline_mode<synchronous>, transform_indices = @transform_6, window_bounds = array<i64: 4, 32, 8>}, {pipeline_mode = #tpu.pipeline_mode<synchronous>, transform_indices = @transform_7, window_bounds = array<i64: 4, 32, 8>}, {pipeline_mode = #tpu.pipeline_mode<synchronous>, transform_indices = @transform_8, window_bounds = array<i64: 4, 1, 8>}, {pipeline_mode = #tpu.pipeline_mode<synchronous>, transform_indices = @transform_9, window_bounds = array<i64: 4, 1, 8>}, {pipeline_mode = #tpu.pipeline_mode<synchronous>, transform_indices = @transform_10, window_bounds = array<i64: 4, 1, 8>}, {pipeline_mode = #tpu.pipeline_mode<synchronous>, transform_indices = @transform_11, window_bounds = array<i64: 4, 8, 32>}, {pipeline_mode = #tpu.pipeline_mode<synchronous>, transform_indices = @transform_12, window_bounds = array<i64: 1, 32>}, {transform_indices = @transform_13, window_bounds = array<i64: 1, 8, 32>}]} {
    %c0 = arith.constant 0 : index
    %c0_0 = arith.constant 0 : index
    %c0_1 = arith.constant 0 : index
    %0 = vector.load %arg1[%c0, %c0_0, %c0_1] : memref<1x8x32xf32, #tpu.memory_space<vmem>>, vector<1x8x32xf32>
    %1 = vector.shape_cast %0 : vector<1x8x32xf32> to vector<8x32xf32>
    %cst = arith.constant dense<0.000000e+00> : vector<8xf32>
    %2 = vector.multi_reduction <add>, %1, %cst [1] : vector<8x32xf32> to vector<8xf32>
    %3 = vector.shape_cast %2 : vector<8xf32> to vector<8x1xf32>
    %cst_2 = arith.constant 3.200000e+01 : f32
    %4 = vector.broadcast %cst_2 : f32 to vector<8x1xf32>
    %5 = arith.divf %3, %4 : vector<8x1xf32>
    %6 = vector.broadcast %5 : vector<8x1xf32> to vector<8x32xf32>
    %7 = arith.subf %1, %6 : vector<8x32xf32>
    %8 = arith.mulf %7, %7 : vector<8x32xf32>
    %cst_3 = arith.constant dense<0.000000e+00> : vector<8xf32>
    %9 = vector.multi_reduction <add>, %8, %cst_3 [1] : vector<8x32xf32> to vector<8xf32>
    %10 = vector.shape_cast %9 : vector<8xf32> to vector<8x1xf32>
    %cst_4 = arith.constant 3.100000e+01 : f32
    %11 = vector.broadcast %cst_4 : f32 to vector<8x1xf32>
    %12 = arith.divf %10, %11 : vector<8x1xf32>
    %c0_5 = arith.constant 0 : index
    %c0_6 = arith.constant 0 : index
    %13 = vector.load %arg4[%c0_5, %c0_6] : memref<1x32xf32, #tpu.memory_space<vmem>>, vector<1x32xf32>
    %14 = vector.broadcast %13 : vector<1x32xf32> to vector<8x32xf32>
    %15 = arith.mulf %14, %7 : vector<8x32xf32>
    %16 = math.sqrt %12 : vector<8x1xf32>
    %cst_7 = arith.constant 9.99999997E-7 : f32
    %17 = vector.broadcast %cst_7 : f32 to vector<8x1xf32>
    %18 = arith.addf %16, %17 : vector<8x1xf32>
    %19 = vector.broadcast %18 : vector<8x1xf32> to vector<8x32xf32>
    %20 = arith.divf %15, %19 : vector<8x32xf32>
    %c0_8 = arith.constant 0 : index
    %c0_9 = arith.constant 0 : index
    %21 = vector.load %arg5[%c0_8, %c0_9] : memref<1x32xf32, #tpu.memory_space<vmem>>, vector<1x32xf32>
    %22 = vector.broadcast %21 : vector<1x32xf32> to vector<8x32xf32>
    %23 = arith.addf %20, %22 : vector<8x32xf32>
    %c0_10 = arith.constant 0 : index
    %c0_11 = arith.constant 0 : index
    %c0_12 = arith.constant 0 : index
    %24 = vector.load %arg2[%c0_10, %c0_11, %c0_12] : memref<1x8x32xf32, #tpu.memory_space<vmem>>, vector<1x8x32xf32>
    %25 = vector.shape_cast %24 : vector<1x8x32xf32> to vector<8x32xf32>
    %c0_13 = arith.constant 0 : index
    %c0_14 = arith.constant 0 : index
    %c0_15 = arith.constant 0 : index
    %26 = vector.load %arg3[%c0_13, %c0_14, %c0_15] : memref<1x1x8xf32, #tpu.memory_space<vmem>>, vector<1x1x8xf32>
    %27 = vector.shape_cast %26 : vector<1x1x8xf32> to vector<1x8xf32>
    %cst_16 = arith.constant 0.000000e+00 : f32
    %28 = vector.broadcast %cst_16 : f32 to vector<1x8xf32>
    %29 = arith.cmpf ogt, %27, %28 : vector<1x8xf32>
    %cst_17 = arith.constant 0.000000e+00 : f32
    %cst_18 = arith.constant -1.000000e+09 : f32
    %30 = vector.broadcast %cst_17 : f32 to vector<1x8xf32>
    %31 = vector.broadcast %cst_18 : f32 to vector<1x8xf32>
    %32 = arith.select %29, %30, %31 : vector<1x8xi1>, vector<1x8xf32>
    %33 = arith.truncf %23 : vector<8x32xf32> to vector<8x32xbf16>
    %34 = arith.truncf %25 : vector<8x32xf32> to vector<8x32xbf16>
    %cst_19 = arith.constant 0.000000e+00 : f32
    %35 = vector.broadcast %cst_19 : f32 to vector<8x32xf32>
    %c0_i32 = arith.constant 0 : i32
    %36 = arith.index_cast %c0_i32 : i32 to index
    %c0_20 = arith.constant 0 : index
    %c0_21 = arith.constant 0 : index
    %37 = vector.load %arg6[%36, %c0_20, %c0_21] : memref<4x32x8xbf16, #tpu.memory_space<vmem>>, vector<1x32x8xbf16>
    %38 = vector.shape_cast %37 : vector<1x32x8xbf16> to vector<32x8xbf16>
    %cst_22 = arith.constant dense<0.000000e+00> : vector<8x8xf32>
    %39 = tpu.matmul %33, %38, %cst_22 {dimension_numbers = #tpu.dot_dimension_numbers<[1], [0], [0], [1], [0, 0, 1, 1], [], []>} : vector<8x32xbf16>, vector<32x8xbf16>, vector<8x8xf32> -> vector<8x8xf32>
    %40 = arith.index_cast %c0_i32 : i32 to index
    %c0_23 = arith.constant 0 : index
    %c0_24 = arith.constant 0 : index
    %41 = vector.load %arg9[%40, %c0_23, %c0_24] : memref<4x1x8xf32, #tpu.memory_space<vmem>>, vector<1x1x8xf32>
    %42 = vector.shape_cast %41 : vector<1x1x8xf32> to vector<1x8xf32>
    %43 = vector.broadcast %42 : vector<1x8xf32> to vector<8x8xf32>
    %44 = arith.addf %39, %43 : vector<8x8xf32>
    %cst_25 = arith.constant 0.353553385 : f32
    %45 = vector.broadcast %cst_25 : f32 to vector<8x8xf32>
    %46 = arith.mulf %44, %45 : vector<8x8xf32>
    %47 = arith.index_cast %c0_i32 : i32 to index
    %c0_26 = arith.constant 0 : index
    %c0_27 = arith.constant 0 : index
    %48 = vector.load %arg7[%47, %c0_26, %c0_27] : memref<4x32x8xbf16, #tpu.memory_space<vmem>>, vector<1x32x8xbf16>
    %49 = vector.shape_cast %48 : vector<1x32x8xbf16> to vector<32x8xbf16>
    %cst_28 = arith.constant dense<0.000000e+00> : vector<8x8xf32>
    %50 = tpu.matmul %34, %49, %cst_28 {dimension_numbers = #tpu.dot_dimension_numbers<[1], [0], [0], [1], [0, 0, 1, 1], [], []>} : vector<8x32xbf16>, vector<32x8xbf16>, vector<8x8xf32> -> vector<8x8xf32>
    %51 = arith.index_cast %c0_i32 : i32 to index
    %c0_29 = arith.constant 0 : index
    %c0_30 = arith.constant 0 : index
    %52 = vector.load %arg10[%51, %c0_29, %c0_30] : memref<4x1x8xf32, #tpu.memory_space<vmem>>, vector<1x1x8xf32>
    %53 = vector.shape_cast %52 : vector<1x1x8xf32> to vector<1x8xf32>
    %54 = vector.broadcast %53 : vector<1x8xf32> to vector<8x8xf32>
    %55 = arith.addf %50, %54 : vector<8x8xf32>
    %56 = arith.index_cast %c0_i32 : i32 to index
    %c0_31 = arith.constant 0 : index
    %c0_32 = arith.constant 0 : index
    %57 = vector.load %arg8[%56, %c0_31, %c0_32] : memref<4x32x8xbf16, #tpu.memory_space<vmem>>, vector<1x32x8xbf16>
    %58 = vector.shape_cast %57 : vector<1x32x8xbf16> to vector<32x8xbf16>
    %cst_33 = arith.constant dense<0.000000e+00> : vector<8x8xf32>
    %59 = tpu.matmul %34, %58, %cst_33 {dimension_numbers = #tpu.dot_dimension_numbers<[1], [0], [0], [1], [0, 0, 1, 1], [], []>} : vector<8x32xbf16>, vector<32x8xbf16>, vector<8x8xf32> -> vector<8x8xf32>
    %60 = arith.index_cast %c0_i32 : i32 to index
    %c0_34 = arith.constant 0 : index
    %c0_35 = arith.constant 0 : index
    %61 = vector.load %arg11[%60, %c0_34, %c0_35] : memref<4x1x8xf32, #tpu.memory_space<vmem>>, vector<1x1x8xf32>
    %62 = vector.shape_cast %61 : vector<1x1x8xf32> to vector<1x8xf32>
    %63 = vector.broadcast %62 : vector<1x8xf32> to vector<8x8xf32>
    %64 = arith.addf %59, %63 : vector<8x8xf32>
    %65 = arith.truncf %46 : vector<8x8xf32> to vector<8x8xbf16>
    %66 = arith.truncf %55 : vector<8x8xf32> to vector<8x8xbf16>
    %cst_36 = arith.constant dense<0.000000e+00> : vector<8x8xf32>
    %67 = tpu.matmul %65, %66, %cst_36 {dimension_numbers = #tpu.dot_dimension_numbers<[1], [1], [0], [0], [0, 0, 1, 0], [], []>} : vector<8x8xbf16>, vector<8x8xbf16>, vector<8x8xf32> -> vector<8x8xf32>
    %68 = vector.broadcast %32 : vector<1x8xf32> to vector<8x8xf32>
    %69 = arith.addf %67, %68 : vector<8x8xf32>
    %cst_37 = arith.constant dense<0xFF800000> : vector<8xf32>
    %70 = vector.multi_reduction <maximumf>, %69, %cst_37 [1] : vector<8x8xf32> to vector<8xf32>
    %71 = vector.shape_cast %70 : vector<8xf32> to vector<8x1xf32>
    %72 = vector.broadcast %71 : vector<8x1xf32> to vector<8x8xf32>
    %73 = arith.subf %69, %72 : vector<8x8xf32>
    %74 = math.exp %73 : vector<8x8xf32>
    %cst_38 = arith.constant dense<0.000000e+00> : vector<8xf32>
    %75 = vector.multi_reduction <add>, %74, %cst_38 [1] : vector<8x8xf32> to vector<8xf32>
    %76 = vector.shape_cast %75 : vector<8xf32> to vector<8x1xf32>
    %77 = tpu.reciprocal %76 {approx = true} : vector<8x1xf32> -> vector<8x1xf32>
    %78 = vector.broadcast %77 : vector<8x1xf32> to vector<8x8xf32>
    %79 = arith.mulf %74, %78 : vector<8x8xf32>
    %80 = arith.truncf %79 : vector<8x8xf32> to vector<8x8xbf16>
    %81 = arith.truncf %64 : vector<8x8xf32> to vector<8x8xbf16>
    %cst_39 = arith.constant dense<0.000000e+00> : vector<8x8xf32>
    %82 = tpu.matmul %80, %81, %cst_39 {dimension_numbers = #tpu.dot_dimension_numbers<[1], [0], [0], [1], [0, 0, 1, 1], [], []>} : vector<8x8xbf16>, vector<8x8xbf16>, vector<8x8xf32> -> vector<8x8xf32>
    %83 = arith.truncf %82 : vector<8x8xf32> to vector<8x8xbf16>
    %84 = arith.index_cast %c0_i32 : i32 to index
    %c0_40 = arith.constant 0 : index
    %c0_41 = arith.constant 0 : index
    %85 = vector.load %arg12[%84, %c0_40, %c0_41] : memref<4x8x32xbf16, #tpu.memory_space<vmem>>, vector<1x8x32xbf16>
    %86 = vector.shape_cast %85 : vector<1x8x32xbf16> to vector<8x32xbf16>
    %cst_42 = arith.constant dense<0.000000e+00> : vector<8x32xf32>
    %87 = tpu.matmul %83, %86, %cst_42 {dimension_numbers = #tpu.dot_dimension_numbers<[1], [0], [0], [1], [0, 0, 1, 1], [], []>} : vector<8x8xbf16>, vector<8x32xbf16>, vector<8x32xf32> -> vector<8x32xf32>
    %88 = arith.addf %35, %87 : vector<8x32xf32>
    %c1_i32 = arith.constant 1 : i32
    %89 = arith.index_cast %c1_i32 : i32 to index
    %c0_43 = arith.constant 0 : index
    %c0_44 = arith.constant 0 : index
    %90 = vector.load %arg6[%89, %c0_43, %c0_44] : memref<4x32x8xbf16, #tpu.memory_space<vmem>>, vector<1x32x8xbf16>
    %91 = vector.shape_cast %90 : vector<1x32x8xbf16> to vector<32x8xbf16>
    %cst_45 = arith.constant dense<0.000000e+00> : vector<8x8xf32>
    %92 = tpu.matmul %33, %91, %cst_45 {dimension_numbers = #tpu.dot_dimension_numbers<[1], [0], [0], [1], [0, 0, 1, 1], [], []>} : vector<8x32xbf16>, vector<32x8xbf16>, vector<8x8xf32> -> vector<8x8xf32>
    %93 = arith.index_cast %c1_i32 : i32 to index
    %c0_46 = arith.constant 0 : index
    %c0_47 = arith.constant 0 : index
    %94 = vector.load %arg9[%93, %c0_46, %c0_47] : memref<4x1x8xf32, #tpu.memory_space<vmem>>, vector<1x1x8xf32>
    %95 = vector.shape_cast %94 : vector<1x1x8xf32> to vector<1x8xf32>
    %96 = vector.broadcast %95 : vector<1x8xf32> to vector<8x8xf32>
    %97 = arith.addf %92, %96 : vector<8x8xf32>
    %cst_48 = arith.constant 0.353553385 : f32
    %98 = vector.broadcast %cst_48 : f32 to vector<8x8xf32>
    %99 = arith.mulf %97, %98 : vector<8x8xf32>
    %100 = arith.index_cast %c1_i32 : i32 to index
    %c0_49 = arith.constant 0 : index
    %c0_50 = arith.constant 0 : index
    %101 = vector.load %arg7[%100, %c0_49, %c0_50] : memref<4x32x8xbf16, #tpu.memory_space<vmem>>, vector<1x32x8xbf16>
    %102 = vector.shape_cast %101 : vector<1x32x8xbf16> to vector<32x8xbf16>
    %cst_51 = arith.constant dense<0.000000e+00> : vector<8x8xf32>
    %103 = tpu.matmul %34, %102, %cst_51 {dimension_numbers = #tpu.dot_dimension_numbers<[1], [0], [0], [1], [0, 0, 1, 1], [], []>} : vector<8x32xbf16>, vector<32x8xbf16>, vector<8x8xf32> -> vector<8x8xf32>
    %104 = arith.index_cast %c1_i32 : i32 to index
    %c0_52 = arith.constant 0 : index
    %c0_53 = arith.constant 0 : index
    %105 = vector.load %arg10[%104, %c0_52, %c0_53] : memref<4x1x8xf32, #tpu.memory_space<vmem>>, vector<1x1x8xf32>
    %106 = vector.shape_cast %105 : vector<1x1x8xf32> to vector<1x8xf32>
    %107 = vector.broadcast %106 : vector<1x8xf32> to vector<8x8xf32>
    %108 = arith.addf %103, %107 : vector<8x8xf32>
    %109 = arith.index_cast %c1_i32 : i32 to index
    %c0_54 = arith.constant 0 : index
    %c0_55 = arith.constant 0 : index
    %110 = vector.load %arg8[%109, %c0_54, %c0_55] : memref<4x32x8xbf16, #tpu.memory_space<vmem>>, vector<1x32x8xbf16>
    %111 = vector.shape_cast %110 : vector<1x32x8xbf16> to vector<32x8xbf16>
    %cst_56 = arith.constant dense<0.000000e+00> : vector<8x8xf32>
    %112 = tpu.matmul %34, %111, %cst_56 {dimension_numbers = #tpu.dot_dimension_numbers<[1], [0], [0], [1], [0, 0, 1, 1], [], []>} : vector<8x32xbf16>, vector<32x8xbf16>, vector<8x8xf32> -> vector<8x8xf32>
    %113 = arith.index_cast %c1_i32 : i32 to index
    %c0_57 = arith.constant 0 : index
    %c0_58 = arith.constant 0 : index
    %114 = vector.load %arg11[%113, %c0_57, %c0_58] : memref<4x1x8xf32, #tpu.memory_space<vmem>>, vector<1x1x8xf32>
    %115 = vector.shape_cast %114 : vector<1x1x8xf32> to vector<1x8xf32>
    %116 = vector.broadcast %115 : vector<1x8xf32> to vector<8x8xf32>
    %117 = arith.addf %112, %116 : vector<8x8xf32>
    %118 = arith.truncf %99 : vector<8x8xf32> to vector<8x8xbf16>
    %119 = arith.truncf %108 : vector<8x8xf32> to vector<8x8xbf16>
    %cst_59 = arith.constant dense<0.000000e+00> : vector<8x8xf32>
    %120 = tpu.matmul %118, %119, %cst_59 {dimension_numbers = #tpu.dot_dimension_numbers<[1], [1], [0], [0], [0, 0, 1, 0], [], []>} : vector<8x8xbf16>, vector<8x8xbf16>, vector<8x8xf32> -> vector<8x8xf32>
    %121 = vector.broadcast %32 : vector<1x8xf32> to vector<8x8xf32>
    %122 = arith.addf %120, %121 : vector<8x8xf32>
    %cst_60 = arith.constant dense<0xFF800000> : vector<8xf32>
    %123 = vector.multi_reduction <maximumf>, %122, %cst_60 [1] : vector<8x8xf32> to vector<8xf32>
    %124 = vector.shape_cast %123 : vector<8xf32> to vector<8x1xf32>
    %125 = vector.broadcast %124 : vector<8x1xf32> to vector<8x8xf32>
    %126 = arith.subf %122, %125 : vector<8x8xf32>
    %127 = math.exp %126 : vector<8x8xf32>
    %cst_61 = arith.constant dense<0.000000e+00> : vector<8xf32>
    %128 = vector.multi_reduction <add>, %127, %cst_61 [1] : vector<8x8xf32> to vector<8xf32>
    %129 = vector.shape_cast %128 : vector<8xf32> to vector<8x1xf32>
    %130 = tpu.reciprocal %129 {approx = true} : vector<8x1xf32> -> vector<8x1xf32>
    %131 = vector.broadcast %130 : vector<8x1xf32> to vector<8x8xf32>
    %132 = arith.mulf %127, %131 : vector<8x8xf32>
    %133 = arith.truncf %132 : vector<8x8xf32> to vector<8x8xbf16>
    %134 = arith.truncf %117 : vector<8x8xf32> to vector<8x8xbf16>
    %cst_62 = arith.constant dense<0.000000e+00> : vector<8x8xf32>
    %135 = tpu.matmul %133, %134, %cst_62 {dimension_numbers = #tpu.dot_dimension_numbers<[1], [0], [0], [1], [0, 0, 1, 1], [], []>} : vector<8x8xbf16>, vector<8x8xbf16>, vector<8x8xf32> -> vector<8x8xf32>
    %136 = arith.truncf %135 : vector<8x8xf32> to vector<8x8xbf16>
    %137 = arith.index_cast %c1_i32 : i32 to index
    %c0_63 = arith.constant 0 : index
    %c0_64 = arith.constant 0 : index
    %138 = vector.load %arg12[%137, %c0_63, %c0_64] : memref<4x8x32xbf16, #tpu.memory_space<vmem>>, vector<1x8x32xbf16>
    %139 = vector.shape_cast %138 : vector<1x8x32xbf16> to vector<8x32xbf16>
    %cst_65 = arith.constant dense<0.000000e+00> : vector<8x32xf32>
    %140 = tpu.matmul %136, %139, %cst_65 {dimension_numbers = #tpu.dot_dimension_numbers<[1], [0], [0], [1], [0, 0, 1, 1], [], []>} : vector<8x8xbf16>, vector<8x32xbf16>, vector<8x32xf32> -> vector<8x32xf32>
    %141 = arith.addf %88, %140 : vector<8x32xf32>
    %c2_i32 = arith.constant 2 : i32
    %142 = arith.index_cast %c2_i32 : i32 to index
    %c0_66 = arith.constant 0 : index
    %c0_67 = arith.constant 0 : index
    %143 = vector.load %arg6[%142, %c0_66, %c0_67] : memref<4x32x8xbf16, #tpu.memory_space<vmem>>, vector<1x32x8xbf16>
    %144 = vector.shape_cast %143 : vector<1x32x8xbf16> to vector<32x8xbf16>
    %cst_68 = arith.constant dense<0.000000e+00> : vector<8x8xf32>
    %145 = tpu.matmul %33, %144, %cst_68 {dimension_numbers = #tpu.dot_dimension_numbers<[1], [0], [0], [1], [0, 0, 1, 1], [], []>} : vector<8x32xbf16>, vector<32x8xbf16>, vector<8x8xf32> -> vector<8x8xf32>
    %146 = arith.index_cast %c2_i32 : i32 to index
    %c0_69 = arith.constant 0 : index
    %c0_70 = arith.constant 0 : index
    %147 = vector.load %arg9[%146, %c0_69, %c0_70] : memref<4x1x8xf32, #tpu.memory_space<vmem>>, vector<1x1x8xf32>
    %148 = vector.shape_cast %147 : vector<1x1x8xf32> to vector<1x8xf32>
    %149 = vector.broadcast %148 : vector<1x8xf32> to vector<8x8xf32>
    %150 = arith.addf %145, %149 : vector<8x8xf32>
    %cst_71 = arith.constant 0.353553385 : f32
    %151 = vector.broadcast %cst_71 : f32 to vector<8x8xf32>
    %152 = arith.mulf %150, %151 : vector<8x8xf32>
    %153 = arith.index_cast %c2_i32 : i32 to index
    %c0_72 = arith.constant 0 : index
    %c0_73 = arith.constant 0 : index
    %154 = vector.load %arg7[%153, %c0_72, %c0_73] : memref<4x32x8xbf16, #tpu.memory_space<vmem>>, vector<1x32x8xbf16>
    %155 = vector.shape_cast %154 : vector<1x32x8xbf16> to vector<32x8xbf16>
    %cst_74 = arith.constant dense<0.000000e+00> : vector<8x8xf32>
    %156 = tpu.matmul %34, %155, %cst_74 {dimension_numbers = #tpu.dot_dimension_numbers<[1], [0], [0], [1], [0, 0, 1, 1], [], []>} : vector<8x32xbf16>, vector<32x8xbf16>, vector<8x8xf32> -> vector<8x8xf32>
    %157 = arith.index_cast %c2_i32 : i32 to index
    %c0_75 = arith.constant 0 : index
    %c0_76 = arith.constant 0 : index
    %158 = vector.load %arg10[%157, %c0_75, %c0_76] : memref<4x1x8xf32, #tpu.memory_space<vmem>>, vector<1x1x8xf32>
    %159 = vector.shape_cast %158 : vector<1x1x8xf32> to vector<1x8xf32>
    %160 = vector.broadcast %159 : vector<1x8xf32> to vector<8x8xf32>
    %161 = arith.addf %156, %160 : vector<8x8xf32>
    %162 = arith.index_cast %c2_i32 : i32 to index
    %c0_77 = arith.constant 0 : index
    %c0_78 = arith.constant 0 : index
    %163 = vector.load %arg8[%162, %c0_77, %c0_78] : memref<4x32x8xbf16, #tpu.memory_space<vmem>>, vector<1x32x8xbf16>
    %164 = vector.shape_cast %163 : vector<1x32x8xbf16> to vector<32x8xbf16>
    %cst_79 = arith.constant dense<0.000000e+00> : vector<8x8xf32>
    %165 = tpu.matmul %34, %164, %cst_79 {dimension_numbers = #tpu.dot_dimension_numbers<[1], [0], [0], [1], [0, 0, 1, 1], [], []>} : vector<8x32xbf16>, vector<32x8xbf16>, vector<8x8xf32> -> vector<8x8xf32>
    %166 = arith.index_cast %c2_i32 : i32 to index
    %c0_80 = arith.constant 0 : index
    %c0_81 = arith.constant 0 : index
    %167 = vector.load %arg11[%166, %c0_80, %c0_81] : memref<4x1x8xf32, #tpu.memory_space<vmem>>, vector<1x1x8xf32>
    %168 = vector.shape_cast %167 : vector<1x1x8xf32> to vector<1x8xf32>
    %169 = vector.broadcast %168 : vector<1x8xf32> to vector<8x8xf32>
    %170 = arith.addf %165, %169 : vector<8x8xf32>
    %171 = arith.truncf %152 : vector<8x8xf32> to vector<8x8xbf16>
    %172 = arith.truncf %161 : vector<8x8xf32> to vector<8x8xbf16>
    %cst_82 = arith.constant dense<0.000000e+00> : vector<8x8xf32>
    %173 = tpu.matmul %171, %172, %cst_82 {dimension_numbers = #tpu.dot_dimension_numbers<[1], [1], [0], [0], [0, 0, 1, 0], [], []>} : vector<8x8xbf16>, vector<8x8xbf16>, vector<8x8xf32> -> vector<8x8xf32>
    %174 = vector.broadcast %32 : vector<1x8xf32> to vector<8x8xf32>
    %175 = arith.addf %173, %174 : vector<8x8xf32>
    %cst_83 = arith.constant dense<0xFF800000> : vector<8xf32>
    %176 = vector.multi_reduction <maximumf>, %175, %cst_83 [1] : vector<8x8xf32> to vector<8xf32>
    %177 = vector.shape_cast %176 : vector<8xf32> to vector<8x1xf32>
    %178 = vector.broadcast %177 : vector<8x1xf32> to vector<8x8xf32>
    %179 = arith.subf %175, %178 : vector<8x8xf32>
    %180 = math.exp %179 : vector<8x8xf32>
    %cst_84 = arith.constant dense<0.000000e+00> : vector<8xf32>
    %181 = vector.multi_reduction <add>, %180, %cst_84 [1] : vector<8x8xf32> to vector<8xf32>
    %182 = vector.shape_cast %181 : vector<8xf32> to vector<8x1xf32>
    %183 = tpu.reciprocal %182 {approx = true} : vector<8x1xf32> -> vector<8x1xf32>
    %184 = vector.broadcast %183 : vector<8x1xf32> to vector<8x8xf32>
    %185 = arith.mulf %180, %184 : vector<8x8xf32>
    %186 = arith.truncf %185 : vector<8x8xf32> to vector<8x8xbf16>
    %187 = arith.truncf %170 : vector<8x8xf32> to vector<8x8xbf16>
    %cst_85 = arith.constant dense<0.000000e+00> : vector<8x8xf32>
    %188 = tpu.matmul %186, %187, %cst_85 {dimension_numbers = #tpu.dot_dimension_numbers<[1], [0], [0], [1], [0, 0, 1, 1], [], []>} : vector<8x8xbf16>, vector<8x8xbf16>, vector<8x8xf32> -> vector<8x8xf32>
    %189 = arith.truncf %188 : vector<8x8xf32> to vector<8x8xbf16>
    %190 = arith.index_cast %c2_i32 : i32 to index
    %c0_86 = arith.constant 0 : index
    %c0_87 = arith.constant 0 : index
    %191 = vector.load %arg12[%190, %c0_86, %c0_87] : memref<4x8x32xbf16, #tpu.memory_space<vmem>>, vector<1x8x32xbf16>
    %192 = vector.shape_cast %191 : vector<1x8x32xbf16> to vector<8x32xbf16>
    %cst_88 = arith.constant dense<0.000000e+00> : vector<8x32xf32>
    %193 = tpu.matmul %189, %192, %cst_88 {dimension_numbers = #tpu.dot_dimension_numbers<[1], [0], [0], [1], [0, 0, 1, 1], [], []>} : vector<8x8xbf16>, vector<8x32xbf16>, vector<8x32xf32> -> vector<8x32xf32>
    %194 = arith.addf %141, %193 : vector<8x32xf32>
    %c3_i32 = arith.constant 3 : i32
    %195 = arith.index_cast %c3_i32 : i32 to index
    %c0_89 = arith.constant 0 : index
    %c0_90 = arith.constant 0 : index
    %196 = vector.load %arg6[%195, %c0_89, %c0_90] : memref<4x32x8xbf16, #tpu.memory_space<vmem>>, vector<1x32x8xbf16>
    %197 = vector.shape_cast %196 : vector<1x32x8xbf16> to vector<32x8xbf16>
    %cst_91 = arith.constant dense<0.000000e+00> : vector<8x8xf32>
    %198 = tpu.matmul %33, %197, %cst_91 {dimension_numbers = #tpu.dot_dimension_numbers<[1], [0], [0], [1], [0, 0, 1, 1], [], []>} : vector<8x32xbf16>, vector<32x8xbf16>, vector<8x8xf32> -> vector<8x8xf32>
    %199 = arith.index_cast %c3_i32 : i32 to index
    %c0_92 = arith.constant 0 : index
    %c0_93 = arith.constant 0 : index
    %200 = vector.load %arg9[%199, %c0_92, %c0_93] : memref<4x1x8xf32, #tpu.memory_space<vmem>>, vector<1x1x8xf32>
    %201 = vector.shape_cast %200 : vector<1x1x8xf32> to vector<1x8xf32>
    %202 = vector.broadcast %201 : vector<1x8xf32> to vector<8x8xf32>
    %203 = arith.addf %198, %202 : vector<8x8xf32>
    %cst_94 = arith.constant 0.353553385 : f32
    %204 = vector.broadcast %cst_94 : f32 to vector<8x8xf32>
    %205 = arith.mulf %203, %204 : vector<8x8xf32>
    %206 = arith.index_cast %c3_i32 : i32 to index
    %c0_95 = arith.constant 0 : index
    %c0_96 = arith.constant 0 : index
    %207 = vector.load %arg7[%206, %c0_95, %c0_96] : memref<4x32x8xbf16, #tpu.memory_space<vmem>>, vector<1x32x8xbf16>
    %208 = vector.shape_cast %207 : vector<1x32x8xbf16> to vector<32x8xbf16>
    %cst_97 = arith.constant dense<0.000000e+00> : vector<8x8xf32>
    %209 = tpu.matmul %34, %208, %cst_97 {dimension_numbers = #tpu.dot_dimension_numbers<[1], [0], [0], [1], [0, 0, 1, 1], [], []>} : vector<8x32xbf16>, vector<32x8xbf16>, vector<8x8xf32> -> vector<8x8xf32>
    %210 = arith.index_cast %c3_i32 : i32 to index
    %c0_98 = arith.constant 0 : index
    %c0_99 = arith.constant 0 : index
    %211 = vector.load %arg10[%210, %c0_98, %c0_99] : memref<4x1x8xf32, #tpu.memory_space<vmem>>, vector<1x1x8xf32>
    %212 = vector.shape_cast %211 : vector<1x1x8xf32> to vector<1x8xf32>
    %213 = vector.broadcast %212 : vector<1x8xf32> to vector<8x8xf32>
    %214 = arith.addf %209, %213 : vector<8x8xf32>
    %215 = arith.index_cast %c3_i32 : i32 to index
    %c0_100 = arith.constant 0 : index
    %c0_101 = arith.constant 0 : index
    %216 = vector.load %arg8[%215, %c0_100, %c0_101] : memref<4x32x8xbf16, #tpu.memory_space<vmem>>, vector<1x32x8xbf16>
    %217 = vector.shape_cast %216 : vector<1x32x8xbf16> to vector<32x8xbf16>
    %cst_102 = arith.constant dense<0.000000e+00> : vector<8x8xf32>
    %218 = tpu.matmul %34, %217, %cst_102 {dimension_numbers = #tpu.dot_dimension_numbers<[1], [0], [0], [1], [0, 0, 1, 1], [], []>} : vector<8x32xbf16>, vector<32x8xbf16>, vector<8x8xf32> -> vector<8x8xf32>
    %219 = arith.index_cast %c3_i32 : i32 to index
    %c0_103 = arith.constant 0 : index
    %c0_104 = arith.constant 0 : index
    %220 = vector.load %arg11[%219, %c0_103, %c0_104] : memref<4x1x8xf32, #tpu.memory_space<vmem>>, vector<1x1x8xf32>
    %221 = vector.shape_cast %220 : vector<1x1x8xf32> to vector<1x8xf32>
    %222 = vector.broadcast %221 : vector<1x8xf32> to vector<8x8xf32>
    %223 = arith.addf %218, %222 : vector<8x8xf32>
    %224 = arith.truncf %205 : vector<8x8xf32> to vector<8x8xbf16>
    %225 = arith.truncf %214 : vector<8x8xf32> to vector<8x8xbf16>
    %cst_105 = arith.constant dense<0.000000e+00> : vector<8x8xf32>
    %226 = tpu.matmul %224, %225, %cst_105 {dimension_numbers = #tpu.dot_dimension_numbers<[1], [1], [0], [0], [0, 0, 1, 0], [], []>} : vector<8x8xbf16>, vector<8x8xbf16>, vector<8x8xf32> -> vector<8x8xf32>
    %227 = vector.broadcast %32 : vector<1x8xf32> to vector<8x8xf32>
    %228 = arith.addf %226, %227 : vector<8x8xf32>
    %cst_106 = arith.constant dense<0xFF800000> : vector<8xf32>
    %229 = vector.multi_reduction <maximumf>, %228, %cst_106 [1] : vector<8x8xf32> to vector<8xf32>
    %230 = vector.shape_cast %229 : vector<8xf32> to vector<8x1xf32>
    %231 = vector.broadcast %230 : vector<8x1xf32> to vector<8x8xf32>
    %232 = arith.subf %228, %231 : vector<8x8xf32>
    %233 = math.exp %232 : vector<8x8xf32>
    %cst_107 = arith.constant dense<0.000000e+00> : vector<8xf32>
    %234 = vector.multi_reduction <add>, %233, %cst_107 [1] : vector<8x8xf32> to vector<8xf32>
    %235 = vector.shape_cast %234 : vector<8xf32> to vector<8x1xf32>
    %236 = tpu.reciprocal %235 {approx = true} : vector<8x1xf32> -> vector<8x1xf32>
    %237 = vector.broadcast %236 : vector<8x1xf32> to vector<8x8xf32>
    %238 = arith.mulf %233, %237 : vector<8x8xf32>
    %239 = arith.truncf %238 : vector<8x8xf32> to vector<8x8xbf16>
    %240 = arith.truncf %223 : vector<8x8xf32> to vector<8x8xbf16>
    %cst_108 = arith.constant dense<0.000000e+00> : vector<8x8xf32>
    %241 = tpu.matmul %239, %240, %cst_108 {dimension_numbers = #tpu.dot_dimension_numbers<[1], [0], [0], [1], [0, 0, 1, 1], [], []>} : vector<8x8xbf16>, vector<8x8xbf16>, vector<8x8xf32> -> vector<8x8xf32>
    %242 = arith.truncf %241 : vector<8x8xf32> to vector<8x8xbf16>
    %243 = arith.index_cast %c3_i32 : i32 to index
    %c0_109 = arith.constant 0 : index
    %c0_110 = arith.constant 0 : index
    %244 = vector.load %arg12[%243, %c0_109, %c0_110] : memref<4x8x32xbf16, #tpu.memory_space<vmem>>, vector<1x8x32xbf16>
    %245 = vector.shape_cast %244 : vector<1x8x32xbf16> to vector<8x32xbf16>
    %cst_111 = arith.constant dense<0.000000e+00> : vector<8x32xf32>
    %246 = tpu.matmul %242, %245, %cst_111 {dimension_numbers = #tpu.dot_dimension_numbers<[1], [0], [0], [1], [0, 0, 1, 1], [], []>} : vector<8x8xbf16>, vector<8x32xbf16>, vector<8x32xf32> -> vector<8x32xf32>
    %247 = arith.addf %194, %246 : vector<8x32xf32>
    %c4_i32 = arith.constant 4 : i32
    %c0_112 = arith.constant 0 : index
    %c0_113 = arith.constant 0 : index
    %248 = vector.load %arg13[%c0_112, %c0_113] : memref<1x32xf32, #tpu.memory_space<vmem>>, vector<1x32xf32>
    %249 = vector.broadcast %248 : vector<1x32xf32> to vector<8x32xf32>
    %250 = arith.addf %247, %249 : vector<8x32xf32>
    %251 = arith.addf %1, %250 : vector<8x32xf32>
    %c0_114 = arith.constant 0 : index
    %c0_115 = arith.constant 0 : index
    %c0_116 = arith.constant 0 : index
    %252 = vector.load %arg14[%c0_114, %c0_115, %c0_116] : memref<1x8x32xf32, #tpu.memory_space<vmem>>, vector<1x8x32xf32>
    %253 = vector.shape_cast %252 : vector<1x8x32xf32> to vector<8x32xf32>
    %254 = vector.shape_cast %251 : vector<8x32xf32> to vector<1x8x32xf32>
    tpu.vector_store %arg14[%c0_114, %c0_115, %c0_116], %254 {strides = array<i32>} : memref<1x8x32xf32, #tpu.memory_space<vmem>>, vector<1x8x32xf32>,
    return
  }
  func.func @transform_0(%arg0: i32) -> (i32, i32, i32) {
    %c0_i32 = arith.constant 0 : i32
    %c0_i32_0 = arith.constant 0 : i32
    %c0_i32_1 = arith.constant 0 : i32
    return %arg0, %c0_i32, %c0_i32_0 : i32, i32, i32
  }
  func.func @transform_1(%arg0: i32) -> (i32, i32, i32) {
    %c0_i32 = arith.constant 0 : i32
    %c0_i32_0 = arith.constant 0 : i32
    %c0_i32_1 = arith.constant 0 : i32
    return %arg0, %c0_i32, %c0_i32_0 : i32, i32, i32
  }
  func.func @transform_2(%arg0: i32) -> (i32, i32, i32) {
    %c0_i32 = arith.constant 0 : i32
    %c0_i32_0 = arith.constant 0 : i32
    %c0_i32_1 = arith.constant 0 : i32
    return %arg0, %c0_i32, %c0_i32_0 : i32, i32, i32
  }
  func.func @transform_3(%arg0: i32) -> (i32, i32) {
    %c0_i32 = arith.constant 0 : i32
    %c0_i32_0 = arith.constant 0 : i32
    %c0_i32_1 = arith.constant 0 : i32
    return %c0_i32, %c0_i32_0 : i32, i32
  }
  func.func @transform_4(%arg0: i32) -> (i32, i32) {
    %c0_i32 = arith.constant 0 : i32
    %c0_i32_0 = arith.constant 0 : i32
    %c0_i32_1 = arith.constant 0 : i32
    return %c0_i32, %c0_i32_0 : i32, i32
  }
  func.func @transform_5(%arg0: i32) -> (i32, i32, i32) {
    %c0_i32 = arith.constant 0 : i32
    %c0_i32_0 = arith.constant 0 : i32
    %c0_i32_1 = arith.constant 0 : i32
    %c0_i32_2 = arith.constant 0 : i32
    return %c0_i32, %c0_i32_0, %c0_i32_1 : i32, i32, i32
  }
  func.func @transform_6(%arg0: i32) -> (i32, i32, i32) {
    %c0_i32 = arith.constant 0 : i32
    %c0_i32_0 = arith.constant 0 : i32
    %c0_i32_1 = arith.constant 0 : i32
    %c0_i32_2 = arith.constant 0 : i32
    return %c0_i32, %c0_i32_0, %c0_i32_1 : i32, i32, i32
  }
  func.func @transform_7(%arg0: i32) -> (i32, i32, i32) {
    %c0_i32 = arith.constant 0 : i32
    %c0_i32_0 = arith.constant 0 : i32
    %c0_i32_1 = arith.constant 0 : i32
    %c0_i32_2 = arith.constant 0 : i32
    return %c0_i32, %c0_i32_0, %c0_i32_1 : i32, i32, i32
  }
  func.func @transform_8(%arg0: i32) -> (i32, i32, i32) {
    %c0_i32 = arith.constant 0 : i32
    %c0_i32_0 = arith.constant 0 : i32
    %c0_i32_1 = arith.constant 0 : i32
    %c0_i32_2 = arith.constant 0 : i32
    return %c0_i32, %c0_i32_0, %c0_i32_1 : i32, i32, i32
  }
  func.func @transform_9(%arg0: i32) -> (i32, i32, i32) {
    %c0_i32 = arith.constant 0 : i32
    %c0_i32_0 = arith.constant 0 : i32
    %c0_i32_1 = arith.constant 0 : i32
    %c0_i32_2 = arith.constant 0 : i32
    return %c0_i32, %c0_i32_0, %c0_i32_1 : i32, i32, i32
  }
  func.func @transform_10(%arg0: i32) -> (i32, i32, i32) {
    %c0_i32 = arith.constant 0 : i32
    %c0_i32_0 = arith.constant 0 : i32
    %c0_i32_1 = arith.constant 0 : i32
    %c0_i32_2 = arith.constant 0 : i32
    return %c0_i32, %c0_i32_0, %c0_i32_1 : i32, i32, i32
  }
  func.func @transform_11(%arg0: i32) -> (i32, i32, i32) {
    %c0_i32 = arith.constant 0 : i32
    %c0_i32_0 = arith.constant 0 : i32
    %c0_i32_1 = arith.constant 0 : i32
    %c0_i32_2 = arith.constant 0 : i32
    return %c0_i32, %c0_i32_0, %c0_i32_1 : i32, i32, i32
  }
  func.func @transform_12(%arg0: i32) -> (i32, i32) {
    %c0_i32 = arith.constant 0 : i32
    %c0_i32_0 = arith.constant 0 : i32
    %c0_i32_1 = arith.constant 0 : i32
    return %c0_i32, %c0_i32_0 : i32, i32
  }
  func.func @transform_13(%arg0: i32) -> (i32, i32, i32) {
    %c0_i32 = arith.constant 0 : i32
    %c0_i32_0 = arith.constant 0 : i32
    %c0_i32_1 = arith.constant 0 : i32
    return %arg0, %c0_i32, %c0_i32_0 : i32, i32, i32
  }
}

</mosaic_0001>

<bundles_post_ra>
// kernel: duplex_decoder_conv_forward.13
= control target key start
LH: loop header
LB: loop body
LE: loop exit
PB: predicated region body
PF: predicated region fallthrough
CT: control target
= control target key end

     0   :  { %vm17_vm0 = vcmask 261120   ;;  %s175_s0 = inlined_call_operand.vmem [shape: f32[16,32], index: 0, kind: input, shape index: {}]   ;;  %s176_s1 = inlined_call_operand.vmem [shape: f32[1,32], index: 1, kind: input, shape index: {}]   ;;  %s177_s2 = inlined_call_operand.vmem [shape: f32[1,32], index: 2, kind: input, shape index: {}]   ;;  %s178_s3 = inlined_call_operand.hbm [shape: f32[16,32], index: 3, kind: output, shape index: {}]  }
   0x1   :  { %v15_v0 = vld [vmem:[%s175_s0] sm:$0xff]  ;;  %v16_v1 = vld [vmem:[%s175_s0 + $0x8] sm:$0xff] }
   0x2   :  { %v18_v2 = vsel %vm17_vm0, %v15_v0, 0.0 }
   0x3   :  { %8 = vsyncpa [#allocation3], 0  ;;  %19 = vadd.xlane.f32.xlu0 %v18_v2  ;;  %v21_v3 = vsel %vm17_vm0, %v16_v1, 0.0  ;;  %v96_v30 = vld [vmem:[%s176_s1] ss:$0 sm:$0xff]  ;;  %s131_s19 = smov [#allocation2]  }
   0x4   :  { %v97_v33 = vld [vmem:[%s177_s2] ss:$0 sm:$0xff]  ;;  %s85_s20 = sshll.u32 %s131_s19, 4  ;;  %s86_s20 = int_to_ptr.vmem [resolvable:$true] %s85_s20 }
   0x5   :  { %s109_s1 = scalar_lea.vmem %s86_s20, 256  ;;  %p114_p1 = scmp.lt.s32.totalorder %s86_s20, %s86_s20 }
   0x6   :  { %p110_p0 = scmp.ne.s32.totalorder %s86_s20, %s109_s1  ;;  %p115_p2 = scmp.lt.s32.totalorder %s109_s1, %s109_s1 }
   0x7   :  { %22 = vadd.xlane.f32.xlu0 %v21_v3 }
   0x8   :  { %p116_p3 = por %p115_p2, %p114_p1 }
   0xa   :  { %p117_p4 = pnand %p116_p3, %p110_p0 }
  0x8c   :  { %v20_v4 = vpop.xlane.xlu0 %19 }
  0x8d   :  { %v25_v5 = vmul.f32 0.03125, %v20_v4 }
  0x8f   :  { %v27_v6 = vsub.f32 %v15_v0, %v25_v5 }
  0x90   :  { %v23_v7 = vpop.xlane.xlu0 %22 }
  0x91   :  { %v26_v8 = vmul.f32 0.03125, %v23_v7  ;;  %v29_v9 = vmul.f32 %v27_v6, %v27_v6  ;;  %v47_v31 = vmul.f32 %v96_v30, %v27_v6 }
  0x93   :  { %v28_v10 = vsub.f32 %v16_v1, %v26_v8  ;;  %v31_v11 = vsel %vm17_vm0, %v29_v9, 0.0 }
  0x94   :  { %32 = vadd.xlane.f32.xlu1 %v31_v11 }
  0x95   :  { %v30_v12 = vmul.f32 %v28_v10, %v28_v10  ;;  %v48_v35 = vmul.f32 %v96_v30, %v28_v10 }
  0x97   :  { %v34_v13 = vsel %vm17_vm0, %v30_v12, 0.0 }
  0x98   :  { %35 = vadd.xlane.f32.xlu1 %v34_v13 }
 0x11d   :  { %v33_v14 = vpop.xlane.xlu1 %32 }
 0x11e   :  { %v38_v15 = vmul.f32 0.032258064, %v33_v14 }
 0x120   :  { %101 = vrsqrt.f32 %v38_v15  ;;  %vm51_vm1 = vcmp.eq.f32.partialorder %v38_v15, inf  ;;  %v54_v20 = vand.u32 2147483648, %v38_v15  ;;  %vm53_vm2 = vcmp.eq.f32.partialorder %v38_v15, 0.0 }
 0x121   :  { %v36_v16 = vpop.xlane.xlu1 %35 }
 0x122   :  { %v39_v17 = vmul.f32 0.032258064, %v36_v16 }
 0x124   :  { %103 = vrsqrt.f32 %v39_v17  ;;  %vm58_vm3 = vcmp.eq.f32.partialorder %v39_v17, inf  ;;  %v61_v26 = vand.u32 2147483648, %v39_v17  ;;  %vm60_vm4 = vcmp.eq.f32.partialorder %v39_v17, 0.0 }
 0x12d   :  { %v102_v18 = vpop.eup %101 }
 0x12e   :  { %v50_v19 = vmul.f32 %v102_v18, %v38_v15 }
 0x130   :  { %v52_v21 = vsel %vm51_vm1, %v38_v15, %v50_v19 }
 0x131   :  { %v104_v22 = vpop.eup %103  ;;  %v55_v23 = vsel %vm53_vm2, %v54_v20, %v52_v21 }
 0x132   :  { %v63_v24 = vadd.f32 1e-06, %v55_v23  ;;  %v57_v25 = vmul.f32 %v104_v22, %v39_v17 }
 0x134   :  { %105 = vrcp.f32 %v63_v24  ;;  %v59_v27 = vsel %vm58_vm3, %v39_v17, %v57_v25 }
 0x135   :  { %v62_v28 = vsel %vm60_vm4, %v61_v26, %v59_v27 }
 0x136   :  { %v64_v29 = vadd.f32 1e-06, %v62_v28 }
 0x138   :  { %107 = vrcp.f32 %v64_v29 }
 0x141   :  { %v106_v32 = vpop.eup %105 }
 0x142   :  { %v66_v34 = vmul.f32 %v106_v32, %v47_v31 }
 0x144   :  { %v76_v36 = vadd.f32 %v97_v33, %v66_v34 }
 0x145   :  { %v108_v37 = vpop.eup %107 }
 0x146   :  { %v68_v38 = vmul.f32 %v108_v37, %v48_v35  ;;  %78 = vst.msk [vmem:[#allocation2] sm:$0xff] %vm17_vm0, %v76_v36 }
 0x148   :  { %v77_v39 = vadd.f32 %v97_v33, %v68_v38 }
 0x14a   :  { %79 = vst.msk [vmem:[#allocation2 + $0x8] sm:$0xff] %vm17_vm0, %v77_v39 }
 0x14b   :  { %120 = shalt.err (!%p117_p4)
}
 0x14c   :  { %s132_s2 = smov 128   ;;  %s133_s21 = smov 8  }
 0x14d   :  { %91 = dma.vmem_to_hbm [thread:$0]  %s86_s20, 256, %s178_s3, [#allocation3], %s132_s2, %s132_s2, %s133_s21  }
 0x14e   :  { %129 = dma.done.wait [#allocation3], 256  }
 0x14f   :  { %130 = vsyncadd [#allocation3], 4294967040 }
 0x150   :  { %95 = vsyncpa [#allocation3], 1 }

// kernel: duplex_decoder_conv_forward.9
= control target key start
LH: loop header
LB: loop body
LE: loop exit
PB: predicated region body
PF: predicated region fallthrough
CT: control target
= control target key end

     0   :  { %vm29_vm0 = vcmask 261120   ;;  %v309_v14 = vmov 0.0   ;;  %vm310_vm1 = vmmov 0   ;;  %vm200_vm6 = vcmask 523264   ;;  %s410_s0 = inlined_call_operand.vmem [shape: f32[16,32], index: 0, kind: input, shape index: {}]   ;;  %s411_s3 = inlined_call_operand.vmem [shape: bf16[32,64], index: 3, kind: input, shape index: {}]   ;;  %s412_s5 = inlined_call_operand.vmem [shape: bf16[64,32], index: 5, kind: input, shape index: {}]   ;;  %s413_s1 = inlined_call_operand.vmem [shape: f32[1,32], index: 1, kind: input, shape index: {}]   ;;  %s414_s2 = inlined_call_operand.vmem [shape: f32[1,32], index: 2, kind: input, shape index: {}]   ;;  %s415_s4 = inlined_call_operand.vmem [shape: f32[1,64], index: 4, kind: input, shape index: {}]   ;;  %s416_s6 = inlined_call_operand.vmem [shape: f32[1,32], index: 6, kind: input, shape index: {}]   ;;  %s417_s7 = inlined_call_operand.vmem [shape: f32[16,32], index: 7, kind: output, shape index: {}]  }
   0x1   :  { %v354_v0 = vld [vmem:[%s410_s0] sm:$0xff]  ;;  %v359_v1 = vld [vmem:[%s410_s0 + $0x8] sm:$0xff]  ;;  %273 = vmatprep.subr.bf16.mxu0 %v309_v14  ;;  %277 = vmatprep.mubr.msk.bf16.mxu0 %vm310_vm1, %v309_v14  ;;  %v297_v17 = vld [vmem:[%s412_s5 + $0x18] sm:$0xff]  }
   0x2   :  { %v30_v2 = vsel %vm29_vm0, %v354_v0, 0.0  ;;  %v33_v3 = vsel %vm29_vm0, %v359_v1, 0.0  ;;  %v295_v15 = vld [vmem:[%s411_s3 + $0x8] sm:$0xff]   ;;  %281 = vmatprep.subr.bf16.mxu1 %v309_v14  ;;  %289 = vmatprep.mubr.msk.bf16.mxu1 %vm310_vm1, %v309_v14  ;;  %v296_v16 = vld [vmem:[%s411_s3] sm:$0xff]   ;;  %v298_v45 = vld [vmem:[%s412_s5 + $0x10] sm:$0xff]  }
   0x3   :  { %31 = vadd.xlane.f32.xlu0 %v30_v2  ;;  %274 = vmatpush3.bf16.msra.mxu0 %v295_v15  ;;  %v253_v34 = vld [vmem:[%s413_s1] ss:$0 sm:$0xff]  ;;  %v299_v46 = vld [vmem:[%s412_s5 + $0x8] sm:$0xff]  }
   0x4   :  { %275 = vmatprep.subr.bf16.mxu0 %v309_v14  ;;  %282 = vmatpush3.bf16.msra.mxu1 %v297_v17  ;;  %v254_v40 = vld [vmem:[%s414_s2] ss:$0 sm:$0xff] }
   0x5   :  { %283 = vmatprep.subr.bf16.mxu1 %v309_v14  ;;  %v300_v47 = vld [vmem:[%s412_s5] sm:$0xff]  }
   0x6   :  { %v255_v48 = vld [vmem:[%s415_s4] ss:$0 sm:$0xff] }
   0x7   :  { %34 = vadd.xlane.f32.xlu0 %v33_v3  ;;  %276 = vmatpush3.bf16.msra.mxu0 %v296_v16  ;;  %v259_v58 = vld [vmem:[%s416_s6] ss:$0 sm:$0xff] }
   0x8   :  { %284 = vmatpush3.bf16.msra.mxu1 %v298_v45 }
   0x9   :  { %285 = vmatprep.subr.bf16.mxu1 %v309_v14 }
   0xc   :  { %286 = vmatpush3.bf16.msra.mxu1 %v299_v46 }
   0xd   :  { %287 = vmatprep.subr.bf16.mxu1 %v309_v14 }
  0x10   :  { %288 = vmatpush3.bf16.msra.mxu1 %v300_v47 }
  0x8c   :  { %v32_v4 = vpop.xlane.xlu0 %31 }
  0x8d   :  { %v37_v5 = vmul.f32 0.03125, %v32_v4 }
  0x8f   :  { %v39_v6 = vsub.f32 %v354_v0, %v37_v5 }
  0x90   :  { %v35_v7 = vpop.xlane.xlu0 %34 }
  0x91   :  { %v38_v8 = vmul.f32 0.03125, %v35_v7  ;;  %v41_v9 = vmul.f32 %v39_v6, %v39_v6  ;;  %v59_v36 = vmul.f32 %v253_v34, %v39_v6 }
  0x93   :  { %v40_v10 = vsub.f32 %v359_v1, %v38_v8  ;;  %v43_v11 = vsel %vm29_vm0, %v41_v9, 0.0 }
  0x94   :  { %44 = vadd.xlane.f32.xlu1 %v43_v11 }
  0x95   :  { %v42_v12 = vmul.f32 %v40_v10, %v40_v10  ;;  %v60_v37 = vmul.f32 %v253_v34, %v40_v10 }
  0x97   :  { %v46_v13 = vsel %vm29_vm0, %v42_v12, 0.0 }
  0x98   :  { %47 = vadd.xlane.f32.xlu1 %v46_v13 }
 0x11d   :  { %v45_v18 = vpop.xlane.xlu1 %44 }
 0x11e   :  { %v50_v19 = vmul.f32 0.032258064, %v45_v18 }
 0x120   :  { %301 = vrsqrt.f32 %v50_v19  ;;  %vm63_vm2 = vcmp.eq.f32.partialorder %v50_v19, inf  ;;  %v66_v24 = vand.u32 2147483648, %v50_v19  ;;  %vm65_vm3 = vcmp.eq.f32.partialorder %v50_v19, 0.0 }
 0x121   :  { %v48_v20 = vpop.xlane.xlu1 %47 }
 0x122   :  { %v51_v21 = vmul.f32 0.032258064, %v48_v20 }
 0x124   :  { %303 = vrsqrt.f32 %v51_v21  ;;  %vm70_vm4 = vcmp.eq.f32.partialorder %v51_v21, inf  ;;  %v73_v30 = vand.u32 2147483648, %v51_v21  ;;  %vm72_vm5 = vcmp.eq.f32.partialorder %v51_v21, 0.0 }
 0x12d   :  { %v302_v22 = vpop.eup %301 }
 0x12e   :  { %v62_v23 = vmul.f32 %v302_v22, %v50_v19 }
 0x130   :  { %v64_v25 = vsel %vm63_vm2, %v50_v19, %v62_v23 }
 0x131   :  { %v304_v26 = vpop.eup %303  ;;  %v67_v27 = vsel %vm65_vm3, %v66_v24, %v64_v25 }
 0x132   :  { %v75_v28 = vadd.f32 1e-06, %v67_v27  ;;  %v69_v29 = vmul.f32 %v304_v26, %v51_v21 }
 0x134   :  { %305 = vrcp.f32 %v75_v28  ;;  %v71_v31 = vsel %vm70_vm4, %v51_v21, %v69_v29 }
 0x135   :  { %v74_v32 = vsel %vm72_vm5, %v73_v30, %v71_v31 }
 0x136   :  { %v76_v33 = vadd.f32 1e-06, %v74_v32 }
 0x138   :  { %307 = vrcp.f32 %v76_v33 }
 0x141   :  { %v306_v35 = vpop.eup %305 }
 0x142   :  { %v78_v38 = vmul.f32 %v306_v35, %v59_v36 }
 0x144   :  { %v88_v42 = vadd.f32 %v254_v40, %v78_v38 }
 0x145   :  { %v308_v39 = vpop.eup %307 }
 0x146   :  { %v80_v41 = vmul.f32 %v308_v39, %v60_v37 }
 0x148   :  { %v89_v43 = vadd.f32 %v254_v40, %v80_v41 }
 0x14a   :  { %v90_v44 = vpack.c.bf16 %v89_v43, %v88_v42 }
 0x14c   :  { %278 = vmatmul.mubr.msk.bf16.vlgmr.msra.gmra.mxu0 %vm29_vm0, %v90_v44 }
 0x20c   :  { %v151_v49 = vpop.f32.mrf.mxu0 }
 0x20d   :  { %v152_v51 = vadd.f32 %v255_v48, %v151_v49 }
 0x20e   :  { %v279_v50 = vpop.f32.mrf.mxu0 }
 0x20f   :  { %v158_v55 = vmax.f32 %v152_v51, 0.0 }
 0x210   :  { %v154_v52 = vpop.f32.mrf.mxu0 }
 0x211   :  { %v155_v53 = vadd.f32 %v255_v48, %v154_v52 }
 0x212   :  { %v280_v54 = vpop.f32.mrf.mxu0 }
 0x213   :  { %v159_v56 = vmax.f32 %v155_v53, 0.0 }
 0x215   :  { %v160_v57 = vpack.c.bf16 %v159_v56, %v158_v55 }
 0x217   :  { %290 = vmatmul.mubr.msk.bf16.vlgmr.msra.gmra.mxu1 %vm200_vm6, %v160_v57 }
 0x2d7   :  { %v238_v59 = vpop.f32.mrf.mxu1 }
 0x2d8   :  { %v239_v60 = vadd.f32 %v259_v58, %v238_v59 }
 0x2d9   :  { %v291_v61 = vpop.f32.mrf.mxu1 }
 0x2da   :  { %v245_v62 = vadd.f32 %v239_v60, %v354_v0 }
 0x2db   :  { %v241_v63 = vpop.f32.mrf.mxu1 }
 0x2dc   :  { %247 = vst.msk [vmem:[%s417_s7] sm:$0xff] %vm29_vm0, %v245_v62  ;;  %v242_v2 = vadd.f32 %v259_v58, %v241_v63 }
 0x2dd   :  { %v292_v3 = vpop.f32.mrf.mxu1 }
 0x2de   :  { %v246_v4 = vadd.f32 %v242_v2, %v359_v1 }
 0x2e0   :  { %248 = vst.msk [vmem:[%s417_s7 + $0x8] sm:$0xff] %vm29_vm0, %v246_v4 }

// kernel: duplex_decoder_conv_forward.8
= control target key start
LH: loop header
LB: loop body
LE: loop exit
PB: predicated region body
PF: predicated region fallthrough
CT: control target
= control target key end

     0   :  { %s2500_s25 = smov 0   ;;  %s2832_s0 = inlined_call_operand.vmem [shape: f32[2,8,32], index: 0, kind: input, shape index: {}]   ;;  %s2833_s1 = inlined_call_operand.vmem [shape: f32[2,8,32], index: 1, kind: input, shape index: {}]   ;;  %s2834_s2 = inlined_call_operand.vmem [shape: f32[2,1,8], index: 2, kind: input, shape index: {}]   ;;  %s2835_s3 = inlined_call_operand.vmem [shape: f32[1,32], index: 3, kind: input, shape index: {}]   ;;  %s2836_s4 = inlined_call_operand.vmem [shape: f32[1,32], index: 4, kind: input, shape index: {}]   ;;  %s2837_s5 = inlined_call_operand.vmem [shape: bf16[4,32,8], index: 5, kind: input, shape index: {}]   ;;  %s2838_s6 = inlined_call_operand.vmem [shape: bf16[4,32,8], index: 6, kind: input, shape index: {}]   ;;  %s2839_s7 = inlined_call_operand.vmem [shape: bf16[4,32,8], index: 7, kind: input, shape index: {}]   ;;  %s2840_s8 = inlined_call_operand.vmem [shape: f32[4,1,8], index: 8, kind: input, shape index: {}]   ;;  %s2841_s9 = inlined_call_operand.vmem [shape: f32[4,1,8], index: 9, kind: input, shape index: {}]   ;;  %s2842_s10 = inlined_call_operand.vmem [shape: f32[4,1,8], index: 10, kind: input, shape index: {}]   ;;  %s2843_s11 = inlined_call_operand.vmem [shape: bf16[4,8,32], index: 11, kind: input, shape index: {}]   ;;  %s2844_s12 = inlined_call_operand.vmem [shape: f32[1,32], index: 12, kind: input, shape index: {}]   ;;  %s2845_s13 = inlined_call_operand.vmem [shape: f32[2,8,32], index: 13, kind: output, shape index: {}]  }
   0x1 LB: > { %s2015_s26 = sadd.s32 4294967295, %s2425_s25   ;;  %p2019_p0 = scmp.ge.s32.totalorder %s2425_s25, 1  ;;  %s2425_s25 = sphi %s2500_s25, %s23_s25  }
   0x2   : > { %p403_p1 = scmp.lt.s32.totalorder %s2425_s25, 3 }
   0x4   : > { %p404_p2 = pnand %p2019_p0, %p403_p1 }
   0x5   : > { %p452_p3 = scmp.lt.s32.totalorder (!%p404_p2), %s2015_s26, 1 }
   0x6   : > { %407 = sbr.rel (%p404_p2) target bundleno = 3994 (0xf9a), region = 72 }
   0xb   : > { %s2847_s26 = smov (!%p452_p3, %s2015_s26), 1  ;;  %vm469_vm0 = vcmask 261120   ;;  %v2375_v7 = vld [vmem:[%s2838_s6 + $0x8] sm:$0xff]   ;;  %v2427_v8 = vmov 0.0   ;;  %v2376_v11 = vld [vmem:[%s2838_s6] sm:$0xff]   ;;  %vm2428_vm1 = vmmov 0   ;;  %v713_v49 = vlaneseq }
   0xc   : > { %s2511_s27 = sshll.u32 %s2847_s26, 3  ;;  %2204 = vmatprep.subr.bf16.mxu1 %v2427_v8  ;;  %2196 = vmatprep.subr.bf16.mxu0 %v2427_v8  ;;  %v2377_v9 = vld [vmem:[%s2837_s5 + $0x8] sm:$0xff]   ;;  %v2378_v12 = vld [vmem:[%s2837_s5] sm:$0xff]   ;;  %vm718_vm4 = vcmask 64512   ;;  %v2379_v43 = vld [vmem:[%s2837_s5 + $0x18] sm:$0xff]   ;;  %s462_s15 = scalar_lea.vmem %s2834_s2, %s2847_s26  ;;  %vm781_vm6 = vcmask 1043456  }
   0xd   : > { %s455_s30 = scalar_lea.vmem %s2832_s0, %s2511_s27  ;;  %s459_s16 = scalar_lea.vmem %s2833_s1, %s2511_s27  ;;  %2205 = vmatpush3.bf16.msra.mxu1 %v2375_v7  ;;  %2208 = vmatprep.mubr.msk.bf16.mxu1 %vm2428_vm1, %v2427_v8  ;;  %v2023_v22 = vld [vmem:[%s2835_s3] ss:$0 sm:$0xff]  ;;  %v2380_v46 = vld [vmem:[%s2837_s5 + $0x10] sm:$0xff]   ;;  %v2381_v47 = vld [vmem:[%s2839_s7 + $0x8] sm:$0xff]   ;;  %v714_v51 = vshrl.u32 %v713_v49, 7 }
   0xe   : > { %v2517_v0 = vld [vmem:[%s455_s30] sm:$0xff]  ;;  %2206 = vmatprep.subr.bf16.mxu1 %v2427_v8  ;;  %2197 = vmatpush3.bf16.msra.mxu0 %v2377_v9  ;;  %v2429_v53 = vmov -1e+09   ;;  %s466_s19 = scalar_lea.vmem %s2845_s13, %s2511_s27 }
   0xf   : > { %v470_v1 = vsel %vm469_vm0, %v2517_v0, 0.0  ;;  %v508_v10 = vld [vmem:[%s459_s16] sm:$0xff]  ;;  %2198 = vmatprep.subr.bf16.mxu0 %v2427_v8  ;;  %2200 = vmatprep.mubr.msk.bf16.mxu0 %vm2428_vm1, %v2427_v8  ;;  %v715_v52 = vsub.s32 0, %v714_v51 }
  0x10   : > { %471 = vadd.xlane.f32.xlu0 %v470_v1  ;;  %v2547_v13 = vpack.c.bf16 %v508_v10, %v508_v10  ;;  %v2024_v25 = vld [vmem:[%s2836_s4] ss:$0 sm:$0xff]  ;;  %v2062_v49 = vld [vmem:[%s2842_s10 + $0x1] ss:$0 sm:$0xff] }
  0x11   : > { %2207 = vmatpush3.bf16.msra.mxu1 %v2376_v11  ;;  %v2029_v29 = vld [vmem:[%s2841_s9] ss:$0 sm:$0xff] }
  0x12   : > { %2199 = vmatpush3.bf16.msra.mxu0 %v2378_v12  ;;  %2220 = vmatprep.subr.bf16.mxu1 %v2427_v8  ;;  %v2025_v37 = vld [vmem:[%s2840_s8] ss:$0 sm:$0xff] }
  0x13   : > { %2212 = vmatprep.subr.bf16.mxu0 %v2427_v8  ;;  %v2382_v48 = vld [vmem:[%s2839_s7] sm:$0xff]  }
  0x14   : > { %2209 = vmatmul.mubr.msk.bf16.vlgmr.msra.gmra.mxu1 %vm469_vm0, %v2547_v13  ;;  %v509_v50 = vld [vmem:[%s462_s15] sm:$0x1] }
  0x15   : > { %2222 = vmatprep.mubr.msk.bf16.mxu1 %vm2428_vm1, %v2427_v8  ;;  %vm510_vm5 = vcmp.gt.f32.partialorder %v509_v50, 0.0  ;;  %v2033_v9 = vld [vmem:[%s2842_s10] ss:$0 sm:$0xff] }
  0x16   : > { %v511_v54 = vsel %vm510_vm5, 0.0, %v2429_v53 }
  0x17   : > { %v2606_v55 = vrot.slane %v511_v54, %v715_v52 }
  0x99   : > { %v472_v2 = vpop.xlane.xlu0 %471 }
  0x9a   : > { %v474_v3 = vmul.f32 0.03125, %v472_v2 }
  0x9c   : > { %v475_v4 = vsub.f32 %v2517_v0, %v474_v3 }
  0x9e   : > { %v476_v5 = vmul.f32 %v475_v4, %v475_v4  ;;  %v489_v23 = vmul.f32 %v2023_v22, %v475_v4 }
  0xa0   : > { %v477_v6 = vsel %vm469_vm0, %v476_v5, 0.0 }
  0xa1   : > { %478 = vadd.xlane.f32.xlu0 %v477_v6 }
  0xd4   : > { %v641_v30 = vpop.f32.mrf.mxu1 }
  0xd5   : > { %v642_v31 = vadd.f32 %v2029_v29, %v641_v30  ;;  %v2053_v29 = vld [vmem:[%s2841_s9 + $0x1] ss:$0 sm:$0xff] }
  0xd6   : > { %v2210_v32 = vpop.f32.mrf.mxu1  ;;  %v2044_v30 = vld [vmem:[%s2840_s8 + $0x1] ss:$0 sm:$0xff] }
  0xd7   : > { %v711_v33 = vpack.c.bf16 %v642_v31, %v642_v31 }
  0xd8   : > { %v644_v34 = vpop.f32.mrf.mxu1 }
  0xd9   : > { %v723_v35 = vsel %vm718_vm4, %v711_v33, 0 }
  0xda   : > { %v2211_v36 = vpop.f32.mrf.mxu1  ;;  %2221 = vmatpush3.bf16.xpose.msra.mxu1 %v723_v35 }
  0xdb   : > { %2232 = vmatprep.subr.bf16.mxu1 %v2427_v8 }
 0x12a   : > { %v479_v14 = vpop.xlane.xlu0 %478 }
 0x12b   : > { %v481_v15 = vmul.f32 0.032258064, %v479_v14 }
 0x12d   : > { %2399 = vrsqrt.f32 %v481_v15  ;;  %vm492_vm2 = vcmp.eq.f32.partialorder %v481_v15, inf  ;;  %v495_v18 = vand.u32 2147483648, %v481_v15  ;;  %vm494_vm3 = vcmp.eq.f32.partialorder %v481_v15, 0.0 }
 0x13a   : > { %v2400_v16 = vpop.eup %2399 }
 0x13b   : > { %v491_v17 = vmul.f32 %v2400_v16, %v481_v15 }
 0x13d   : > { %v493_v19 = vsel %vm492_vm2, %v481_v15, %v491_v17 }
 0x13e   : > { %v496_v20 = vsel %vm494_vm3, %v495_v18, %v493_v19 }
 0x13f   : > { %v497_v21 = vadd.f32 1e-06, %v496_v20 }
 0x141   : > { %2401 = vrcp.f32 %v497_v21  ;;  %v2383_v21 = vld [vmem:[%s2838_s6 + $0x18] sm:$0xff]  }
 0x14e   : > { %v2402_v24 = vpop.eup %2401 }
 0x14f   : > { %v499_v26 = vmul.f32 %v2402_v24, %v489_v23  ;;  %v2384_v23 = vld [vmem:[%s2838_s6 + $0x10] sm:$0xff]  }
 0x151   : > { %v507_v27 = vadd.f32 %v2024_v25, %v499_v26 }
 0x153   : > { %v2561_v28 = vpack.c.bf16 %v507_v27, %v507_v27 }
 0x155   : > { %2201 = vmatmul.mubr.msk.bf16.vlgmr.msra.gmra.mxu0 %vm469_vm0, %v2561_v28 }
 0x156   : > { %2216 = vmatprep.mubr.msk.bf16.mxu0 %vm2428_vm1, %v2427_v8  ;;  %2213 = vmatpush3.bf16.msra.mxu0 %v2381_v47 }
 0x157   : > { %2214 = vmatprep.subr.bf16.mxu0 %v2427_v8 }
 0x15a   : > { %2215 = vmatpush3.bf16.msra.mxu0 %v2382_v48 }
 0x15b   : > { %2226 = vmatprep.subr.bf16.mxu0 %v2427_v8 }
 0x15d   : > { %2217 = vmatmul.mubr.msk.bf16.vlgmr.msra.gmra.mxu0 %vm469_vm0, %v2547_v13 }
 0x15e   : > { %2228 = vmatprep.mubr.msk.bf16.mxu0 %vm2428_vm1, %v2427_v8 }
 0x215   : > { %v574_v38 = vpop.f32.mrf.mxu0 }
 0x216   : > { %v575_v39 = vadd.f32 %v2025_v37, %v574_v38 }
 0x217   : > { %v2202_v40 = vpop.f32.mrf.mxu0 }
 0x218   : > { %v580_v41 = vmul.f32 0.35355338, %v575_v39 }
 0x219   : > { %v577_v42 = vpop.f32.mrf.mxu0 }
 0x21a   : > { %v710_v44 = vpack.c.bf16 %v580_v41, %v580_v41  ;;  %v2385_v41 = vld [vmem:[%s2839_s7 + $0x18] sm:$0xff]   ;;  %v2386_v42 = vld [vmem:[%s2839_s7 + $0x10] sm:$0xff]  }
 0x21b   : > { %v2203_v45 = vpop.f32.mrf.mxu0 }
 0x21c   : > { %2223 = vmatmul.mubr.msk.bf16.vlgmr.msra.gmra.mxu1 %vm718_vm4, %v710_v44 }
 0x21d   : > { %2233 = vmatpush3.bf16.msra.mxu1 %v2379_v43  ;;  %2236 = vmatprep.mubr.msk.bf16.mxu1 %vm2428_vm1, %v2427_v8  ;;  %v704_v10 = vpop.f32.mrf.mxu0 }
 0x21e   : > { %2234 = vmatprep.subr.bf16.mxu1 %v2427_v8  ;;  %v705_v11 = vadd.f32 %v2033_v9, %v704_v10  ;;  %v2387_v9 = vld [vmem:[%s2838_s6 + $0x28] sm:$0xff]  }
 0x21f   : > { %v2218_v12 = vpop.f32.mrf.mxu0 }
 0x220   : > { %v777_v14 = vpack.c.bf16 %v705_v11, %v705_v11  ;;  %v2388_v11 = vld [vmem:[%s2838_s6 + $0x20] sm:$0xff]  }
 0x221   : > { %2235 = vmatpush3.bf16.msra.mxu1 %v2380_v46  ;;  %v707_v15 = vpop.f32.mrf.mxu0 }
 0x222   : > { %2248 = vmatprep.subr.bf16.mxu1 %v2427_v8  ;;  %v783_v16 = vsel %vm781_vm6, %v777_v14, 0  ;;  %v2389_v14 = vld [vmem:[%s2837_s5 + $0x28] sm:$0xff]  }
 0x223   : > { %v2219_v17 = vpop.f32.mrf.mxu0  ;;  %2227 = vmatpush3.bf16.msra.mxu0 %v783_v16 }
 0x224   : > { %2237 = vmatmul.mubr.msk.bf16.vlgmr.msra.gmra.mxu1 %vm469_vm0, %v2561_v28  ;;  %2240 = vmatprep.subr.bf16.mxu0 %v2427_v8 }
 0x225   : > { %2252 = vmatprep.mubr.msk.bf16.mxu1 %vm2428_vm1, %v2427_v8  ;;  %2249 = vmatpush3.bf16.msra.mxu1 %v2385_v41 }
 0x226   : > { %2250 = vmatprep.subr.bf16.mxu1 %v2427_v8 }
 0x229   : > { %2251 = vmatpush3.bf16.msra.mxu1 %v2386_v42 }
 0x22a   : > { %2262 = vmatprep.subr.bf16.mxu1 %v2427_v8 }
 0x22c   : > { %2253 = vmatmul.mubr.msk.bf16.vlgmr.msra.gmra.mxu1 %vm469_vm0, %v2547_v13 }
 0x22d   : > { %2264 = vmatprep.mubr.msk.bf16.mxu1 %vm2428_vm1, %v2427_v8 }
 0x2dc   : > { %v759_v56 = vpop.f32.mrf.mxu1 }
 0x2dd   : > { %v760_v57 = vadd.f32 %v759_v56, %v2606_v55 }
 0x2de   : > { %v2224_v58 = vpop.f32.mrf.mxu1 }
 0x2df   : > { %v765_v59 = vsel %vm718_vm4, %v760_v57, -inf }
 0x2e0   : > { %766 = vmax.xlane.f32.xlu1 %v765_v59  ;;  %v762_v60 = vpop.f32.mrf.mxu1 }
 0x2e2   : > { %v2225_v61 = vpop.f32.mrf.mxu1 }
 0x2e4   : > { %v886_v62 = vpop.f32.mrf.mxu1 }
 0x2e5   : > { %v887_v34 = vadd.f32 %v2044_v30, %v886_v62 }
 0x2e6   : > { %v2238_v63 = vpop.f32.mrf.mxu1 }
 0x2e7   : > { %v892_v39 = vmul.f32 0.35355338, %v887_v34  ;;  %v2068_v63 = vld [vmem:[%s2843_s11 + $0x4] sm:$0xf] }
 0x2e8   : > { %v889_v1 = vpop.f32.mrf.mxu1 }
 0x2e9   : > { %v1023_v40 = vpack.c.bf16 %v892_v39, %v892_v39  ;;  %v1137_v1 = vsel %vm781_vm6, %v2068_v63, 0 }
 0x2ea   : > { %v2239_v2 = vpop.f32.mrf.mxu1 }
 0x2ec   : > { %v1017_v50 = vpop.f32.mrf.mxu1 }
 0x2ed   : > { %v1018_v51 = vadd.f32 %v2062_v49, %v1017_v50 }
 0x2ee   : > { %v2254_v52 = vpop.f32.mrf.mxu1 }
 0x2ef   : > { %v1083_v53 = vpack.c.bf16 %v1018_v51, %v1018_v51 }
 0x2f0   : > { %v1020_v54 = vpop.f32.mrf.mxu1 }
 0x2f1   : > { %v1088_v56 = vsel %vm781_vm6, %v1083_v53, 0 }
 0x2f2   : > { %2263 = vmatpush3.bf16.msra.mxu1 %v1088_v56 }
 0x2f3   : > { %2274 = vmatprep.subr.bf16.mxu1 %v2427_v8 }
 0x369   : > { %v767_v3 = vpop.xlane.xlu1 %766 }
 0x36a   : > { %v768_v4 = vsub.f32 %v760_v57, %v767_v3  ;;  %v2255_v57 = vpop.f32.mrf.mxu1 }
 0x36c   : > { %v769_v5 = vmul.f32 1.442695, %v768_v4  ;;  %v826_v4 = vld [vmem:[%s2843_s11] sm:$0xf] }
 0x36e   : > { %2403 = vpow2.f32 %v769_v5 }
 0x37b   : > { %v2404_v6 = vpop.eup %2403 }
 0x37c   : > { %v771_v7 = vsel %vm718_vm4, %v2404_v6, 0.0 }
 0x37d   : > { %772 = vadd.xlane.f32.xlu1 %v771_v7  ;;  %v1183_v7 = vsel %vm781_vm6, %v826_v4, 0  ;;  %v2100_v4 = vld [vmem:[%s2843_s11 + $0x8] sm:$0xf] }
 0x406   : > { %v773_v18 = vpop.xlane.xlu1 %772 }
 0x407   : > { %2405 = vrcp.f32 %v773_v18  ;;  %v2390_v18 = vld [vmem:[%s2837_s5 + $0x20] sm:$0xff]  }
 0x414   : > { %v2406_v19 = vpop.eup %2405 }
 0x415   : > { %v775_v20 = vmul.f32 %v2406_v19, %v2404_v6 }
 0x417   : > { %v776_v22 = vpack.c.bf16 %v775_v20, %v775_v20 }
 0x419   : > { %2229 = vmatmul.mubr.msk.bf16.vlgmr.msra.gmra.mxu0 %vm718_vm4, %v776_v22 }
 0x41a   : > { %2241 = vmatpush3.bf16.msra.mxu0 %v2383_v21  ;;  %2244 = vmatprep.mubr.msk.bf16.mxu0 %vm2428_vm1, %v2427_v8 }
 0x41b   : > { %2242 = vmatprep.subr.bf16.mxu0 %v2427_v8 }
 0x41e   : > { %2243 = vmatpush3.bf16.msra.mxu0 %v2384_v23 }
 0x41f   : > { %2256 = vmatprep.subr.bf16.mxu0 %v2427_v8 }
 0x421   : > { %2245 = vmatmul.mubr.msk.bf16.vlgmr.msra.gmra.mxu0 %vm469_vm0, %v2547_v13 }
 0x422   : > { %2258 = vmatprep.mubr.msk.bf16.mxu0 %vm2428_vm1, %v2427_v8 }
 0x4d9   : > { %v2631_v24 = vpop.f32.mrf.mxu0 }
 0x4da   : > { %v825_v10 = vpack.c.bf16 %v2631_v24, %v2631_v24  ;;  %v2085_v24 = vld [vmem:[%s2841_s9 + $0x2] ss:$0 sm:$0xff] }
 0x4db   : > { %v2230_v25 = vpop.f32.mrf.mxu0 }
 0x4dd   : > { %v822_v26 = vpop.f32.mrf.mxu0 }
 0x4df   : > { %v2231_v27 = vpop.f32.mrf.mxu0 }
 0x4e1   : > { %v952_v31 = vpop.f32.mrf.mxu0 }
 0x4e2   : > { %v953_v32 = vadd.f32 %v2053_v29, %v952_v31 }
 0x4e3   : > { %v2246_v33 = vpop.f32.mrf.mxu0 }
 0x4e4   : > { %v1024_v35 = vpack.c.bf16 %v953_v32, %v953_v32 }
 0x4e5   : > { %v955_v36 = vpop.f32.mrf.mxu0 }
 0x4e6   : > { %v1029_v37 = vsel %vm718_vm4, %v1024_v35, 0 }
 0x4e7   : > { %v2247_v38 = vpop.f32.mrf.mxu0  ;;  %2257 = vmatpush3.bf16.xpose.msra.mxu0 %v1029_v37  ;;  %v2076_v37 = vld [vmem:[%s2840_s8 + $0x2] ss:$0 sm:$0xff] }
 0x4e8   : > { %2268 = vmatprep.subr.bf16.mxu0 %v2427_v8 }
 0x4ee   : > { %2259 = vmatmul.mubr.msk.bf16.vlgmr.msra.gmra.mxu0 %vm718_vm4, %v1023_v40 }
 0x4ef   : > { %2270 = vmatprep.mubr.msk.bf16.mxu0 %vm2428_vm1, %v2427_v8  ;;  %2269 = vmatpush3.bf16.msra.mxu0 %v1137_v1 }
 0x4f0   : > { %2280 = vmatprep.subr.bf16.mxu0 %v2427_v8 }
 0x5ae   : > { %v1065_v43 = vpop.f32.mrf.mxu0 }
 0x5af   : > { %v1066_v44 = vadd.f32 %v1065_v43, %v2606_v55 }
 0x5b0   : > { %v2260_v45 = vpop.f32.mrf.mxu0 }
 0x5b1   : > { %v1071_v46 = vsel %vm718_vm4, %v1066_v44, -inf  ;;  %v2391_v45 = vld [vmem:[%s2839_s7 + $0x28] sm:$0xff]  }
 0x5b2   : > { %1072 = vmax.xlane.f32.xlu0 %v1071_v46  ;;  %v1068_v47 = vpop.f32.mrf.mxu0  ;;  %v2392_v46 = vld [vmem:[%s2839_s7 + $0x20] sm:$0xff]  }
 0x5b4   : > { %v2261_v48 = vpop.f32.mrf.mxu0 }
 0x63b   : > { %v1073_v58 = vpop.xlane.xlu0 %1072 }
 0x63c   : > { %v1074_v59 = vsub.f32 %v1066_v44, %v1073_v58 }
 0x63e   : > { %v1075_v60 = vmul.f32 1.442695, %v1074_v59  ;;  %v2094_v59 = vld [vmem:[%s2842_s10 + $0x2] ss:$0 sm:$0xff] }
 0x640   : > { %2407 = vpow2.f32 %v1075_v60 }
 0x64d   : > { %v2408_v61 = vpop.eup %2407 }
 0x64e   : > { %v1077_v62 = vsel %vm718_vm4, %v2408_v61, 0.0 }
 0x64f   : > { %1078 = vadd.xlane.f32.xlu1 %v1077_v62 }
 0x6d8   : > { %v1079_v2 = vpop.xlane.xlu1 %1078 }
 0x6d9   : > { %2409 = vrcp.f32 %v1079_v2 }
 0x6e6   : > { %v2410_v3 = vpop.eup %2409 }
 0x6e7   : > { %v1081_v5 = vmul.f32 %v2410_v3, %v2408_v61 }
 0x6e9   : > { %v1082_v6 = vpack.c.bf16 %v1081_v5, %v1081_v5  ;;  %v1535_v5 = vsel %vm781_vm6, %v2100_v4, 0 }
 0x6eb   : > { %2265 = vmatmul.mubr.msk.bf16.vlgmr.msra.gmra.mxu1 %vm718_vm4, %v1082_v6 }
 0x6ec   : > { %2275 = vmatpush3.bf16.msra.mxu1 %v1183_v7  ;;  %2276 = vmatprep.mubr.msk.bf16.mxu1 %vm2428_vm1, %v2427_v8 }
 0x6ed   : > { %2288 = vmatprep.subr.bf16.mxu1 %v2427_v8 }
 0x6f3   : > { %2277 = vmatmul.mubr.msk.bf16.vlgmr.msra.gmra.mxu1 %vm718_vm4, %v825_v10  ;;  %v2393_v10 = vld [vmem:[%s2837_s5 + $0x38] sm:$0xff]  }
 0x6f4   : > { %2289 = vmatpush3.bf16.msra.mxu1 %v2387_v9  ;;  %2292 = vmatprep.mubr.msk.bf16.mxu1 %vm2428_vm1, %v2427_v8 }
 0x6f5   : > { %2290 = vmatprep.subr.bf16.mxu1 %v2427_v8 }
 0x6f8   : > { %2291 = vmatpush3.bf16.msra.mxu1 %v2388_v11 }
 0x6f9   : > { %2304 = vmatprep.subr.bf16.mxu1 %v2427_v8 }
 0x6fb   : > { %2293 = vmatmul.mubr.msk.bf16.vlgmr.msra.gmra.mxu1 %vm469_vm0, %v2547_v13 }
 0x6fc   : > { %2306 = vmatprep.mubr.msk.bf16.mxu1 %vm2428_vm1, %v2427_v8 }
 0x7ab   : > { %v1124_v12 = vpop.f32.mrf.mxu1 }
 0x7ac   : > { %v1130_v15 = vpack.c.bf16 %v1124_v12, %v1124_v12  ;;  %v2394_v12 = vld [vmem:[%s2837_s5 + $0x30] sm:$0xff]  }
 0x7ad   : > { %v2266_v16 = vpop.f32.mrf.mxu1 }
 0x7ae   : > { %2271 = vmatmul.mubr.msk.bf16.vlgmr.msra.gmra.mxu0 %vm718_vm4, %v1130_v15  ;;  %v2395_v15 = vld [vmem:[%s2838_s6 + $0x38] sm:$0xff]  }
 0x7af   : > { %v1127_v17 = vpop.f32.mrf.mxu1  ;;  %2281 = vmatpush3.bf16.msra.mxu0 %v2389_v14  ;;  %2284 = vmatprep.mubr.msk.bf16.mxu0 %vm2428_vm1, %v2427_v8 }
 0x7b0   : > { %2282 = vmatprep.subr.bf16.mxu0 %v2427_v8 }
 0x7b1   : > { %v2267_v19 = vpop.f32.mrf.mxu1 }
 0x7b2   : > { %v2396_v19 = vld [vmem:[%s2838_s6 + $0x30] sm:$0xff]  }
 0x7b3   : > { %v2704_v20 = vpop.f32.mrf.mxu1  ;;  %2283 = vmatpush3.bf16.msra.mxu0 %v2390_v18 }
 0x7b4   : > { %2296 = vmatprep.subr.bf16.mxu0 %v2427_v8 }
 0x7b5   : > { %v2278_v21 = vpop.f32.mrf.mxu1 }
 0x7b6   : > { %2285 = vmatmul.mubr.msk.bf16.vlgmr.msra.gmra.mxu0 %vm469_vm0, %v2561_v28 }
 0x7b7   : > { %v1222_v22 = vpop.f32.mrf.mxu1  ;;  %2300 = vmatprep.mubr.msk.bf16.mxu0 %vm2428_vm1, %v2427_v8  ;;  %2297 = vmatpush3.bf16.msra.mxu0 %v2391_v45 }
 0x7b8   : > { %2298 = vmatprep.subr.bf16.mxu0 %v2427_v8 }
 0x7b9   : > { %v2279_v23 = vpop.f32.mrf.mxu1 }
 0x7bb   : > { %v1350_v25 = vpop.f32.mrf.mxu1  ;;  %2299 = vmatpush3.bf16.msra.mxu0 %v2392_v46 }
 0x7bc   : > { %v1351_v26 = vadd.f32 %v2085_v24, %v1350_v25  ;;  %2310 = vmatprep.subr.bf16.mxu0 %v2427_v8 }
 0x7bd   : > { %v2294_v27 = vpop.f32.mrf.mxu1 }
 0x7be   : > { %v1422_v29 = vpack.c.bf16 %v1351_v26, %v1351_v26  ;;  %2301 = vmatmul.mubr.msk.bf16.vlgmr.msra.gmra.mxu0 %vm469_vm0, %v2547_v13 }
 0x7bf   : > { %v1353_v30 = vpop.f32.mrf.mxu1  ;;  %2312 = vmatprep.mubr.msk.bf16.mxu0 %vm2428_vm1, %v2427_v8 }
 0x7c0   : > { %v1427_v31 = vsel %vm718_vm4, %v1422_v29, 0 }
 0x7c1   : > { %v2295_v32 = vpop.f32.mrf.mxu1  ;;  %2305 = vmatpush3.bf16.xpose.msra.mxu1 %v1427_v31 }
 0x7c2   : > { %2316 = vmatprep.subr.bf16.mxu1 %v2427_v8  ;;  %v2116_v32 = vld [vmem:[%s2841_s9 + $0x3] ss:$0 sm:$0xff] }
 0x86e   : > { %v2716_v33 = vpop.f32.mrf.mxu0 }
 0x86f   : > { %v1220_v25 = vadd.f32 %v2704_v20, %v2716_v33 }
 0x870   : > { %v2272_v34 = vpop.f32.mrf.mxu0 }
 0x871   : > { %v2107_v34 = vld [vmem:[%s2840_s8 + $0x3] ss:$0 sm:$0xff] }
 0x872   : > { %v1176_v35 = vpop.f32.mrf.mxu0 }
 0x874   : > { %v2273_v36 = vpop.f32.mrf.mxu0 }
 0x876   : > { %v1284_v38 = vpop.f32.mrf.mxu0 }
 0x877   : > { %v1285_v39 = vadd.f32 %v2076_v37, %v1284_v38 }
 0x878   : > { %v2286_v40 = vpop.f32.mrf.mxu0 }
 0x879   : > { %v1290_v41 = vmul.f32 0.35355338, %v1285_v39 }
 0x87a   : > { %v1287_v42 = vpop.f32.mrf.mxu0 }
 0x87b   : > { %v1421_v43 = vpack.c.bf16 %v1290_v41, %v1290_v41 }
 0x87c   : > { %v2287_v44 = vpop.f32.mrf.mxu0 }
 0x87d   : > { %2307 = vmatmul.mubr.msk.bf16.vlgmr.msra.gmra.mxu1 %vm718_vm4, %v1421_v43  ;;  %v2397_v43 = vld [vmem:[%s2839_s7 + $0x38] sm:$0xff]   ;;  %v2398_v44 = vld [vmem:[%s2839_s7 + $0x30] sm:$0xff]  }
 0x87e   : > { %2318 = vmatprep.mubr.msk.bf16.mxu1 %vm2428_vm1, %v2427_v8  ;;  %v1415_v60 = vpop.f32.mrf.mxu0  ;;  %2317 = vmatpush3.bf16.msra.mxu1 %v1535_v5 }
 0x87f   : > { %v1416_v61 = vadd.f32 %v2094_v59, %v1415_v60  ;;  %2330 = vmatprep.subr.bf16.mxu1 %v2427_v8 }
 0x880   : > { %v2302_v62 = vpop.f32.mrf.mxu0 }
 0x881   : > { %v1481_v63 = vpack.c.bf16 %v1416_v61, %v1416_v61  ;;  %v2131_v62 = vld [vmem:[%s2843_s11 + $0xc] sm:$0xf] }
 0x882   : > { %v1418_v1 = vpop.f32.mrf.mxu0 }
 0x883   : > { %v1486_v2 = vsel %vm781_vm6, %v1481_v63, 0  ;;  %v1888_v63 = vsel %vm781_vm6, %v2131_v62, 0 }
 0x884   : > { %v2303_v3 = vpop.f32.mrf.mxu0  ;;  %2311 = vmatpush3.bf16.msra.mxu0 %v1486_v2 }
 0x885   : > { %2322 = vmatprep.subr.bf16.mxu0 %v2427_v8 }
 0x93d   : > { %v1463_v47 = vpop.f32.mrf.mxu1 }
 0x93e   : > { %v1464_v48 = vadd.f32 %v1463_v47, %v2606_v55 }
 0x93f   : > { %v2308_v49 = vpop.f32.mrf.mxu1 }
 0x940   : > { %v1469_v50 = vsel %vm718_vm4, %v1464_v48, -inf }
 0x941   : > { %1470 = vmax.xlane.f32.xlu0 %v1469_v50  ;;  %v1466_v51 = vpop.f32.mrf.mxu1 }
 0x943   : > { %v2309_v52 = vpop.f32.mrf.mxu1 }
 0x9ca   : > { %v1471_v53 = vpop.xlane.xlu0 %1470 }
 0x9cb   : > { %v1472_v54 = vsub.f32 %v1464_v48, %v1471_v53 }
 0x9cd   : > { %v1473_v56 = vmul.f32 1.442695, %v1472_v54 }
 0x9cf   : > { %2411 = vpow2.f32 %v1473_v56 }
 0x9dc   : > { %v2412_v57 = vpop.eup %2411 }
 0x9dd   : > { %v1475_v58 = vsel %vm718_vm4, %v2412_v57, 0.0 }
 0x9de   : > { %1476 = vadd.xlane.f32.xlu1 %v1475_v58 }
 0xa67   : > { %v1477_v6 = vpop.xlane.xlu1 %1476 }
 0xa68   : > { %2413 = vrcp.f32 %v1477_v6 }
 0xa75   : > { %v2414_v7 = vpop.eup %2413 }
 0xa76   : > { %v1479_v9 = vmul.f32 %v2414_v7, %v2412_v57 }
 0xa78   : > { %v1480_v11 = vpack.c.bf16 %v1479_v9, %v1479_v9 }
 0xa7a   : > { %2313 = vmatmul.mubr.msk.bf16.vlgmr.msra.gmra.mxu0 %vm718_vm4, %v1480_v11 }
 0xa7b   : > { %2323 = vmatpush3.bf16.msra.mxu0 %v2393_v10  ;;  %2326 = vmatprep.mubr.msk.bf16.mxu0 %vm2428_vm1, %v2427_v8 }
 0xa7c   : > { %2324 = vmatprep.subr.bf16.mxu0 %v2427_v8 }
 0xa7f   : > { %2325 = vmatpush3.bf16.msra.mxu0 %v2394_v12  ;;  %v2133_v12 = vld [vmem:[%s2844_s12] ss:$0 sm:$0xff] }
 0xa80   : > { %2338 = vmatprep.subr.bf16.mxu0 %v2427_v8 }
 0xa82   : > { %2327 = vmatmul.mubr.msk.bf16.vlgmr.msra.gmra.mxu0 %vm469_vm0, %v2561_v28 }
 0xa83   : > { %2342 = vmatprep.mubr.msk.bf16.mxu0 %vm2428_vm1, %v2427_v8  ;;  %2339 = vmatpush3.bf16.msra.mxu0 %v2397_v43 }
 0xa84   : > { %2340 = vmatprep.subr.bf16.mxu0 %v2427_v8 }
 0xa87   : > { %2341 = vmatpush3.bf16.msra.mxu0 %v2398_v44 }
 0xa88   : > { %2352 = vmatprep.subr.bf16.mxu0 %v2427_v8 }
 0xa8a   : > { %2343 = vmatmul.mubr.msk.bf16.vlgmr.msra.gmra.mxu0 %vm469_vm0, %v2547_v13 }
 0xa8b   : > { %2354 = vmatprep.mubr.msk.bf16.mxu0 %vm2428_vm1, %v2427_v8 }
 0xb3a   : > { %v1522_v14 = vpop.f32.mrf.mxu0 }
 0xb3b   : > { %v1528_v16 = vpack.c.bf16 %v1522_v14, %v1522_v14 }
 0xb3c   : > { %v2314_v17 = vpop.f32.mrf.mxu0 }
 0xb3d   : > { %2319 = vmatmul.mubr.msk.bf16.vlgmr.msra.gmra.mxu1 %vm718_vm4, %v1528_v16 }
 0xb3e   : > { %v1525_v18 = vpop.f32.mrf.mxu0  ;;  %2331 = vmatpush3.bf16.msra.mxu1 %v2395_v15  ;;  %2334 = vmatprep.mubr.msk.bf16.mxu1 %vm2428_vm1, %v2427_v8 }
 0xb3f   : > { %2332 = vmatprep.subr.bf16.mxu1 %v2427_v8 }
 0xb40   : > { %v2315_v28 = vpop.f32.mrf.mxu0 }
 0xb42   : > { %v1637_v21 = vpop.f32.mrf.mxu0  ;;  %2333 = vmatpush3.bf16.msra.mxu1 %v2396_v19 }
 0xb43   : > { %2346 = vmatprep.subr.bf16.mxu1 %v2427_v8  ;;  %v1638_v38 = vadd.f32 %v2107_v34, %v1637_v21 }
 0xb44   : > { %v2328_v22 = vpop.f32.mrf.mxu0 }
 0xb45   : > { %2335 = vmatmul.mubr.msk.bf16.vlgmr.msra.gmra.mxu1 %vm469_vm0, %v2547_v13  ;;  %v1643_v41 = vmul.f32 0.35355338, %v1638_v38 }
 0xb46   : > { %v1640_v23 = vpop.f32.mrf.mxu0  ;;  %2348 = vmatprep.mubr.msk.bf16.mxu1 %vm2428_vm1, %v2427_v8 }
 0xb47   : > { %v1774_v42 = vpack.c.bf16 %v1643_v41, %v1643_v41 }
 0xb48   : > { %v2329_v24 = vpop.f32.mrf.mxu0 }
 0xb4a   : > { %v1768_v13 = vpop.f32.mrf.mxu0 }
 0xb4c   : > { %v2344_v57 = vpop.f32.mrf.mxu0 }
 0xb4e   : > { %v1771_v59 = vpop.f32.mrf.mxu0 }
 0xb50   : > { %v2345_v61 = vpop.f32.mrf.mxu0 }
 0xbfd   : > { %v1571_v26 = vpop.f32.mrf.mxu1 }
 0xbfe   : > { %v2781_v27 = vadd.f32 %v1571_v26, %v1220_v25 }
 0xbff   : > { %v2320_v29 = vpop.f32.mrf.mxu1 }
 0xc01   : > { %v1574_v30 = vpop.f32.mrf.mxu1 }
 0xc03   : > { %v2321_v31 = vpop.f32.mrf.mxu1 }
 0xc05   : > { %v1703_v35 = vpop.f32.mrf.mxu1 }
 0xc06   : > { %v1704_v36 = vadd.f32 %v2116_v32, %v1703_v35 }
 0xc07   : > { %v2336_v37 = vpop.f32.mrf.mxu1 }
 0xc08   : > { %v1775_v39 = vpack.c.bf16 %v1704_v36, %v1704_v36 }
 0xc09   : > { %v1706_v20 = vpop.f32.mrf.mxu1 }
 0xc0a   : > { %v1780_v33 = vsel %vm718_vm4, %v1775_v39, 0 }
 0xc0b   : > { %v2337_v40 = vpop.f32.mrf.mxu1  ;;  %2347 = vmatpush3.bf16.xpose.msra.mxu1 %v1780_v33 }
 0xc0c   : > { %2358 = vmatprep.subr.bf16.mxu1 %v2427_v8 }
 0xc12   : > { %2349 = vmatmul.mubr.msk.bf16.vlgmr.msra.gmra.mxu1 %vm718_vm4, %v1774_v42 }
 0xc13   : > { %2360 = vmatprep.mubr.msk.bf16.mxu1 %vm2428_vm1, %v2427_v8  ;;  %v2125_v8 = vld [vmem:[%s2842_s10 + $0x3] ss:$0 sm:$0xff]  ;;  %2359 = vmatpush3.bf16.msra.mxu1 %v1888_v63 }
 0xcd2   : > { %v1816_v45 = vpop.f32.mrf.mxu1 }
 0xcd3   : > { %v1817_v46 = vadd.f32 %v1816_v45, %v2606_v55  ;;  %v1769_v55 = vadd.f32 %v2125_v8, %v1768_v13 }
 0xcd4   : > { %v2350_v47 = vpop.f32.mrf.mxu1 }
 0xcd5   : > { %v1822_v48 = vsel %vm718_vm4, %v1817_v46, -inf  ;;  %v1834_v58 = vpack.c.bf16 %v1769_v55, %v1769_v55 }
 0xcd6   : > { %1823 = vmax.xlane.f32.xlu0 %v1822_v48  ;;  %v1819_v49 = vpop.f32.mrf.mxu1 }
 0xcd7   : > { %v1839_v60 = vsel %vm781_vm6, %v1834_v58, 0 }
 0xcd8   : > { %v2351_v50 = vpop.f32.mrf.mxu1  ;;  %2353 = vmatpush3.bf16.msra.mxu0 %v1839_v60 }
 0xd5f   : > { %v1824_v51 = vpop.xlane.xlu0 %1823 }
 0xd60   : > { %v1825_v52 = vsub.f32 %v1817_v46, %v1824_v51 }
 0xd62   : > { %v1826_v53 = vmul.f32 1.442695, %v1825_v52 }
 0xd64   : > { %2415 = vpow2.f32 %v1826_v53 }
 0xd71   : > { %v2416_v54 = vpop.eup %2415 }
 0xd72   : > { %v1828_v56 = vsel %vm718_vm4, %v2416_v54, 0.0 }
 0xd73   : > { %1829 = vadd.xlane.f32.xlu1 %v1828_v56 }
 0xdfc   : > { %v1830_v1 = vpop.xlane.xlu1 %1829 }
 0xdfd   : > { %2417 = vrcp.f32 %v1830_v1 }
 0xe0a   : > { %v2418_v2 = vpop.eup %2417 }
 0xe0b   : > { %v1832_v3 = vmul.f32 %v2418_v2, %v2416_v54 }
 0xe0d   : > { %v1833_v4 = vpack.c.bf16 %v1832_v3, %v1832_v3 }
 0xe0f   : > { %2355 = vmatmul.mubr.msk.bf16.vlgmr.msra.gmra.mxu0 %vm718_vm4, %v1833_v4 }
 0xecf   : > { %v1875_v5 = vpop.f32.mrf.mxu0 }
 0xed0   : > { %v1881_v6 = vpack.c.bf16 %v1875_v5, %v1875_v5 }
 0xed1   : > { %v2356_v7 = vpop.f32.mrf.mxu0 }
 0xed2   : > { %2361 = vmatmul.mubr.msk.bf16.vlgmr.msra.gmra.mxu1 %vm718_vm4, %v1881_v6 }
 0xed3   : > { %v1878_v9 = vpop.f32.mrf.mxu0 }
 0xed5   : > { %v2357_v10 = vpop.f32.mrf.mxu0 }
 0xf92   : > { %v1924_v11 = vpop.f32.mrf.mxu1 }
 0xf93   : > { %v1930_v14 = vadd.f32 %v1924_v11, %v2781_v27 }
 0xf94   : > { %v2362_v15 = vpop.f32.mrf.mxu1 }
 0xf95   : > { %v1938_v16 = vadd.f32 %v2133_v12, %v1930_v14 }
 0xf96   : > { %v1927_v17 = vpop.f32.mrf.mxu1 }
 0xf97   : > { %v1939_v18 = vadd.f32 %v1938_v16, %v2517_v0 }
 0xf98   : > { %v2363_v19 = vpop.f32.mrf.mxu1 }
 0xf99   : > { %1940 = vst.msk [vmem:[%s466_s19] sm:$0xff] %vm469_vm0, %v1939_v18 }
 0xf9a PF: > { %s23_s25 = sadd.s32 1, %s2425_s25  }
 0xf9b   : > { %p20_p4 = scmp.ge.s32.totalorder %s23_s25, 4  }
 0xf9d   :  { %22 = sbr.rel (!%p20_p4) target bundleno = 1 (0x1), region = 129 }

// kernel: duplex_decoder_conv_forward.7
= control target key start
LH: loop header
LB: loop body
LE: loop exit
PB: predicated region body
PF: predicated region fallthrough
CT: control target
= control target key end

     0   :  { %s2730_s0 = inlined_call_operand.vmem [shape: s32[2], index: 0, kind: input, shape index: {}]   ;;  %s2731_s1 = inlined_call_operand.vmem [shape: f32[2,8,32], index: 1, kind: input, shape index: {}]   ;;  %s2732_s2 = inlined_call_operand.vmem [shape: f32[1,32], index: 2, kind: input, shape index: {}]   ;;  %s2733_s3 = inlined_call_operand.vmem [shape: f32[1,32], index: 3, kind: input, shape index: {}]   ;;  %s2734_s4 = inlined_call_operand.vmem [shape: bf16[4,32,8], index: 4, kind: input, shape index: {}]   ;;  %s2735_s5 = inlined_call_operand.vmem [shape: bf16[4,32,8], index: 5, kind: input, shape index: {}]   ;;  %s2736_s6 = inlined_call_operand.vmem [shape: bf16[4,32,8], index: 6, kind: input, shape index: {}]   ;;  %s2737_s7 = inlined_call_operand.vmem [shape: f32[4,1,8], index: 7, kind: input, shape index: {}]   ;;  %s2738_s8 = inlined_call_operand.vmem [shape: f32[4,1,8], index: 8, kind: input, shape index: {}]   ;;  %s2739_s9 = inlined_call_operand.vmem [shape: f32[4,1,8], index: 9, kind: input, shape index: {}]   ;;  %s2740_s10 = inlined_call_operand.vmem [shape: bf16[4,8,32], index: 10, kind: input, shape index: {}]   ;;  %s2741_s11 = inlined_call_operand.vmem [shape: f32[1,32], index: 11, kind: input, shape index: {}]   ;;  %s2742_s12 = inlined_call_operand.vmem [shape: f32[2,8,32], index: 12, kind: output, shape index: {}]  }
   0x1   :  { %s17_s23 = sshll.u32 %s2730_s0, 4  ;;  %s18_s23 = int_to_ptr.vmem [resolvable:$true] %s17_s23 }
   0x2   :  { %s2316_s24 = scalar_lea.vmem %s18_s23, 16  ;;  %p2321_p1 = scmp.lt.s32.totalorder %s18_s23, %s18_s23 }
   0x3   :  { %p2317_p0 = scmp.ne.s32.totalorder %s18_s23, %s2316_s24  ;;  %p2322_p2 = scmp.lt.s32.totalorder %s2316_s24, %s2316_s24 }
   0x5   :  { %p2323_p3 = por %p2322_p2, %p2321_p1 }
   0x7   :  { %p2324_p4 = pnand %p2323_p3, %p2317_p0 }
   0x9   :  { %2327 = shalt.err (!%p2324_p4)  }
   0xa   :  { %s2338_s25 = smov [#allocation3]  }
   0xb   :  { %20 = dma.vmem_to_smem %s18_s23, 16, %s2338_s25, [#allocation2] }
   0xc   :  { %2332 = dma.done.wait [#allocation2], 16 }
   0xd   :  { %2333 = vsyncadd [#allocation2], 4294967280 }
   0xe   :  { %22 = sfence }
   0xf   :  { %s2410_s26 = smov 0  }
  0x10 LB: > { %s2416_s0 = sadd.s32 4294967295, %s2336_s26   ;;  %p1916_p5 = scmp.ge.s32.totalorder %s2336_s26, 1  ;;  %s2336_s26 = sphi %s2410_s26, %s28_s26  }
  0x11   : > { %p343_p6 = scmp.lt.s32.totalorder %s2336_s26, 3 }
  0x13   : > { %p344_p7 = pnand %p1916_p5, %p343_p6 }
  0x14   : > { %p381_p8 = scmp.lt.s32.totalorder (!%p344_p7), %s2416_s0, 1  ;;  %s430_s14 = sld [smem:[#allocation3 + %s2416_s0]] (!%p344_p7) }
  0x15   : > { %347 = sbr.rel (%p344_p7) target bundleno = 4016 (0xfb0), region = 64 }
  0x1a   : > { %s2422_s27 = scalar_select %p381_p8, %s2416_s0, 1  ;;  %vm391_vm0 = vcmask 261120   ;;  %v2272_v7 = vld [vmem:[%s2734_s4 + $0x8] sm:$0xff]   ;;  %v2339_v9 = vmov 0.0   ;;  %v2274_v10 = vld [vmem:[%s2734_s4] sm:$0xff]   ;;  %vm2340_vm1 = vmmov 0   ;;  %v431_v57 = vlaneseq }
  0x1b   : > { %v2273_v8 = vld [vmem:[%s2735_s5 + $0x8] sm:$0xff]   ;;  %2092 = vmatprep.subr.bf16.mxu0 %v2339_v9  ;;  %2100 = vmatprep.subr.bf16.mxu1 %v2339_v9  ;;  %v2275_v11 = vld [vmem:[%s2735_s5] sm:$0xff]   ;;  %vm636_vm4 = vcmask 64512   ;;  %vm699_vm5 = vcmask 1043456   ;;  %v2278_v48 = vld [vmem:[%s2734_s4 + $0x18] sm:$0xff]   ;;  %v436_v60 = vstv %s430_s14 }
  0x1c   : > { %s1917_s28 = sshll.u32 %s2422_s27, 3  ;;  %2093 = vmatpush3.bf16.msra.mxu0 %v2272_v7  ;;  %2101 = vmatpush3.bf16.msra.mxu1 %v2273_v8  ;;  %v1919_v20 = vld [vmem:[%s2732_s2] ss:$0 sm:$0xff]  ;;  %v2276_v26 = vld [vmem:[%s2736_s6 + $0x8] sm:$0xff]   ;;  %v2279_v54 = vld [vmem:[%s2734_s4 + $0x10] sm:$0xff]   ;;  %v432_v58 = vshrl.u32 %v431_v57, 7 }
  0x1d   : > { %s384_s13 = scalar_lea.vmem %s2731_s1, %s1917_s28  ;;  %2094 = vmatprep.subr.bf16.mxu0 %v2339_v9  ;;  %2102 = vmatprep.subr.bf16.mxu1 %v2339_v9  ;;  %v1920_v23 = vld [vmem:[%s2733_s3] ss:$0 sm:$0xff]  ;;  %v2280_v55 = vld [vmem:[%s2736_s6 + $0x18] sm:$0xff]   ;;  %v2281_v56 = vld [vmem:[%s2736_s6 + $0x10] sm:$0xff]   ;;  %v434_v59 = vand.u32 127, %v431_v57  ;;  %s388_s24 = scalar_lea.vmem %s2742_s12, %s1917_s28 }
  0x1e   : > { %v2430_v0 = vld [vmem:[%s384_s13] sm:$0xff]  ;;  %2096 = vmatprep.mubr.msk.bf16.mxu0 %vm2340_vm1, %v2339_v9  ;;  %2104 = vmatprep.mubr.msk.bf16.mxu1 %vm2340_vm1, %v2339_v9  ;;  %vm437_vm7 = vcmp.lt.s32.totalorder %v432_v58, %v436_v60  ;;  %v2341_v61 = vmov -1e+09  }
  0x1f   : > { %v392_v1 = vsel %vm391_vm0, %v2430_v0, 0.0  ;;  %v2277_v28 = vld [vmem:[%s2736_s6] sm:$0xff]   ;;  %vm435_vm6 = vcmp.le.s32.totalorder %v434_v59, %v432_v58 }
  0x20   : > { %393 = vadd.xlane.f32.xlu0 %v392_v1  ;;  %2095 = vmatpush3.bf16.msra.mxu0 %v2274_v10  ;;  %v1925_v29 = vld [vmem:[%s2738_s8] ss:$0 sm:$0xff]  ;;  %vm438_vm8 = vmand %vm435_vm6, %vm437_vm7  ;;  %v1964_v58 = vld [vmem:[%s2740_s10 + $0x4] sm:$0xf] }
  0x21   : > { %2103 = vmatpush3.bf16.msra.mxu1 %v2275_v11  ;;  %2108 = vmatprep.subr.bf16.mxu0 %v2339_v9  ;;  %v1921_v30 = vld [vmem:[%s2737_s7] ss:$0 sm:$0xff]  ;;  %v2527_v62 = vsel %vm438_vm8, 0.0, %v2341_v61  ;;  %v1958_v11 = vld [vmem:[%s2739_s9 + $0x1] ss:$0 sm:$0xff]  ;;  %v1055_v59 = vsel %vm699_vm5, %v1964_v58, 0 }
  0x22   : > { %2116 = vmatprep.subr.bf16.mxu1 %v2339_v9  ;;  %v1929_v43 = vld [vmem:[%s2739_s9] ss:$0 sm:$0xff] }
  0xa9   : > { %v394_v2 = vpop.xlane.xlu0 %393 }
  0xaa   : > { %v396_v3 = vmul.f32 0.03125, %v394_v2 }
  0xac   : > { %v397_v4 = vsub.f32 %v2430_v0, %v396_v3 }
  0xae   : > { %v398_v5 = vmul.f32 %v397_v4, %v397_v4  ;;  %v411_v21 = vmul.f32 %v1919_v20, %v397_v4 }
  0xb0   : > { %v399_v6 = vsel %vm391_vm0, %v398_v5, 0.0 }
  0xb1   : > { %400 = vadd.xlane.f32.xlu0 %v399_v6 }
 0x13a   : > { %v401_v12 = vpop.xlane.xlu0 %400 }
 0x13b   : > { %v403_v13 = vmul.f32 0.032258064, %v401_v12 }
 0x13d   : > { %2296 = vrsqrt.f32 %v403_v13  ;;  %vm414_vm2 = vcmp.eq.f32.partialorder %v403_v13, inf  ;;  %v417_v16 = vand.u32 2147483648, %v403_v13  ;;  %vm416_vm3 = vcmp.eq.f32.partialorder %v403_v13, 0.0 }
 0x14a   : > { %v2297_v14 = vpop.eup %2296 }
 0x14b   : > { %v413_v15 = vmul.f32 %v2297_v14, %v403_v13 }
 0x14d   : > { %v415_v17 = vsel %vm414_vm2, %v403_v13, %v413_v15 }
 0x14e   : > { %v418_v18 = vsel %vm416_vm3, %v417_v16, %v415_v17 }
 0x14f   : > { %v419_v19 = vadd.f32 1e-06, %v418_v18 }
 0x151   : > { %2298 = vrcp.f32 %v419_v19 }
 0x15e   : > { %v2299_v22 = vpop.eup %2298 }
 0x15f   : > { %v421_v24 = vmul.f32 %v2299_v22, %v411_v21 }
 0x161   : > { %v429_v25 = vadd.f32 %v1920_v23, %v421_v24 }
 0x163   : > { %v2467_v27 = vpack.c.bf16 %v429_v25, %v429_v25 }
 0x165   : > { %2097 = vmatmul.mubr.msk.bf16.vlgmr.msra.gmra.mxu0 %vm391_vm0, %v2467_v27  ;;  %2105 = vmatmul.mubr.msk.bf16.vlgmr.msra.gmra.mxu1 %vm391_vm0, %v2467_v27 }
 0x166   : > { %2109 = vmatpush3.bf16.msra.mxu0 %v2276_v26  ;;  %2112 = vmatprep.mubr.msk.bf16.mxu0 %vm2340_vm1, %v2339_v9 }
 0x167   : > { %2110 = vmatprep.subr.bf16.mxu0 %v2339_v9  ;;  %2118 = vmatprep.mubr.msk.bf16.mxu1 %vm2340_vm1, %v2339_v9 }
 0x16a   : > { %2111 = vmatpush3.bf16.msra.mxu0 %v2277_v28  ;;  %v2282_v28 = vld [vmem:[%s2735_s5 + $0x18] sm:$0xff]  }
 0x16b   : > { %2122 = vmatprep.subr.bf16.mxu0 %v2339_v9 }
 0x16d   : > { %2113 = vmatmul.mubr.msk.bf16.vlgmr.msra.gmra.mxu0 %vm391_vm0, %v2467_v27 }
 0x16e   : > { %2124 = vmatprep.mubr.msk.bf16.mxu0 %vm2340_vm1, %v2339_v9 }
 0x225   : > { %v501_v31 = vpop.f32.mrf.mxu0  ;;  %v565_v32 = vpop.f32.mrf.mxu1 }
 0x226   : > { %v566_v33 = vadd.f32 %v1925_v29, %v565_v32  ;;  %v502_v36 = vadd.f32 %v1921_v30, %v501_v31  ;;  %v2283_v30 = vld [vmem:[%s2735_s5 + $0x10] sm:$0xff]  }
 0x227   : > { %v2098_v34 = vpop.f32.mrf.mxu0  ;;  %v2106_v35 = vpop.f32.mrf.mxu1 }
 0x228   : > { %v635_v37 = vpack.c.bf16 %v566_v33, %v566_v33  ;;  %v507_v44 = vmul.f32 0.35355338, %v502_v36  ;;  %v1949_v35 = vld [vmem:[%s2738_s8 + $0x1] ss:$0 sm:$0xff] }
 0x229   : > { %v504_v38 = vpop.f32.mrf.mxu0  ;;  %v568_v39 = vpop.f32.mrf.mxu1  ;;  %v1940_v36 = vld [vmem:[%s2737_s7 + $0x1] ss:$0 sm:$0xff] }
 0x22a   : > { %v641_v40 = vsel %vm636_vm4, %v635_v37, 0  ;;  %v634_v49 = vpack.c.bf16 %v507_v44, %v507_v44 }
 0x22b   : > { %v2099_v41 = vpop.f32.mrf.mxu0  ;;  %v2107_v42 = vpop.f32.mrf.mxu1  ;;  %2117 = vmatpush3.bf16.xpose.msra.mxu1 %v641_v40 }
 0x22c   : > { %2128 = vmatprep.subr.bf16.mxu1 %v2339_v9 }
 0x22d   : > { %v628_v45 = vpop.f32.mrf.mxu0 }
 0x22e   : > { %v629_v46 = vadd.f32 %v1929_v43, %v628_v45 }
 0x22f   : > { %v2114_v47 = vpop.f32.mrf.mxu0 }
 0x230   : > { %v695_v50 = vpack.c.bf16 %v629_v46, %v629_v46 }
 0x231   : > { %v631_v51 = vpop.f32.mrf.mxu0 }
 0x232   : > { %v701_v52 = vsel %vm699_vm5, %v695_v50, 0  ;;  %2119 = vmatmul.mubr.msk.bf16.vlgmr.msra.gmra.mxu1 %vm636_vm4, %v634_v49 }
 0x233   : > { %v2115_v53 = vpop.f32.mrf.mxu0  ;;  %2123 = vmatpush3.bf16.msra.mxu0 %v701_v52  ;;  %2129 = vmatpush3.bf16.msra.mxu1 %v2278_v48 }
 0x234   : > { %2130 = vmatprep.subr.bf16.mxu1 %v2339_v9  ;;  %2132 = vmatprep.mubr.msk.bf16.mxu1 %vm2340_vm1, %v2339_v9 }
 0x235   : > { %2136 = vmatprep.subr.bf16.mxu0 %v2339_v9 }
 0x237   : > { %2131 = vmatpush3.bf16.msra.mxu1 %v2279_v54 }
 0x238   : > { %2144 = vmatprep.subr.bf16.mxu1 %v2339_v9 }
 0x23a   : > { %2133 = vmatmul.mubr.msk.bf16.vlgmr.msra.gmra.mxu1 %vm391_vm0, %v2467_v27 }
 0x23b   : > { %2145 = vmatpush3.bf16.msra.mxu1 %v2280_v55  ;;  %2148 = vmatprep.mubr.msk.bf16.mxu1 %vm2340_vm1, %v2339_v9 }
 0x23c   : > { %2146 = vmatprep.subr.bf16.mxu1 %v2339_v9 }
 0x23f   : > { %2147 = vmatpush3.bf16.msra.mxu1 %v2281_v56 }
 0x240   : > { %2158 = vmatprep.subr.bf16.mxu1 %v2339_v9 }
 0x242   : > { %2149 = vmatmul.mubr.msk.bf16.vlgmr.msra.gmra.mxu1 %vm391_vm0, %v2467_v27 }
 0x243   : > { %2160 = vmatprep.mubr.msk.bf16.mxu1 %vm2340_vm1, %v2339_v9 }
 0x2f2   : > { %v677_v63 = vpop.f32.mrf.mxu1 }
 0x2f3   : > { %v678_v1 = vadd.f32 %v677_v63, %v2527_v62  ;;  %v744_v63 = vld [vmem:[%s2740_s10] sm:$0xf] }
 0x2f4   : > { %v2120_v2 = vpop.f32.mrf.mxu1 }
 0x2f5   : > { %v683_v3 = vsel %vm636_vm4, %v678_v1, -inf }
 0x2f6   : > { %684 = vmax.xlane.f32.xlu1 %v683_v3  ;;  %v680_v4 = vpop.f32.mrf.mxu1  ;;  %v1101_v3 = vsel %vm699_vm5, %v744_v63, 0 }
 0x2f7   : > { %v2284_v4 = vld [vmem:[%s2735_s5 + $0x28] sm:$0xff]  }
 0x2f8   : > { %v2121_v5 = vpop.f32.mrf.mxu1 }
 0x2fa   : > { %v804_v6 = vpop.f32.mrf.mxu1 }
 0x2fb   : > { %v805_v40 = vadd.f32 %v1940_v36, %v804_v6  ;;  %v2285_v6 = vld [vmem:[%s2735_s5 + $0x20] sm:$0xff]  }
 0x2fc   : > { %v2134_v7 = vpop.f32.mrf.mxu1 }
 0x2fd   : > { %v810_v45 = vmul.f32 0.35355338, %v805_v40 }
 0x2fe   : > { %v807_v8 = vpop.f32.mrf.mxu1 }
 0x2ff   : > { %v941_v46 = vpack.c.bf16 %v810_v45, %v810_v45  ;;  %v2286_v8 = vld [vmem:[%s2734_s4 + $0x28] sm:$0xff]  }
 0x300   : > { %v2135_v10 = vpop.f32.mrf.mxu1 }
 0x302   : > { %v935_v12 = vpop.f32.mrf.mxu1 }
 0x303   : > { %v936_v13 = vadd.f32 %v1958_v11, %v935_v12 }
 0x304   : > { %v2150_v14 = vpop.f32.mrf.mxu1 }
 0x305   : > { %v1001_v15 = vpack.c.bf16 %v936_v13, %v936_v13  ;;  %v2287_v13 = vld [vmem:[%s2734_s4 + $0x20] sm:$0xff]  }
 0x306   : > { %v938_v16 = vpop.f32.mrf.mxu1 }
 0x307   : > { %v1006_v17 = vsel %vm699_vm5, %v1001_v15, 0  ;;  %v2288_v16 = vld [vmem:[%s2736_s6 + $0x28] sm:$0xff]  }
 0x308   : > { %v2151_v18 = vpop.f32.mrf.mxu1  ;;  %2159 = vmatpush3.bf16.msra.mxu1 %v1006_v17 }
 0x309   : > { %2170 = vmatprep.subr.bf16.mxu1 %v2339_v9 }
 0x37f   : > { %v685_v19 = vpop.xlane.xlu1 %684 }
 0x380   : > { %v686_v20 = vsub.f32 %v678_v1, %v685_v19  ;;  %v2289_v19 = vld [vmem:[%s2736_s6 + $0x20] sm:$0xff]  }
 0x382   : > { %v687_v21 = vmul.f32 1.442695, %v686_v20 }
 0x384   : > { %2300 = vpow2.f32 %v687_v21  ;;  %v1981_v21 = vld [vmem:[%s2738_s8 + $0x2] ss:$0 sm:$0xff] }
 0x391   : > { %v2301_v22 = vpop.eup %2300 }
 0x392   : > { %v689_v23 = vsel %vm636_vm4, %v2301_v22, 0.0 }
 0x393   : > { %690 = vadd.xlane.f32.xlu1 %v689_v23 }
 0x41c   : > { %v691_v24 = vpop.xlane.xlu1 %690 }
 0x41d   : > { %2302 = vrcp.f32 %v691_v24 }
 0x42a   : > { %v2303_v25 = vpop.eup %2302 }
 0x42b   : > { %v693_v26 = vmul.f32 %v2303_v25, %v2301_v22 }
 0x42d   : > { %v694_v29 = vpack.c.bf16 %v693_v26, %v693_v26 }
 0x42f   : > { %2125 = vmatmul.mubr.msk.bf16.vlgmr.msra.gmra.mxu0 %vm636_vm4, %v694_v29 }
 0x430   : > { %2137 = vmatpush3.bf16.msra.mxu0 %v2282_v28  ;;  %2140 = vmatprep.mubr.msk.bf16.mxu0 %vm2340_vm1, %v2339_v9 }
 0x431   : > { %2138 = vmatprep.subr.bf16.mxu0 %v2339_v9 }
 0x434   : > { %2139 = vmatpush3.bf16.msra.mxu0 %v2283_v30 }
 0x435   : > { %2152 = vmatprep.subr.bf16.mxu0 %v2339_v9 }
 0x437   : > { %2141 = vmatmul.mubr.msk.bf16.vlgmr.msra.gmra.mxu0 %vm391_vm0, %v2467_v27 }
 0x438   : > { %2154 = vmatprep.mubr.msk.bf16.mxu0 %vm2340_vm1, %v2339_v9 }
 0x4ef   : > { %v737_v31 = vpop.f32.mrf.mxu0 }
 0x4f0   : > { %v743_v5 = vpack.c.bf16 %v737_v31, %v737_v31 }
 0x4f1   : > { %v2126_v32 = vpop.f32.mrf.mxu0 }
 0x4f3   : > { %v740_v33 = vpop.f32.mrf.mxu0 }
 0x4f5   : > { %v2127_v34 = vpop.f32.mrf.mxu0 }
 0x4f6   : > { %v1972_v34 = vld [vmem:[%s2737_s7 + $0x2] ss:$0 sm:$0xff] }
 0x4f7   : > { %v870_v37 = vpop.f32.mrf.mxu0 }
 0x4f8   : > { %v871_v38 = vadd.f32 %v1949_v35, %v870_v37 }
 0x4f9   : > { %v2142_v39 = vpop.f32.mrf.mxu0 }
 0x4fa   : > { %v942_v41 = vpack.c.bf16 %v871_v38, %v871_v38 }
 0x4fb   : > { %v873_v42 = vpop.f32.mrf.mxu0 }
 0x4fc   : > { %v947_v43 = vsel %vm636_vm4, %v942_v41, 0  ;;  %v1990_v42 = vld [vmem:[%s2739_s9 + $0x2] ss:$0 sm:$0xff] }
 0x4fd   : > { %v2143_v44 = vpop.f32.mrf.mxu0  ;;  %2153 = vmatpush3.bf16.xpose.msra.mxu0 %v947_v43 }
 0x4fe   : > { %2164 = vmatprep.subr.bf16.mxu0 %v2339_v9 }
 0x504   : > { %2155 = vmatmul.mubr.msk.bf16.vlgmr.msra.gmra.mxu0 %vm636_vm4, %v941_v46 }
 0x505   : > { %2166 = vmatprep.mubr.msk.bf16.mxu0 %vm2340_vm1, %v2339_v9  ;;  %2165 = vmatpush3.bf16.msra.mxu0 %v1055_v59 }
 0x506   : > { %2176 = vmatprep.subr.bf16.mxu0 %v2339_v9 }
 0x5c4   : > { %v983_v47 = vpop.f32.mrf.mxu0 }
 0x5c5   : > { %v984_v48 = vadd.f32 %v983_v47, %v2527_v62 }
 0x5c6   : > { %v2156_v49 = vpop.f32.mrf.mxu0 }
 0x5c7   : > { %v989_v50 = vsel %vm636_vm4, %v984_v48, -inf }
 0x5c8   : > { %990 = vmax.xlane.f32.xlu0 %v989_v50  ;;  %v986_v51 = vpop.f32.mrf.mxu0 }
 0x5ca   : > { %v2157_v52 = vpop.f32.mrf.mxu0 }
 0x651   : > { %v991_v53 = vpop.xlane.xlu0 %990 }
 0x652   : > { %v992_v54 = vsub.f32 %v984_v48, %v991_v53 }
 0x654   : > { %v993_v55 = vmul.f32 1.442695, %v992_v54 }
 0x656   : > { %2304 = vpow2.f32 %v993_v55 }
 0x663   : > { %v2305_v56 = vpop.eup %2304 }
 0x664   : > { %v995_v57 = vsel %vm636_vm4, %v2305_v56, 0.0 }
 0x665   : > { %996 = vadd.xlane.f32.xlu1 %v995_v57 }
 0x6ee   : > { %v997_v60 = vpop.xlane.xlu1 %996 }
 0x6ef   : > { %2306 = vrcp.f32 %v997_v60 }
 0x6fc   : > { %v2307_v61 = vpop.eup %2306 }
 0x6fd   : > { %v999_v1 = vmul.f32 %v2307_v61, %v2305_v56  ;;  %v1996_v61 = vld [vmem:[%s2740_s10 + $0x8] sm:$0xf] }
 0x6fe   : > { %v1453_v63 = vsel %vm699_vm5, %v1996_v61, 0 }
 0x6ff   : > { %v1000_v2 = vpack.c.bf16 %v999_v1, %v999_v1 }
 0x701   : > { %2161 = vmatmul.mubr.msk.bf16.vlgmr.msra.gmra.mxu1 %vm636_vm4, %v1000_v2 }
 0x702   : > { %2171 = vmatpush3.bf16.msra.mxu1 %v1101_v3  ;;  %2172 = vmatprep.mubr.msk.bf16.mxu1 %vm2340_vm1, %v2339_v9 }
 0x703   : > { %2184 = vmatprep.subr.bf16.mxu1 %v2339_v9 }
 0x709   : > { %2173 = vmatmul.mubr.msk.bf16.vlgmr.msra.gmra.mxu1 %vm636_vm4, %v743_v5 }
 0x70a   : > { %2185 = vmatpush3.bf16.msra.mxu1 %v2284_v4  ;;  %2188 = vmatprep.mubr.msk.bf16.mxu1 %vm2340_vm1, %v2339_v9  ;;  %v2290_v4 = vld [vmem:[%s2734_s4 + $0x38] sm:$0xff]  }
 0x70b   : > { %2186 = vmatprep.subr.bf16.mxu1 %v2339_v9 }
 0x70e   : > { %2187 = vmatpush3.bf16.msra.mxu1 %v2285_v6  ;;  %v2291_v6 = vld [vmem:[%s2734_s4 + $0x30] sm:$0xff]  }
 0x70f   : > { %2200 = vmatprep.subr.bf16.mxu1 %v2339_v9 }
 0x711   : > { %2189 = vmatmul.mubr.msk.bf16.vlgmr.msra.gmra.mxu1 %vm391_vm0, %v2467_v27 }
 0x712   : > { %2202 = vmatprep.mubr.msk.bf16.mxu1 %vm2340_vm1, %v2339_v9 }
 0x7c1   : > { %v1042_v7 = vpop.f32.mrf.mxu1 }
 0x7c2   : > { %v1048_v10 = vpack.c.bf16 %v1042_v7, %v1042_v7  ;;  %v2292_v7 = vld [vmem:[%s2736_s6 + $0x38] sm:$0xff]  }
 0x7c3   : > { %v2162_v11 = vpop.f32.mrf.mxu1 }
 0x7c4   : > { %2167 = vmatmul.mubr.msk.bf16.vlgmr.msra.gmra.mxu0 %vm636_vm4, %v1048_v10  ;;  %v2294_v11 = vld [vmem:[%s2735_s5 + $0x38] sm:$0xff]  }
 0x7c5   : > { %v1045_v12 = vpop.f32.mrf.mxu1  ;;  %2177 = vmatpush3.bf16.msra.mxu0 %v2286_v8  ;;  %2180 = vmatprep.mubr.msk.bf16.mxu0 %vm2340_vm1, %v2339_v9  ;;  %v2293_v8 = vld [vmem:[%s2736_s6 + $0x30] sm:$0xff]  }
 0x7c6   : > { %2178 = vmatprep.subr.bf16.mxu0 %v2339_v9 }
 0x7c7   : > { %v2163_v14 = vpop.f32.mrf.mxu1 }
 0x7c9   : > { %v2604_v15 = vpop.f32.mrf.mxu1  ;;  %2179 = vmatpush3.bf16.msra.mxu0 %v2287_v13 }
 0x7ca   : > { %2192 = vmatprep.subr.bf16.mxu0 %v2339_v9 }
 0x7cb   : > { %v2174_v17 = vpop.f32.mrf.mxu1 }
 0x7cc   : > { %2181 = vmatmul.mubr.msk.bf16.vlgmr.msra.gmra.mxu0 %vm391_vm0, %v2467_v27 }
 0x7cd   : > { %v1140_v18 = vpop.f32.mrf.mxu1  ;;  %2193 = vmatpush3.bf16.msra.mxu0 %v2288_v16  ;;  %2196 = vmatprep.mubr.msk.bf16.mxu0 %vm2340_vm1, %v2339_v9  ;;  %v2295_v16 = vld [vmem:[%s2735_s5 + $0x30] sm:$0xff]  }
 0x7ce   : > { %2194 = vmatprep.subr.bf16.mxu0 %v2339_v9 }
 0x7cf   : > { %v2175_v20 = vpop.f32.mrf.mxu1 }
 0x7d1   : > { %v1268_v22 = vpop.f32.mrf.mxu1  ;;  %2195 = vmatpush3.bf16.msra.mxu0 %v2289_v19 }
 0x7d2   : > { %v1269_v23 = vadd.f32 %v1981_v21, %v1268_v22  ;;  %2206 = vmatprep.subr.bf16.mxu0 %v2339_v9  ;;  %v2021_v22 = vld [vmem:[%s2739_s9 + $0x3] ss:$0 sm:$0xff] }
 0x7d3   : > { %v2190_v24 = vpop.f32.mrf.mxu1 }
 0x7d4   : > { %v1340_v25 = vpack.c.bf16 %v1269_v23, %v1269_v23  ;;  %2197 = vmatmul.mubr.msk.bf16.vlgmr.msra.gmra.mxu0 %vm391_vm0, %v2467_v27 }
 0x7d5   : > { %v1271_v26 = vpop.f32.mrf.mxu1  ;;  %2208 = vmatprep.mubr.msk.bf16.mxu0 %vm2340_vm1, %v2339_v9 }
 0x7d6   : > { %v1345_v28 = vsel %vm636_vm4, %v1340_v25, 0 }
 0x7d7   : > { %v2191_v29 = vpop.f32.mrf.mxu1  ;;  %2201 = vmatpush3.bf16.xpose.msra.mxu1 %v1345_v28 }
 0x7d8   : > { %2212 = vmatprep.subr.bf16.mxu1 %v2339_v9 }
 0x884   : > { %v2628_v30 = vpop.f32.mrf.mxu0 }
 0x886   : > { %v2168_v31 = vpop.f32.mrf.mxu0 }
 0x888   : > { %v1094_v32 = vpop.f32.mrf.mxu0 }
 0x88a   : > { %v2169_v33 = vpop.f32.mrf.mxu0 }
 0x88c   : > { %v1202_v35 = vpop.f32.mrf.mxu0 }
 0x88d   : > { %v1203_v36 = vadd.f32 %v1972_v34, %v1202_v35 }
 0x88e   : > { %v2182_v37 = vpop.f32.mrf.mxu0 }
 0x88f   : > { %v1208_v38 = vmul.f32 0.35355338, %v1203_v36  ;;  %v2012_v37 = vld [vmem:[%s2738_s8 + $0x3] ss:$0 sm:$0xff] }
 0x890   : > { %v1205_v39 = vpop.f32.mrf.mxu0 }
 0x891   : > { %v1339_v40 = vpack.c.bf16 %v1208_v38, %v1208_v38  ;;  %v2003_v38 = vld [vmem:[%s2737_s7 + $0x3] ss:$0 sm:$0xff] }
 0x892   : > { %v2183_v41 = vpop.f32.mrf.mxu0 }
 0x893   : > { %2203 = vmatmul.mubr.msk.bf16.vlgmr.msra.gmra.mxu1 %vm636_vm4, %v1339_v40 }
 0x894   : > { %v1333_v43 = vpop.f32.mrf.mxu0  ;;  %2214 = vmatprep.mubr.msk.bf16.mxu1 %vm2340_vm1, %v2339_v9  ;;  %2213 = vmatpush3.bf16.msra.mxu1 %v1453_v63 }
 0x895   : > { %v1334_v44 = vadd.f32 %v1990_v42, %v1333_v43  ;;  %2226 = vmatprep.subr.bf16.mxu1 %v2339_v9 }
 0x896   : > { %v2198_v45 = vpop.f32.mrf.mxu0 }
 0x897   : > { %v1399_v46 = vpack.c.bf16 %v1334_v44, %v1334_v44 }
 0x898   : > { %v1336_v47 = vpop.f32.mrf.mxu0 }
 0x899   : > { %v1404_v48 = vsel %vm699_vm5, %v1399_v46, 0 }
 0x89a   : > { %v2199_v49 = vpop.f32.mrf.mxu0  ;;  %2207 = vmatpush3.bf16.msra.mxu0 %v1404_v48 }
 0x89b   : > { %2218 = vmatprep.subr.bf16.mxu0 %v2339_v9 }
 0x953   : > { %v1381_v50 = vpop.f32.mrf.mxu1 }
 0x954   : > { %v1382_v51 = vadd.f32 %v1381_v50, %v2527_v62 }
 0x955   : > { %v2204_v52 = vpop.f32.mrf.mxu1 }
 0x956   : > { %v1387_v53 = vsel %vm636_vm4, %v1382_v51, -inf }
 0x957   : > { %1388 = vmax.xlane.f32.xlu0 %v1387_v53  ;;  %v1384_v54 = vpop.f32.mrf.mxu1 }
 0x959   : > { %v2205_v55 = vpop.f32.mrf.mxu1 }
 0x9e0   : > { %v1389_v56 = vpop.xlane.xlu0 %1388 }
 0x9e1   : > { %v1390_v57 = vsub.f32 %v1382_v51, %v1389_v56 }
 0x9e3   : > { %v1391_v58 = vmul.f32 1.442695, %v1390_v57 }
 0x9e5   : > { %2308 = vpow2.f32 %v1391_v58 }
 0x9f2   : > { %v2309_v59 = vpop.eup %2308 }
 0x9f3   : > { %v1393_v60 = vsel %vm636_vm4, %v2309_v59, 0.0 }
 0x9f4   : > { %1394 = vadd.xlane.f32.xlu1 %v1393_v60 }
 0xa7d   : > { %v1395_v1 = vpop.xlane.xlu1 %1394 }
 0xa7e   : > { %2310 = vrcp.f32 %v1395_v1 }
 0xa8b   : > { %v2311_v2 = vpop.eup %2310 }
 0xa8c   : > { %v1397_v3 = vmul.f32 %v2311_v2, %v2309_v59 }
 0xa8e   : > { %v1398_v5 = vpack.c.bf16 %v1397_v3, %v1397_v3 }
 0xa90   : > { %2209 = vmatmul.mubr.msk.bf16.vlgmr.msra.gmra.mxu0 %vm636_vm4, %v1398_v5 }
 0xa91   : > { %2219 = vmatpush3.bf16.msra.mxu0 %v2290_v4  ;;  %2222 = vmatprep.mubr.msk.bf16.mxu0 %vm2340_vm1, %v2339_v9 }
 0xa92   : > { %2220 = vmatprep.subr.bf16.mxu0 %v2339_v9 }
 0xa95   : > { %2221 = vmatpush3.bf16.msra.mxu0 %v2291_v6  ;;  %v2029_v6 = vld [vmem:[%s2741_s11] ss:$0 sm:$0xff] }
 0xa96   : > { %2234 = vmatprep.subr.bf16.mxu0 %v2339_v9 }
 0xa98   : > { %2223 = vmatmul.mubr.msk.bf16.vlgmr.msra.gmra.mxu0 %vm391_vm0, %v2467_v27 }
 0xa99   : > { %2235 = vmatpush3.bf16.msra.mxu0 %v2292_v7  ;;  %2238 = vmatprep.mubr.msk.bf16.mxu0 %vm2340_vm1, %v2339_v9 }
 0xa9a   : > { %2236 = vmatprep.subr.bf16.mxu0 %v2339_v9 }
 0xa9d   : > { %2237 = vmatpush3.bf16.msra.mxu0 %v2293_v8 }
 0xa9e   : > { %2248 = vmatprep.subr.bf16.mxu0 %v2339_v9 }
 0xaa0   : > { %2239 = vmatmul.mubr.msk.bf16.vlgmr.msra.gmra.mxu0 %vm391_vm0, %v2467_v27 }
 0xaa1   : > { %2250 = vmatprep.mubr.msk.bf16.mxu0 %vm2340_vm1, %v2339_v9 }
 0xb50   : > { %v1440_v10 = vpop.f32.mrf.mxu0 }
 0xb51   : > { %v1446_v12 = vpack.c.bf16 %v1440_v10, %v1440_v10 }
 0xb52   : > { %v2210_v13 = vpop.f32.mrf.mxu0 }
 0xb53   : > { %2215 = vmatmul.mubr.msk.bf16.vlgmr.msra.gmra.mxu1 %vm636_vm4, %v1446_v12 }
 0xb54   : > { %v1443_v14 = vpop.f32.mrf.mxu0  ;;  %2227 = vmatpush3.bf16.msra.mxu1 %v2294_v11  ;;  %2230 = vmatprep.mubr.msk.bf16.mxu1 %vm2340_vm1, %v2339_v9 }
 0xb55   : > { %2228 = vmatprep.subr.bf16.mxu1 %v2339_v9 }
 0xb56   : > { %v2211_v17 = vpop.f32.mrf.mxu0 }
 0xb58   : > { %v1555_v18 = vpop.f32.mrf.mxu0  ;;  %2229 = vmatpush3.bf16.msra.mxu1 %v2295_v16 }
 0xb59   : > { %2242 = vmatprep.subr.bf16.mxu1 %v2339_v9  ;;  %v1556_v42 = vadd.f32 %v2003_v38, %v1555_v18 }
 0xb5a   : > { %v2224_v19 = vpop.f32.mrf.mxu0 }
 0xb5b   : > { %2231 = vmatmul.mubr.msk.bf16.vlgmr.msra.gmra.mxu1 %vm391_vm0, %v2467_v27  ;;  %v1138_v27 = vadd.f32 %v2604_v15, %v2628_v30  ;;  %v1561_v45 = vmul.f32 0.35355338, %v1556_v42 }
 0xb5c   : > { %v1558_v20 = vpop.f32.mrf.mxu0  ;;  %2244 = vmatprep.mubr.msk.bf16.mxu1 %vm2340_vm1, %v2339_v9 }
 0xb5d   : > { %v1692_v46 = vpack.c.bf16 %v1561_v45, %v1561_v45 }
 0xb5e   : > { %v2225_v21 = vpop.f32.mrf.mxu0 }
 0xb60   : > { %v1686_v23 = vpop.f32.mrf.mxu0 }
 0xb61   : > { %v1687_v24 = vadd.f32 %v2021_v22, %v1686_v23 }
 0xb62   : > { %v2240_v25 = vpop.f32.mrf.mxu0 }
 0xb63   : > { %v1752_v26 = vpack.c.bf16 %v1687_v24, %v1687_v24 }
 0xb64   : > { %v1689_v28 = vpop.f32.mrf.mxu0 }
 0xb65   : > { %v1757_v29 = vsel %vm699_vm5, %v1752_v26, 0 }
 0xb66   : > { %v2241_v31 = vpop.f32.mrf.mxu0  ;;  %2249 = vmatpush3.bf16.msra.mxu0 %v1757_v29 }
 0xc13   : > { %v1489_v32 = vpop.f32.mrf.mxu1 }
 0xc14   : > { %v1495_v33 = vadd.f32 %v1489_v32, %v1138_v27 }
 0xc15   : > { %v2216_v34 = vpop.f32.mrf.mxu1 }
 0xc17   : > { %v1492_v35 = vpop.f32.mrf.mxu1 }
 0xc19   : > { %v2217_v36 = vpop.f32.mrf.mxu1 }
 0xc1b   : > { %v1621_v39 = vpop.f32.mrf.mxu1 }
 0xc1c   : > { %v1622_v40 = vadd.f32 %v2012_v37, %v1621_v39 }
 0xc1d   : > { %v2232_v41 = vpop.f32.mrf.mxu1 }
 0xc1e   : > { %v1693_v43 = vpack.c.bf16 %v1622_v40, %v1622_v40 }
 0xc1f   : > { %v1624_v44 = vpop.f32.mrf.mxu1 }
 0xc20   : > { %v1698_v15 = vsel %vm636_vm4, %v1693_v43, 0 }
 0xc21   : > { %v2233_v30 = vpop.f32.mrf.mxu1  ;;  %2243 = vmatpush3.bf16.xpose.msra.mxu1 %v1698_v15 }
 0xc22   : > { %2254 = vmatprep.subr.bf16.mxu1 %v2339_v9 }
 0xc28   : > { %2245 = vmatmul.mubr.msk.bf16.vlgmr.msra.gmra.mxu1 %vm636_vm4, %v1692_v46 }
 0xc29   : > { %2256 = vmatprep.mubr.msk.bf16.mxu1 %vm2340_vm1, %v2339_v9  ;;  %v2027_v9 = vld [vmem:[%s2740_s10 + $0xc] sm:$0xf] }
 0xce8   : > { %v1734_v47 = vpop.f32.mrf.mxu1 }
 0xce9   : > { %v1735_v48 = vadd.f32 %v1734_v47, %v2527_v62  ;;  %v1806_v62 = vsel %vm699_vm5, %v2027_v9, 0 }
 0xcea   : > { %v2246_v49 = vpop.f32.mrf.mxu1  ;;  %2255 = vmatpush3.bf16.msra.mxu1 %v1806_v62 }
 0xceb   : > { %v1740_v50 = vsel %vm636_vm4, %v1735_v48, -inf }
 0xcec   : > { %1741 = vmax.xlane.f32.xlu0 %v1740_v50  ;;  %v1737_v51 = vpop.f32.mrf.mxu1 }
 0xcee   : > { %v2247_v52 = vpop.f32.mrf.mxu1 }
 0xd75   : > { %v1742_v53 = vpop.xlane.xlu0 %1741 }
 0xd76   : > { %v1743_v54 = vsub.f32 %v1735_v48, %v1742_v53 }
 0xd78   : > { %v1744_v55 = vmul.f32 1.442695, %v1743_v54 }
 0xd7a   : > { %2312 = vpow2.f32 %v1744_v55 }
 0xd87   : > { %v2313_v56 = vpop.eup %2312 }
 0xd88   : > { %v1746_v57 = vsel %vm636_vm4, %v2313_v56, 0.0 }
 0xd89   : > { %1747 = vadd.xlane.f32.xlu1 %v1746_v57 }
 0xe12   : > { %v1748_v58 = vpop.xlane.xlu1 %1747 }
 0xe13   : > { %2314 = vrcp.f32 %v1748_v58 }
 0xe20   : > { %v2315_v59 = vpop.eup %2314 }
 0xe21   : > { %v1750_v60 = vmul.f32 %v2315_v59, %v2313_v56 }
 0xe23   : > { %v1751_v61 = vpack.c.bf16 %v1750_v60, %v1750_v60 }
 0xe25   : > { %2251 = vmatmul.mubr.msk.bf16.vlgmr.msra.gmra.mxu0 %vm636_vm4, %v1751_v61 }
 0xee5   : > { %v1793_v63 = vpop.f32.mrf.mxu0 }
 0xee6   : > { %v1799_v1 = vpack.c.bf16 %v1793_v63, %v1793_v63 }
 0xee7   : > { %v2252_v2 = vpop.f32.mrf.mxu0 }
 0xee8   : > { %2257 = vmatmul.mubr.msk.bf16.vlgmr.msra.gmra.mxu1 %vm636_vm4, %v1799_v1 }
 0xee9   : > { %v1796_v3 = vpop.f32.mrf.mxu0 }
 0xeeb   : > { %v2253_v4 = vpop.f32.mrf.mxu0 }
 0xfa8   : > { %v1842_v5 = vpop.f32.mrf.mxu1 }
 0xfa9   : > { %v1848_v7 = vadd.f32 %v1842_v5, %v1495_v33 }
 0xfaa   : > { %v2258_v8 = vpop.f32.mrf.mxu1 }
 0xfab   : > { %v1856_v10 = vadd.f32 %v2029_v6, %v1848_v7 }
 0xfac   : > { %v1845_v11 = vpop.f32.mrf.mxu1 }
 0xfad   : > { %v1857_v12 = vadd.f32 %v1856_v10, %v2430_v0 }
 0xfae   : > { %v2259_v13 = vpop.f32.mrf.mxu1 }
 0xfaf   : > { %1858 = vst.msk [vmem:[%s388_s24] sm:$0xff] %vm391_vm0, %v1857_v12 }
 0xfb0 PF: > { %s28_s26 = sadd.s32 1, %s2336_s26  }
 0xfb1   : > { %p25_p9 = scmp.ge.s32.totalorder %s28_s26, 4  }
 0xfb3   :  { %27 = sbr.rel (!%p25_p9) target bundleno = 16 (0x10), region = 115 }

</bundles_post_ra>
